<compile_context>
chip_gen: v7x
topology: tpu7x:2x2x1
jax: 0.10.0
libtpu: 0.0.40
codegen_flags: <defaults>
</compile_context>

<pallas_src>
import functools

import numpy as np
import jax
import jax.numpy as jnp
from jax.experimental import pallas as pl
from jax.experimental.pallas import tpu as pltpu

# ----------------------------- static sizes --------------------------------
IH = 28          # input spatial (28x28, 1 channel)
C1 = 16          # conv1 out channels
PH = 14          # spatial after pool1
C2 = 32          # conv2 out channels
QH = 7           # spatial after pool2
FCH = 32         # fc1 hidden
NCLS = 10        # logits

ROW1 = IH * C1   # 448  conv1 activation row width (lanes = w*16 + c)
PROW1 = PH * C1  # 224  pool1 activation row width
ROW2 = PH * C2   # 448  conv2 activation row width (lanes = w*32 + c)
PROW2 = QH * C2  # 224  pool2 activation row width


# ------------------------------ fused kernel --------------------------------

def _fused_cnn_kernel(x_ref, m1_ref, b1_ref, m2_ref, b2_ref,
                      wf1_ref, bf1_ref, wf2_ref, bf2_ref, o_ref,
                      xv_ref, pm1_ref, pad2_ref, pm2_ref, p2_ref):
    f32 = jnp.float32

    # ---- stage the input with vertical zero padding: xv (30, 28) ----------
    xv_ref[0:1, :] = jnp.zeros((1, IH), f32)
    xv_ref[IH + 1:IH + 2, :] = jnp.zeros((1, IH), f32)
    xv_ref[1:1 + IH, :] = x_ref[...]

    # ---- conv1 + ReLU: a1 (28, 448), cols = w*16 + c -----------------------
    acc1 = jnp.dot(xv_ref[0:IH, :], m1_ref[0], preferred_element_type=f32)
    acc1 = acc1 + jnp.dot(xv_ref[1:1 + IH, :], m1_ref[1], preferred_element_type=f32)
    acc1 = acc1 + jnp.dot(xv_ref[2:2 + IH, :], m1_ref[2], preferred_element_type=f32)
    a1 = jnp.maximum(acc1 + b1_ref[...], 0.0)                      # (28, 448)

    # ---- pool1 (2x2, stride 2) -> vertically padded conv2 input (16, 224) --
    for h in range(PH):                                            # row pairs
        pm1_ref[h:h + 1, :] = jnp.maximum(a1[2 * h:2 * h + 1, :],
                                          a1[2 * h + 1:2 * h + 2, :])
    pad2_ref[0:1, :] = jnp.zeros((1, PROW1), f32)
    pad2_ref[PH + 1:PH + 2, :] = jnp.zeros((1, PROW1), f32)
    for w in range(PH):                                            # column pairs
        left = pm1_ref[:, (2 * w) * C1:(2 * w + 1) * C1]
        right = pm1_ref[:, (2 * w + 1) * C1:(2 * w + 2) * C1]
        pad2_ref[1:1 + PH, w * C1:(w + 1) * C1] = jnp.maximum(left, right)

    # ---- conv2 + ReLU: a2 (14, 448), cols = w*32 + c ------------------------
    acc2 = jnp.dot(pad2_ref[0:PH, :], m2_ref[0], preferred_element_type=f32)
    acc2 = acc2 + jnp.dot(pad2_ref[1:1 + PH, :], m2_ref[1], preferred_element_type=f32)
    acc2 = acc2 + jnp.dot(pad2_ref[2:2 + PH, :], m2_ref[2], preferred_element_type=f32)
    a2 = jnp.maximum(acc2 + b2_ref[...], 0.0)                      # (14, 448)

    # ---- pool2 (2x2, stride 2) -> p2 (7, 224), cols = w*32 + c --------------
    for h in range(QH):
        pm2_ref[h:h + 1, :] = jnp.maximum(a2[2 * h:2 * h + 1, :],
                                          a2[2 * h + 1:2 * h + 2, :])
    for w in range(QH):
        left = pm2_ref[:, (2 * w) * C2:(2 * w + 1) * C2]
        right = pm2_ref[:, (2 * w + 1) * C2:(2 * w + 2) * C2]
        p2_ref[:, w * C2:(w + 1) * C2] = jnp.maximum(left, right)

    # ---- fc1 + ReLU (flatten folded into wf1 row order) + fc2 ---------------
    acc3 = bf1_ref[...]                                            # (1, 32)
    for h in range(QH):
        acc3 = acc3 + jnp.dot(p2_ref[h:h + 1, :], wf1_ref[h],
                              preferred_element_type=f32)
    y1 = jnp.maximum(acc3, 0.0)                                    # (1, 32)
    y2 = jnp.dot(y1, wf2_ref[...], preferred_element_type=f32) + bf2_ref[...]
    o_ref[...] = y2.astype(o_ref.dtype)                            # (1, 10)


def cnn_forward(lowered, x_nchw):
    """Forward pass matching PyTorch CNN.forward, fused into one pallas_call."""
    B = x_nchw.shape[0]
    x = x_nchw.reshape(B, IH, IH).astype(jnp.float32)   # (B, 1, 28, 28) -> (B, 28, 28)

    c3 = lambda i: (0, 0, 0)
    c2 = lambda i: (0, 0)

    out = pl.pallas_call(
        _fused_cnn_kernel,
        out_shape=jax.ShapeDtypeStruct((B, 1, NCLS), jnp.float32),
        grid=(B,),
        in_specs=[
            pl.BlockSpec((None, IH, IH), lambda i: (i, 0, 0)),   # one image / step
            pl.BlockSpec((3, IH, ROW1), c3),                     # conv1 shifted-row mats
            pl.BlockSpec((1, ROW1), c2),                         # conv1 bias (tiled row)
            pl.BlockSpec((3, PROW1, ROW2), c3),                  # conv2 shifted-row mats
            pl.BlockSpec((1, ROW2), c2),                         # conv2 bias (tiled row)
            pl.BlockSpec((QH, PROW2, FCH), c3),                  # fc1 (row-permuted, per h)
            pl.BlockSpec((1, FCH), c2),                          # fc1 bias
            pl.BlockSpec((FCH, NCLS), c2),                       # fc2 weight
            pl.BlockSpec((1, NCLS), c2),                         # fc2 bias
        ],
        out_specs=pl.BlockSpec((None, 1, NCLS), lambda i: (i, 0, 0)),
        scratch_shapes=[
            pltpu.VMEM((IH + 2, IH), jnp.float32),    # xv   : padded input (30, 28)
            pltpu.VMEM((PH, ROW1), jnp.float32),      # pm1  : pool1 row-pass (14, 448)
            pltpu.VMEM((PH + 2, PROW1), jnp.float32), # pad2 : padded conv2 in (16, 224)
            pltpu.VMEM((QH, ROW2), jnp.float32),      # pm2  : pool2 row-pass (7, 448)
            pltpu.VMEM((QH, PROW2), jnp.float32),     # p2   : pool2 out (7, 224)
        ],
        compiler_params=pltpu.CompilerParams(
            dimension_semantics=("parallel",)),
    )(x, lowered["m1"], lowered["b1"], lowered["m2"], lowered["b2"],
      lowered["wf1"], lowered["bf1"], lowered["wf2"], lowered["bf2"])
    return out.reshape(B, NCLS)


# ------------------------ parameters (PyTorch layout) ------------------------

def init_params(key):
    ks = jax.random.split(key, 8)

    def u(k, shape, fan_in):
        bound = 1.0 / np.sqrt(float(fan_in))
        return jax.random.uniform(k, shape, jnp.float32, -bound, bound)

    return {
        "conv1_w": u(ks[0], (C1, 1, 3, 3), 1 * 9),
        "conv1_b": u(ks[1], (C1,), 1 * 9),
        "conv2_w": u(ks[2], (C2, C1, 3, 3), C1 * 9),
        "conv2_b": u(ks[3], (C2,), C1 * 9),
        "fc1_w": u(ks[4], (FCH, C2 * QH * QH), C2 * QH * QH),
        "fc1_b": u(ks[5], (FCH,), C2 * QH * QH),
        "fc2_w": u(ks[6], (NCLS, FCH), FCH),
        "fc2_b": u(ks[7], (NCLS,), FCH),
    }


def lower_params(params):
    """One-time host-side lowering of PyTorch-layout weights into the matrices
    consumed by the fused kernel (shifted-row/Toeplitz conv matrices, tiled
    bias rows, flatten-order-permuted fc1)."""
    w1 = np.asarray(params["conv1_w"], np.float32)   # (16, 1, 3, 3)
    b1 = np.asarray(params["conv1_b"], np.float32)
    w2 = np.asarray(params["conv2_w"], np.float32)   # (32, 16, 3, 3)
    b2 = np.asarray(params["conv2_b"], np.float32)
    f1w = np.asarray(params["fc1_w"], np.float32)    # (32, 1568)
    f1b = np.asarray(params["fc1_b"], np.float32)
    f2w = np.asarray(params["fc2_w"], np.float32)    # (10, 32)
    f2b = np.asarray(params["fc2_b"], np.float32)

    # conv1: a1[h, w*16+c] = sum_di xv[h+di, :] @ m1[di]
    m1 = np.zeros((3, IH, ROW1), np.float32)
    for di in range(3):
        for dj in range(3):
            for w in range(IH):
                j = w + dj - 1
                if 0 <= j < IH:
                    m1[di, j, w * C1:(w + 1) * C1] = w1[:, 0, di, dj]
    b1row = np.tile(b1, IH)[None, :]                 # (1, 448): [w*16+c] = b1[c]

    # conv2: a2[h, w*32+c] = sum_di pad2[h+di, :] @ m2[di]
    m2 = np.zeros((3, PROW1, ROW2), np.float32)
    for di in range(3):
        for dj in range(3):
            for w in range(PH):
                j = w + dj - 1
                if 0 <= j < PH:
                    m2[di, j * C1:(j + 1) * C1, w * C2:(w + 1) * C2] = w2[:, :, di, dj].T
    b2row = np.tile(b2, PH)[None, :]                 # (1, 448): [w*32+c] = b2[c]

    # fc1: permute rows so the kernel's (h, w*32+c) order matches PyTorch's
    # NCHW view(-1, 32*7*7) order (c*49 + h*7 + w).
    wf1 = (f1w.reshape(FCH, C2, QH, QH)              # (n, c, h, w)
              .transpose(2, 3, 1, 0)                 # (h, w, c, n)
              .reshape(QH, QH * C2, FCH))            # (h, w*32+c, n)

    return {
        "m1": jnp.asarray(m1), "b1": jnp.asarray(b1row),
        "m2": jnp.asarray(m2), "b2": jnp.asarray(b2row),
        "wf1": jnp.asarray(wf1), "bf1": jnp.asarray(f1b)[None, :],
        "wf2": jnp.asarray(f2w.T), "bf2": jnp.asarray(f2b)[None, :],
    }


# --------------------------- pure-JAX reference ------------------------------

def reference_forward(params, x_nchw):
    hp = jax.lax.Precision.HIGHEST
    x = x_nchw.astype(jnp.float32)

    def conv3x3(inp, w, b):                          # inp (B, Cin, H, W)
        Hh, Ww = inp.shape[2], inp.shape[3]
        xp = jnp.pad(inp, ((0, 0), (0, 0), (1, 1), (1, 1)))
        out = b[None, :, None, None]
        for di in range(3):
            for dj in range(3):
                out = out + jnp.einsum("bihw,oi->bohw",
                                       xp[:, :, di:di + Hh, dj:dj + Ww],
                                       w[:, :, di, dj], precision=hp)
        return out

    def pool2x2(a):
        return jax.lax.reduce_window(a, -jnp.inf, jax.lax.max,
                                     (1, 1, 2, 2), (1, 1, 2, 2), "VALID")

    a = pool2x2(jax.nn.relu(conv3x3(x, params["conv1_w"], params["conv1_b"])))
    a = pool2x2(jax.nn.relu(conv3x3(a, params["conv2_w"], params["conv2_b"])))
    a = a.reshape(a.shape[0], C2 * QH * QH)
    a = jax.nn.relu(jnp.dot(a, params["fc1_w"].T, precision=hp) + params["fc1_b"])
    return jnp.dot(a, params["fc2_w"].T, precision=hp) + params["fc2_b"]


# ----------------------------------- main ------------------------------------

if __name__ == "__main__":
    key = jax.random.PRNGKey(0)
    pkey, xkey = jax.random.split(key)
    params = init_params(pkey)
    lowered = lower_params(params)

    # Input shape is fixed to 28x28 by fc1 = Linear(32*7*7, 32); batch = 2.
    x = jax.random.normal(xkey, (2, 1, 28, 28), dtype=jnp.float32)

    logits = jax.block_until_ready(jax.jit(cnn_forward)(lowered, x))
    ref = jax.block_until_ready(jax.jit(reference_forward)(params, x))

    assert logits.shape == (2, 10), logits.shape
    assert bool(jnp.all(jnp.isfinite(logits)))
    np.testing.assert_allclose(np.asarray(logits), np.asarray(ref),
                               rtol=2e-2, atol=2e-2)
    print("KERNEL_OK")
</pallas_src>

<mosaic_0001>
module attributes {stable_mosaic.version = 11 : i64} {
  func.func @_fused_cnn_kernel(%arg0: i32, %arg1: memref<1x28x28xf32, #tpu.memory_space<vmem>>, %arg2: memref<3x28x448xf32, #tpu.memory_space<vmem>>, %arg3: memref<1x448xf32, #tpu.memory_space<vmem>>, %arg4: memref<3x224x448xf32, #tpu.memory_space<vmem>>, %arg5: memref<1x448xf32, #tpu.memory_space<vmem>>, %arg6: memref<7x224x32xf32, #tpu.memory_space<vmem>>, %arg7: memref<1x32xf32, #tpu.memory_space<vmem>>, %arg8: memref<32x10xf32, #tpu.memory_space<vmem>>, %arg9: memref<1x10xf32, #tpu.memory_space<vmem>>, %arg10: memref<1x1x10xf32, #tpu.memory_space<vmem>>, %arg11: memref<30x28xf32, #tpu.memory_space<vmem>>, %arg12: memref<14x448xf32, #tpu.memory_space<vmem>>, %arg13: memref<16x224xf32, #tpu.memory_space<vmem>>, %arg14: memref<7x448xf32, #tpu.memory_space<vmem>>, %arg15: memref<7x224xf32, #tpu.memory_space<vmem>>) attributes {dimension_semantics = [#tpu.dimension_semantics<parallel>], iteration_bounds = array<i64: 2>, scalar_prefetch = 0 : i64, scratch_operands = 5 : i64, tpu.core_type = #tpu.core_type<tc>, window_params = [{transform_indices = @transform_0, window_bounds = array<i64: 1, 28, 28>}, {pipeline_mode = #tpu.pipeline_mode<synchronous>, transform_indices = @transform_1, window_bounds = array<i64: 3, 28, 448>}, {pipeline_mode = #tpu.pipeline_mode<synchronous>, transform_indices = @transform_2, window_bounds = array<i64: 1, 448>}, {pipeline_mode = #tpu.pipeline_mode<synchronous>, transform_indices = @transform_3, window_bounds = array<i64: 3, 224, 448>}, {pipeline_mode = #tpu.pipeline_mode<synchronous>, transform_indices = @transform_4, window_bounds = array<i64: 1, 448>}, {pipeline_mode = #tpu.pipeline_mode<synchronous>, transform_indices = @transform_5, window_bounds = array<i64: 7, 224, 32>}, {pipeline_mode = #tpu.pipeline_mode<synchronous>, transform_indices = @transform_6, window_bounds = array<i64: 1, 32>}, {pipeline_mode = #tpu.pipeline_mode<synchronous>, transform_indices = @transform_7, window_bounds = array<i64: 32, 10>}, {pipeline_mode = #tpu.pipeline_mode<synchronous>, transform_indices = @transform_8, window_bounds = array<i64: 1, 10>}, {transform_indices = @transform_9, window_bounds = array<i64: 1, 1, 10>}]} {
    %cst = arith.constant 0.000000e+00 : f32
    %0 = vector.broadcast %cst : f32 to vector<1x28xf32>
    %c0 = arith.constant 0 : index
    %c0_0 = arith.constant 0 : index
    %1 = vector.load %arg11[%c0, %c0_0] : memref<30x28xf32, #tpu.memory_space<vmem>>, vector<1x28xf32>
    tpu.vector_store %arg11[%c0, %c0_0], %0 {strides = array<i32>} : memref<30x28xf32, #tpu.memory_space<vmem>>, vector<1x28xf32>,
    %cst_1 = arith.constant 0.000000e+00 : f32
    %2 = vector.broadcast %cst_1 : f32 to vector<1x28xf32>
    %c29 = arith.constant 29 : index
    %c0_2 = arith.constant 0 : index
    %3 = vector.load %arg11[%c29, %c0_2] : memref<30x28xf32, #tpu.memory_space<vmem>>, vector<1x28xf32>
    tpu.vector_store %arg11[%c29, %c0_2], %2 {strides = array<i32>} : memref<30x28xf32, #tpu.memory_space<vmem>>, vector<1x28xf32>,
    %c0_3 = arith.constant 0 : index
    %c0_4 = arith.constant 0 : index
    %c0_5 = arith.constant 0 : index
    %4 = vector.load %arg1[%c0_3, %c0_4, %c0_5] : memref<1x28x28xf32, #tpu.memory_space<vmem>>, vector<1x28x28xf32>
    %5 = vector.shape_cast %4 : vector<1x28x28xf32> to vector<28x28xf32>
    %c1 = arith.constant 1 : index
    %c0_6 = arith.constant 0 : index
    %6 = vector.load %arg11[%c1, %c0_6] : memref<30x28xf32, #tpu.memory_space<vmem>>, vector<28x28xf32>
    tpu.vector_store %arg11[%c1, %c0_6], %5 {strides = array<i32>} : memref<30x28xf32, #tpu.memory_space<vmem>>, vector<28x28xf32>,
    %c0_7 = arith.constant 0 : index
    %c0_8 = arith.constant 0 : index
    %7 = vector.load %arg11[%c0_7, %c0_8] : memref<30x28xf32, #tpu.memory_space<vmem>>, vector<28x28xf32>
    %c0_9 = arith.constant 0 : index
    %c0_10 = arith.constant 0 : index
    %c0_11 = arith.constant 0 : index
    %8 = vector.load %arg2[%c0_9, %c0_10, %c0_11] : memref<3x28x448xf32, #tpu.memory_space<vmem>>, vector<1x28x448xf32>
    %9 = vector.shape_cast %8 : vector<1x28x448xf32> to vector<28x448xf32>
    %cst_12 = arith.constant dense<0.000000e+00> : vector<28x448xf32>
    %10 = tpu.matmul %7, %9, %cst_12 {dimension_numbers = #tpu.dot_dimension_numbers<[1], [0], [0], [1], [0, 0, 1, 1], [], []>} : vector<28x28xf32>, vector<28x448xf32>, vector<28x448xf32> -> vector<28x448xf32>
    %c1_13 = arith.constant 1 : index
    %c0_14 = arith.constant 0 : index
    %11 = vector.load %arg11[%c1_13, %c0_14] : memref<30x28xf32, #tpu.memory_space<vmem>>, vector<28x28xf32>
    %c1_15 = arith.constant 1 : index
    %c0_16 = arith.constant 0 : index
    %c0_17 = arith.constant 0 : index
    %12 = vector.load %arg2[%c1_15, %c0_16, %c0_17] : memref<3x28x448xf32, #tpu.memory_space<vmem>>, vector<1x28x448xf32>
    %13 = vector.shape_cast %12 : vector<1x28x448xf32> to vector<28x448xf32>
    %cst_18 = arith.constant dense<0.000000e+00> : vector<28x448xf32>
    %14 = tpu.matmul %11, %13, %cst_18 {dimension_numbers = #tpu.dot_dimension_numbers<[1], [0], [0], [1], [0, 0, 1, 1], [], []>} : vector<28x28xf32>, vector<28x448xf32>, vector<28x448xf32> -> vector<28x448xf32>
    %15 = arith.addf %10, %14 : vector<28x448xf32>
    %c2 = arith.constant 2 : index
    %c0_19 = arith.constant 0 : index
    %16 = vector.load %arg11[%c2, %c0_19] : memref<30x28xf32, #tpu.memory_space<vmem>>, vector<28x28xf32>
    %c2_20 = arith.constant 2 : index
    %c0_21 = arith.constant 0 : index
    %c0_22 = arith.constant 0 : index
    %17 = vector.load %arg2[%c2_20, %c0_21, %c0_22] : memref<3x28x448xf32, #tpu.memory_space<vmem>>, vector<1x28x448xf32>
    %18 = vector.shape_cast %17 : vector<1x28x448xf32> to vector<28x448xf32>
    %cst_23 = arith.constant dense<0.000000e+00> : vector<28x448xf32>
    %19 = tpu.matmul %16, %18, %cst_23 {dimension_numbers = #tpu.dot_dimension_numbers<[1], [0], [0], [1], [0, 0, 1, 1], [], []>} : vector<28x28xf32>, vector<28x448xf32>, vector<28x448xf32> -> vector<28x448xf32>
    %20 = arith.addf %15, %19 : vector<28x448xf32>
    %c0_24 = arith.constant 0 : index
    %c0_25 = arith.constant 0 : index
    %21 = vector.load %arg3[%c0_24, %c0_25] : memref<1x448xf32, #tpu.memory_space<vmem>>, vector<1x448xf32>
    %22 = vector.broadcast %21 : vector<1x448xf32> to vector<28x448xf32>
    %23 = arith.addf %20, %22 : vector<28x448xf32>
    %cst_26 = arith.constant 0.000000e+00 : f32
    %24 = vector.broadcast %cst_26 : f32 to vector<28x448xf32>
    %25 = arith.maximumf %23, %24 : vector<28x448xf32>
    %26 = vector.extract_strided_slice %25 {offsets = [0, 0], sizes = [1, 448], strides = [1, 1]} : vector<28x448xf32> to vector<1x448xf32>
    %27 = vector.extract_strided_slice %25 {offsets = [1, 0], sizes = [1, 448], strides = [1, 1]} : vector<28x448xf32> to vector<1x448xf32>
    %28 = arith.maximumf %26, %27 : vector<1x448xf32>
    %c0_27 = arith.constant 0 : index
    %c0_28 = arith.constant 0 : index
    %29 = vector.load %arg12[%c0_27, %c0_28] : memref<14x448xf32, #tpu.memory_space<vmem>>, vector<1x448xf32>
    tpu.vector_store %arg12[%c0_27, %c0_28], %28 {strides = array<i32>} : memref<14x448xf32, #tpu.memory_space<vmem>>, vector<1x448xf32>,
    %30 = vector.extract_strided_slice %25 {offsets = [2, 0], sizes = [1, 448], strides = [1, 1]} : vector<28x448xf32> to vector<1x448xf32>
    %31 = vector.extract_strided_slice %25 {offsets = [3, 0], sizes = [1, 448], strides = [1, 1]} : vector<28x448xf32> to vector<1x448xf32>
    %32 = arith.maximumf %30, %31 : vector<1x448xf32>
    %c1_29 = arith.constant 1 : index
    %c0_30 = arith.constant 0 : index
    %33 = vector.load %arg12[%c1_29, %c0_30] : memref<14x448xf32, #tpu.memory_space<vmem>>, vector<1x448xf32>
    tpu.vector_store %arg12[%c1_29, %c0_30], %32 {strides = array<i32>} : memref<14x448xf32, #tpu.memory_space<vmem>>, vector<1x448xf32>,
    %34 = vector.extract_strided_slice %25 {offsets = [4, 0], sizes = [1, 448], strides = [1, 1]} : vector<28x448xf32> to vector<1x448xf32>
    %35 = vector.extract_strided_slice %25 {offsets = [5, 0], sizes = [1, 448], strides = [1, 1]} : vector<28x448xf32> to vector<1x448xf32>
    %36 = arith.maximumf %34, %35 : vector<1x448xf32>
    %c2_31 = arith.constant 2 : index
    %c0_32 = arith.constant 0 : index
    %37 = vector.load %arg12[%c2_31, %c0_32] : memref<14x448xf32, #tpu.memory_space<vmem>>, vector<1x448xf32>
    tpu.vector_store %arg12[%c2_31, %c0_32], %36 {strides = array<i32>} : memref<14x448xf32, #tpu.memory_space<vmem>>, vector<1x448xf32>,
    %38 = vector.extract_strided_slice %25 {offsets = [6, 0], sizes = [1, 448], strides = [1, 1]} : vector<28x448xf32> to vector<1x448xf32>
    %39 = vector.extract_strided_slice %25 {offsets = [7, 0], sizes = [1, 448], strides = [1, 1]} : vector<28x448xf32> to vector<1x448xf32>
    %40 = arith.maximumf %38, %39 : vector<1x448xf32>
    %c3 = arith.constant 3 : index
    %c0_33 = arith.constant 0 : index
    %41 = vector.load %arg12[%c3, %c0_33] : memref<14x448xf32, #tpu.memory_space<vmem>>, vector<1x448xf32>
    tpu.vector_store %arg12[%c3, %c0_33], %40 {strides = array<i32>} : memref<14x448xf32, #tpu.memory_space<vmem>>, vector<1x448xf32>,
    %42 = vector.extract_strided_slice %25 {offsets = [8, 0], sizes = [1, 448], strides = [1, 1]} : vector<28x448xf32> to vector<1x448xf32>
    %43 = vector.extract_strided_slice %25 {offsets = [9, 0], sizes = [1, 448], strides = [1, 1]} : vector<28x448xf32> to vector<1x448xf32>
    %44 = arith.maximumf %42, %43 : vector<1x448xf32>
    %c4 = arith.constant 4 : index
    %c0_34 = arith.constant 0 : index
    %45 = vector.load %arg12[%c4, %c0_34] : memref<14x448xf32, #tpu.memory_space<vmem>>, vector<1x448xf32>
    tpu.vector_store %arg12[%c4, %c0_34], %44 {strides = array<i32>} : memref<14x448xf32, #tpu.memory_space<vmem>>, vector<1x448xf32>,
    %46 = vector.extract_strided_slice %25 {offsets = [10, 0], sizes = [1, 448], strides = [1, 1]} : vector<28x448xf32> to vector<1x448xf32>
    %47 = vector.extract_strided_slice %25 {offsets = [11, 0], sizes = [1, 448], strides = [1, 1]} : vector<28x448xf32> to vector<1x448xf32>
    %48 = arith.maximumf %46, %47 : vector<1x448xf32>
    %c5 = arith.constant 5 : index
    %c0_35 = arith.constant 0 : index
    %49 = vector.load %arg12[%c5, %c0_35] : memref<14x448xf32, #tpu.memory_space<vmem>>, vector<1x448xf32>
    tpu.vector_store %arg12[%c5, %c0_35], %48 {strides = array<i32>} : memref<14x448xf32, #tpu.memory_space<vmem>>, vector<1x448xf32>,
    %50 = vector.extract_strided_slice %25 {offsets = [12, 0], sizes = [1, 448], strides = [1, 1]} : vector<28x448xf32> to vector<1x448xf32>
    %51 = vector.extract_strided_slice %25 {offsets = [13, 0], sizes = [1, 448], strides = [1, 1]} : vector<28x448xf32> to vector<1x448xf32>
    %52 = arith.maximumf %50, %51 : vector<1x448xf32>
    %c6 = arith.constant 6 : index
    %c0_36 = arith.constant 0 : index
    %53 = vector.load %arg12[%c6, %c0_36] : memref<14x448xf32, #tpu.memory_space<vmem>>, vector<1x448xf32>
    tpu.vector_store %arg12[%c6, %c0_36], %52 {strides = array<i32>} : memref<14x448xf32, #tpu.memory_space<vmem>>, vector<1x448xf32>,
    %54 = vector.extract_strided_slice %25 {offsets = [14, 0], sizes = [1, 448], strides = [1, 1]} : vector<28x448xf32> to vector<1x448xf32>
    %55 = vector.extract_strided_slice %25 {offsets = [15, 0], sizes = [1, 448], strides = [1, 1]} : vector<28x448xf32> to vector<1x448xf32>
    %56 = arith.maximumf %54, %55 : vector<1x448xf32>
    %c7 = arith.constant 7 : index
    %c0_37 = arith.constant 0 : index
    %57 = vector.load %arg12[%c7, %c0_37] : memref<14x448xf32, #tpu.memory_space<vmem>>, vector<1x448xf32>
    tpu.vector_store %arg12[%c7, %c0_37], %56 {strides = array<i32>} : memref<14x448xf32, #tpu.memory_space<vmem>>, vector<1x448xf32>,
    %58 = vector.extract_strided_slice %25 {offsets = [16, 0], sizes = [1, 448], strides = [1, 1]} : vector<28x448xf32> to vector<1x448xf32>
    %59 = vector.extract_strided_slice %25 {offsets = [17, 0], sizes = [1, 448], strides = [1, 1]} : vector<28x448xf32> to vector<1x448xf32>
    %60 = arith.maximumf %58, %59 : vector<1x448xf32>
    %c8 = arith.constant 8 : index
    %c0_38 = arith.constant 0 : index
    %61 = vector.load %arg12[%c8, %c0_38] : memref<14x448xf32, #tpu.memory_space<vmem>>, vector<1x448xf32>
    tpu.vector_store %arg12[%c8, %c0_38], %60 {strides = array<i32>} : memref<14x448xf32, #tpu.memory_space<vmem>>, vector<1x448xf32>,
    %62 = vector.extract_strided_slice %25 {offsets = [18, 0], sizes = [1, 448], strides = [1, 1]} : vector<28x448xf32> to vector<1x448xf32>
    %63 = vector.extract_strided_slice %25 {offsets = [19, 0], sizes = [1, 448], strides = [1, 1]} : vector<28x448xf32> to vector<1x448xf32>
    %64 = arith.maximumf %62, %63 : vector<1x448xf32>
    %c9 = arith.constant 9 : index
    %c0_39 = arith.constant 0 : index
    %65 = vector.load %arg12[%c9, %c0_39] : memref<14x448xf32, #tpu.memory_space<vmem>>, vector<1x448xf32>
    tpu.vector_store %arg12[%c9, %c0_39], %64 {strides = array<i32>} : memref<14x448xf32, #tpu.memory_space<vmem>>, vector<1x448xf32>,
    %66 = vector.extract_strided_slice %25 {offsets = [20, 0], sizes = [1, 448], strides = [1, 1]} : vector<28x448xf32> to vector<1x448xf32>
    %67 = vector.extract_strided_slice %25 {offsets = [21, 0], sizes = [1, 448], strides = [1, 1]} : vector<28x448xf32> to vector<1x448xf32>
    %68 = arith.maximumf %66, %67 : vector<1x448xf32>
    %c10 = arith.constant 10 : index
    %c0_40 = arith.constant 0 : index
    %69 = vector.load %arg12[%c10, %c0_40] : memref<14x448xf32, #tpu.memory_space<vmem>>, vector<1x448xf32>
    tpu.vector_store %arg12[%c10, %c0_40], %68 {strides = array<i32>} : memref<14x448xf32, #tpu.memory_space<vmem>>, vector<1x448xf32>,
    %70 = vector.extract_strided_slice %25 {offsets = [22, 0], sizes = [1, 448], strides = [1, 1]} : vector<28x448xf32> to vector<1x448xf32>
    %71 = vector.extract_strided_slice %25 {offsets = [23, 0], sizes = [1, 448], strides = [1, 1]} : vector<28x448xf32> to vector<1x448xf32>
    %72 = arith.maximumf %70, %71 : vector<1x448xf32>
    %c11 = arith.constant 11 : index
    %c0_41 = arith.constant 0 : index
    %73 = vector.load %arg12[%c11, %c0_41] : memref<14x448xf32, #tpu.memory_space<vmem>>, vector<1x448xf32>
    tpu.vector_store %arg12[%c11, %c0_41], %72 {strides = array<i32>} : memref<14x448xf32, #tpu.memory_space<vmem>>, vector<1x448xf32>,
    %74 = vector.extract_strided_slice %25 {offsets = [24, 0], sizes = [1, 448], strides = [1, 1]} : vector<28x448xf32> to vector<1x448xf32>
    %75 = vector.extract_strided_slice %25 {offsets = [25, 0], sizes = [1, 448], strides = [1, 1]} : vector<28x448xf32> to vector<1x448xf32>
    %76 = arith.maximumf %74, %75 : vector<1x448xf32>
    %c12 = arith.constant 12 : index
    %c0_42 = arith.constant 0 : index
    %77 = vector.load %arg12[%c12, %c0_42] : memref<14x448xf32, #tpu.memory_space<vmem>>, vector<1x448xf32>
    tpu.vector_store %arg12[%c12, %c0_42], %76 {strides = array<i32>} : memref<14x448xf32, #tpu.memory_space<vmem>>, vector<1x448xf32>,
    %78 = vector.extract_strided_slice %25 {offsets = [26, 0], sizes = [1, 448], strides = [1, 1]} : vector<28x448xf32> to vector<1x448xf32>
    %79 = vector.extract_strided_slice %25 {offsets = [27, 0], sizes = [1, 448], strides = [1, 1]} : vector<28x448xf32> to vector<1x448xf32>
    %80 = arith.maximumf %78, %79 : vector<1x448xf32>
    %c13 = arith.constant 13 : index
    %c0_43 = arith.constant 0 : index
    %81 = vector.load %arg12[%c13, %c0_43] : memref<14x448xf32, #tpu.memory_space<vmem>>, vector<1x448xf32>
    tpu.vector_store %arg12[%c13, %c0_43], %80 {strides = array<i32>} : memref<14x448xf32, #tpu.memory_space<vmem>>, vector<1x448xf32>,
    %cst_44 = arith.constant 0.000000e+00 : f32
    %82 = vector.broadcast %cst_44 : f32 to vector<1x224xf32>
    %c0_45 = arith.constant 0 : index
    %c0_46 = arith.constant 0 : index
    %83 = vector.load %arg13[%c0_45, %c0_46] : memref<16x224xf32, #tpu.memory_space<vmem>>, vector<1x224xf32>
    tpu.vector_store %arg13[%c0_45, %c0_46], %82 {strides = array<i32>} : memref<16x224xf32, #tpu.memory_space<vmem>>, vector<1x224xf32>,
    %cst_47 = arith.constant 0.000000e+00 : f32
    %84 = vector.broadcast %cst_47 : f32 to vector<1x224xf32>
    %c15 = arith.constant 15 : index
    %c0_48 = arith.constant 0 : index
    %85 = vector.load %arg13[%c15, %c0_48] : memref<16x224xf32, #tpu.memory_space<vmem>>, vector<1x224xf32>
    tpu.vector_store %arg13[%c15, %c0_48], %84 {strides = array<i32>} : memref<16x224xf32, #tpu.memory_space<vmem>>, vector<1x224xf32>,
    %c0_49 = arith.constant 0 : index
    %c0_50 = arith.constant 0 : index
    %86 = vector.load %arg12[%c0_49, %c0_50] : memref<14x448xf32, #tpu.memory_space<vmem>>, vector<14x16xf32>
    %c0_51 = arith.constant 0 : index
    %c16 = arith.constant 16 : index
    %87 = vector.load %arg12[%c0_51, %c16] : memref<14x448xf32, #tpu.memory_space<vmem>>, vector<14x16xf32>
    %88 = arith.maximumf %86, %87 : vector<14x16xf32>
    %c1_52 = arith.constant 1 : index
    %c0_53 = arith.constant 0 : index
    %89 = vector.load %arg13[%c1_52, %c0_53] : memref<16x224xf32, #tpu.memory_space<vmem>>, vector<14x16xf32>
    tpu.vector_store %arg13[%c1_52, %c0_53], %88 {strides = array<i32>} : memref<16x224xf32, #tpu.memory_space<vmem>>, vector<14x16xf32>,
    %c0_54 = arith.constant 0 : index
    %c32 = arith.constant 32 : index
    %90 = vector.load %arg12[%c0_54, %c32] : memref<14x448xf32, #tpu.memory_space<vmem>>, vector<14x16xf32>
    %c0_55 = arith.constant 0 : index
    %c48 = arith.constant 48 : index
    %91 = vector.load %arg12[%c0_55, %c48] : memref<14x448xf32, #tpu.memory_space<vmem>>, vector<14x16xf32>
    %92 = arith.maximumf %90, %91 : vector<14x16xf32>
    %c1_56 = arith.constant 1 : index
    %c16_57 = arith.constant 16 : index
    %93 = vector.load %arg13[%c1_56, %c16_57] : memref<16x224xf32, #tpu.memory_space<vmem>>, vector<14x16xf32>
    tpu.vector_store %arg13[%c1_56, %c16_57], %92 {strides = array<i32>} : memref<16x224xf32, #tpu.memory_space<vmem>>, vector<14x16xf32>,
    %c0_58 = arith.constant 0 : index
    %c64 = arith.constant 64 : index
    %94 = vector.load %arg12[%c0_58, %c64] : memref<14x448xf32, #tpu.memory_space<vmem>>, vector<14x16xf32>
    %c0_59 = arith.constant 0 : index
    %c80 = arith.constant 80 : index
    %95 = vector.load %arg12[%c0_59, %c80] : memref<14x448xf32, #tpu.memory_space<vmem>>, vector<14x16xf32>
    %96 = arith.maximumf %94, %95 : vector<14x16xf32>
    %c1_60 = arith.constant 1 : index
    %c32_61 = arith.constant 32 : index
    %97 = vector.load %arg13[%c1_60, %c32_61] : memref<16x224xf32, #tpu.memory_space<vmem>>, vector<14x16xf32>
    tpu.vector_store %arg13[%c1_60, %c32_61], %96 {strides = array<i32>} : memref<16x224xf32, #tpu.memory_space<vmem>>, vector<14x16xf32>,
    %c0_62 = arith.constant 0 : index
    %c96 = arith.constant 96 : index
    %98 = vector.load %arg12[%c0_62, %c96] : memref<14x448xf32, #tpu.memory_space<vmem>>, vector<14x16xf32>
    %c0_63 = arith.constant 0 : index
    %c112 = arith.constant 112 : index
    %99 = vector.load %arg12[%c0_63, %c112] : memref<14x448xf32, #tpu.memory_space<vmem>>, vector<14x16xf32>
    %100 = arith.maximumf %98, %99 : vector<14x16xf32>
    %c1_64 = arith.constant 1 : index
    %c48_65 = arith.constant 48 : index
    %101 = vector.load %arg13[%c1_64, %c48_65] : memref<16x224xf32, #tpu.memory_space<vmem>>, vector<14x16xf32>
    tpu.vector_store %arg13[%c1_64, %c48_65], %100 {strides = array<i32>} : memref<16x224xf32, #tpu.memory_space<vmem>>, vector<14x16xf32>,
    %c0_66 = arith.constant 0 : index
    %c128 = arith.constant 128 : index
    %102 = vector.load %arg12[%c0_66, %c128] : memref<14x448xf32, #tpu.memory_space<vmem>>, vector<14x16xf32>
    %c0_67 = arith.constant 0 : index
    %c144 = arith.constant 144 : index
    %103 = vector.load %arg12[%c0_67, %c144] : memref<14x448xf32, #tpu.memory_space<vmem>>, vector<14x16xf32>
    %104 = arith.maximumf %102, %103 : vector<14x16xf32>
    %c1_68 = arith.constant 1 : index
    %c64_69 = arith.constant 64 : index
    %105 = vector.load %arg13[%c1_68, %c64_69] : memref<16x224xf32, #tpu.memory_space<vmem>>, vector<14x16xf32>
    tpu.vector_store %arg13[%c1_68, %c64_69], %104 {strides = array<i32>} : memref<16x224xf32, #tpu.memory_space<vmem>>, vector<14x16xf32>,
    %c0_70 = arith.constant 0 : index
    %c160 = arith.constant 160 : index
    %106 = vector.load %arg12[%c0_70, %c160] : memref<14x448xf32, #tpu.memory_space<vmem>>, vector<14x16xf32>
    %c0_71 = arith.constant 0 : index
    %c176 = arith.constant 176 : index
    %107 = vector.load %arg12[%c0_71, %c176] : memref<14x448xf32, #tpu.memory_space<vmem>>, vector<14x16xf32>
    %108 = arith.maximumf %106, %107 : vector<14x16xf32>
    %c1_72 = arith.constant 1 : index
    %c80_73 = arith.constant 80 : index
    %109 = vector.load %arg13[%c1_72, %c80_73] : memref<16x224xf32, #tpu.memory_space<vmem>>, vector<14x16xf32>
    tpu.vector_store %arg13[%c1_72, %c80_73], %108 {strides = array<i32>} : memref<16x224xf32, #tpu.memory_space<vmem>>, vector<14x16xf32>,
    %c0_74 = arith.constant 0 : index
    %c192 = arith.constant 192 : index
    %110 = vector.load %arg12[%c0_74, %c192] : memref<14x448xf32, #tpu.memory_space<vmem>>, vector<14x16xf32>
    %c0_75 = arith.constant 0 : index
    %c208 = arith.constant 208 : index
    %111 = vector.load %arg12[%c0_75, %c208] : memref<14x448xf32, #tpu.memory_space<vmem>>, vector<14x16xf32>
    %112 = arith.maximumf %110, %111 : vector<14x16xf32>
    %c1_76 = arith.constant 1 : index
    %c96_77 = arith.constant 96 : index
    %113 = vector.load %arg13[%c1_76, %c96_77] : memref<16x224xf32, #tpu.memory_space<vmem>>, vector<14x16xf32>
    tpu.vector_store %arg13[%c1_76, %c96_77], %112 {strides = array<i32>} : memref<16x224xf32, #tpu.memory_space<vmem>>, vector<14x16xf32>,
    %c0_78 = arith.constant 0 : index
    %c224 = arith.constant 224 : index
    %114 = vector.load %arg12[%c0_78, %c224] : memref<14x448xf32, #tpu.memory_space<vmem>>, vector<14x16xf32>
    %c0_79 = arith.constant 0 : index
    %c240 = arith.constant 240 : index
    %115 = vector.load %arg12[%c0_79, %c240] : memref<14x448xf32, #tpu.memory_space<vmem>>, vector<14x16xf32>
    %116 = arith.maximumf %114, %115 : vector<14x16xf32>
    %c1_80 = arith.constant 1 : index
    %c112_81 = arith.constant 112 : index
    %117 = vector.load %arg13[%c1_80, %c112_81] : memref<16x224xf32, #tpu.memory_space<vmem>>, vector<14x16xf32>
    tpu.vector_store %arg13[%c1_80, %c112_81], %116 {strides = array<i32>} : memref<16x224xf32, #tpu.memory_space<vmem>>, vector<14x16xf32>,
    %c0_82 = arith.constant 0 : index
    %c256 = arith.constant 256 : index
    %118 = vector.load %arg12[%c0_82, %c256] : memref<14x448xf32, #tpu.memory_space<vmem>>, vector<14x16xf32>
    %c0_83 = arith.constant 0 : index
    %c272 = arith.constant 272 : index
    %119 = vector.load %arg12[%c0_83, %c272] : memref<14x448xf32, #tpu.memory_space<vmem>>, vector<14x16xf32>
    %120 = arith.maximumf %118, %119 : vector<14x16xf32>
    %c1_84 = arith.constant 1 : index
    %c128_85 = arith.constant 128 : index
    %121 = vector.load %arg13[%c1_84, %c128_85] : memref<16x224xf32, #tpu.memory_space<vmem>>, vector<14x16xf32>
    tpu.vector_store %arg13[%c1_84, %c128_85], %120 {strides = array<i32>} : memref<16x224xf32, #tpu.memory_space<vmem>>, vector<14x16xf32>,
    %c0_86 = arith.constant 0 : index
    %c288 = arith.constant 288 : index
    %122 = vector.load %arg12[%c0_86, %c288] : memref<14x448xf32, #tpu.memory_space<vmem>>, vector<14x16xf32>
    %c0_87 = arith.constant 0 : index
    %c304 = arith.constant 304 : index
    %123 = vector.load %arg12[%c0_87, %c304] : memref<14x448xf32, #tpu.memory_space<vmem>>, vector<14x16xf32>
    %124 = arith.maximumf %122, %123 : vector<14x16xf32>
    %c1_88 = arith.constant 1 : index
    %c144_89 = arith.constant 144 : index
    %125 = vector.load %arg13[%c1_88, %c144_89] : memref<16x224xf32, #tpu.memory_space<vmem>>, vector<14x16xf32>
    tpu.vector_store %arg13[%c1_88, %c144_89], %124 {strides = array<i32>} : memref<16x224xf32, #tpu.memory_space<vmem>>, vector<14x16xf32>,
    %c0_90 = arith.constant 0 : index
    %c320 = arith.constant 320 : index
    %126 = vector.load %arg12[%c0_90, %c320] : memref<14x448xf32, #tpu.memory_space<vmem>>, vector<14x16xf32>
    %c0_91 = arith.constant 0 : index
    %c336 = arith.constant 336 : index
    %127 = vector.load %arg12[%c0_91, %c336] : memref<14x448xf32, #tpu.memory_space<vmem>>, vector<14x16xf32>
    %128 = arith.maximumf %126, %127 : vector<14x16xf32>
    %c1_92 = arith.constant 1 : index
    %c160_93 = arith.constant 160 : index
    %129 = vector.load %arg13[%c1_92, %c160_93] : memref<16x224xf32, #tpu.memory_space<vmem>>, vector<14x16xf32>
    tpu.vector_store %arg13[%c1_92, %c160_93], %128 {strides = array<i32>} : memref<16x224xf32, #tpu.memory_space<vmem>>, vector<14x16xf32>,
    %c0_94 = arith.constant 0 : index
    %c352 = arith.constant 352 : index
    %130 = vector.load %arg12[%c0_94, %c352] : memref<14x448xf32, #tpu.memory_space<vmem>>, vector<14x16xf32>
    %c0_95 = arith.constant 0 : index
    %c368 = arith.constant 368 : index
    %131 = vector.load %arg12[%c0_95, %c368] : memref<14x448xf32, #tpu.memory_space<vmem>>, vector<14x16xf32>
    %132 = arith.maximumf %130, %131 : vector<14x16xf32>
    %c1_96 = arith.constant 1 : index
    %c176_97 = arith.constant 176 : index
    %133 = vector.load %arg13[%c1_96, %c176_97] : memref<16x224xf32, #tpu.memory_space<vmem>>, vector<14x16xf32>
    tpu.vector_store %arg13[%c1_96, %c176_97], %132 {strides = array<i32>} : memref<16x224xf32, #tpu.memory_space<vmem>>, vector<14x16xf32>,
    %c0_98 = arith.constant 0 : index
    %c384 = arith.constant 384 : index
    %134 = vector.load %arg12[%c0_98, %c384] : memref<14x448xf32, #tpu.memory_space<vmem>>, vector<14x16xf32>
    %c0_99 = arith.constant 0 : index
    %c400 = arith.constant 400 : index
    %135 = vector.load %arg12[%c0_99, %c400] : memref<14x448xf32, #tpu.memory_space<vmem>>, vector<14x16xf32>
    %136 = arith.maximumf %134, %135 : vector<14x16xf32>
    %c1_100 = arith.constant 1 : index
    %c192_101 = arith.constant 192 : index
    %137 = vector.load %arg13[%c1_100, %c192_101] : memref<16x224xf32, #tpu.memory_space<vmem>>, vector<14x16xf32>
    tpu.vector_store %arg13[%c1_100, %c192_101], %136 {strides = array<i32>} : memref<16x224xf32, #tpu.memory_space<vmem>>, vector<14x16xf32>,
    %c0_102 = arith.constant 0 : index
    %c416 = arith.constant 416 : index
    %138 = vector.load %arg12[%c0_102, %c416] : memref<14x448xf32, #tpu.memory_space<vmem>>, vector<14x16xf32>
    %c0_103 = arith.constant 0 : index
    %c432 = arith.constant 432 : index
    %139 = vector.load %arg12[%c0_103, %c432] : memref<14x448xf32, #tpu.memory_space<vmem>>, vector<14x16xf32>
    %140 = arith.maximumf %138, %139 : vector<14x16xf32>
    %c1_104 = arith.constant 1 : index
    %c208_105 = arith.constant 208 : index
    %141 = vector.load %arg13[%c1_104, %c208_105] : memref<16x224xf32, #tpu.memory_space<vmem>>, vector<14x16xf32>
    tpu.vector_store %arg13[%c1_104, %c208_105], %140 {strides = array<i32>} : memref<16x224xf32, #tpu.memory_space<vmem>>, vector<14x16xf32>,
    %c0_106 = arith.constant 0 : index
    %c0_107 = arith.constant 0 : index
    %142 = vector.load %arg13[%c0_106, %c0_107] : memref<16x224xf32, #tpu.memory_space<vmem>>, vector<14x224xf32>
    %c0_108 = arith.constant 0 : index
    %c0_109 = arith.constant 0 : index
    %c0_110 = arith.constant 0 : index
    %143 = vector.load %arg4[%c0_108, %c0_109, %c0_110] : memref<3x224x448xf32, #tpu.memory_space<vmem>>, vector<1x224x448xf32>
    %144 = vector.shape_cast %143 : vector<1x224x448xf32> to vector<224x448xf32>
    %cst_111 = arith.constant dense<0.000000e+00> : vector<14x448xf32>
    %145 = tpu.matmul %142, %144, %cst_111 {dimension_numbers = #tpu.dot_dimension_numbers<[1], [0], [0], [1], [0, 0, 1, 1], [], []>} : vector<14x224xf32>, vector<224x448xf32>, vector<14x448xf32> -> vector<14x448xf32>
    %c1_112 = arith.constant 1 : index
    %c0_113 = arith.constant 0 : index
    %146 = vector.load %arg13[%c1_112, %c0_113] : memref<16x224xf32, #tpu.memory_space<vmem>>, vector<14x224xf32>
    %c1_114 = arith.constant 1 : index
    %c0_115 = arith.constant 0 : index
    %c0_116 = arith.constant 0 : index
    %147 = vector.load %arg4[%c1_114, %c0_115, %c0_116] : memref<3x224x448xf32, #tpu.memory_space<vmem>>, vector<1x224x448xf32>
    %148 = vector.shape_cast %147 : vector<1x224x448xf32> to vector<224x448xf32>
    %cst_117 = arith.constant dense<0.000000e+00> : vector<14x448xf32>
    %149 = tpu.matmul %146, %148, %cst_117 {dimension_numbers = #tpu.dot_dimension_numbers<[1], [0], [0], [1], [0, 0, 1, 1], [], []>} : vector<14x224xf32>, vector<224x448xf32>, vector<14x448xf32> -> vector<14x448xf32>
    %150 = arith.addf %145, %149 : vector<14x448xf32>
    %c2_118 = arith.constant 2 : index
    %c0_119 = arith.constant 0 : index
    %151 = vector.load %arg13[%c2_118, %c0_119] : memref<16x224xf32, #tpu.memory_space<vmem>>, vector<14x224xf32>
    %c2_120 = arith.constant 2 : index
    %c0_121 = arith.constant 0 : index
    %c0_122 = arith.constant 0 : index
    %152 = vector.load %arg4[%c2_120, %c0_121, %c0_122] : memref<3x224x448xf32, #tpu.memory_space<vmem>>, vector<1x224x448xf32>
    %153 = vector.shape_cast %152 : vector<1x224x448xf32> to vector<224x448xf32>
    %cst_123 = arith.constant dense<0.000000e+00> : vector<14x448xf32>
    %154 = tpu.matmul %151, %153, %cst_123 {dimension_numbers = #tpu.dot_dimension_numbers<[1], [0], [0], [1], [0, 0, 1, 1], [], []>} : vector<14x224xf32>, vector<224x448xf32>, vector<14x448xf32> -> vector<14x448xf32>
    %155 = arith.addf %150, %154 : vector<14x448xf32>
    %c0_124 = arith.constant 0 : index
    %c0_125 = arith.constant 0 : index
    %156 = vector.load %arg5[%c0_124, %c0_125] : memref<1x448xf32, #tpu.memory_space<vmem>>, vector<1x448xf32>
    %157 = vector.broadcast %156 : vector<1x448xf32> to vector<14x448xf32>
    %158 = arith.addf %155, %157 : vector<14x448xf32>
    %cst_126 = arith.constant 0.000000e+00 : f32
    %159 = vector.broadcast %cst_126 : f32 to vector<14x448xf32>
    %160 = arith.maximumf %158, %159 : vector<14x448xf32>
    %161 = vector.extract_strided_slice %160 {offsets = [0, 0], sizes = [1, 448], strides = [1, 1]} : vector<14x448xf32> to vector<1x448xf32>
    %162 = vector.extract_strided_slice %160 {offsets = [1, 0], sizes = [1, 448], strides = [1, 1]} : vector<14x448xf32> to vector<1x448xf32>
    %163 = arith.maximumf %161, %162 : vector<1x448xf32>
    %c0_127 = arith.constant 0 : index
    %c0_128 = arith.constant 0 : index
    %164 = vector.load %arg14[%c0_127, %c0_128] : memref<7x448xf32, #tpu.memory_space<vmem>>, vector<1x448xf32>
    tpu.vector_store %arg14[%c0_127, %c0_128], %163 {strides = array<i32>} : memref<7x448xf32, #tpu.memory_space<vmem>>, vector<1x448xf32>,
    %165 = vector.extract_strided_slice %160 {offsets = [2, 0], sizes = [1, 448], strides = [1, 1]} : vector<14x448xf32> to vector<1x448xf32>
    %166 = vector.extract_strided_slice %160 {offsets = [3, 0], sizes = [1, 448], strides = [1, 1]} : vector<14x448xf32> to vector<1x448xf32>
    %167 = arith.maximumf %165, %166 : vector<1x448xf32>
    %c1_129 = arith.constant 1 : index
    %c0_130 = arith.constant 0 : index
    %168 = vector.load %arg14[%c1_129, %c0_130] : memref<7x448xf32, #tpu.memory_space<vmem>>, vector<1x448xf32>
    tpu.vector_store %arg14[%c1_129, %c0_130], %167 {strides = array<i32>} : memref<7x448xf32, #tpu.memory_space<vmem>>, vector<1x448xf32>,
    %169 = vector.extract_strided_slice %160 {offsets = [4, 0], sizes = [1, 448], strides = [1, 1]} : vector<14x448xf32> to vector<1x448xf32>
    %170 = vector.extract_strided_slice %160 {offsets = [5, 0], sizes = [1, 448], strides = [1, 1]} : vector<14x448xf32> to vector<1x448xf32>
    %171 = arith.maximumf %169, %170 : vector<1x448xf32>
    %c2_131 = arith.constant 2 : index
    %c0_132 = arith.constant 0 : index
    %172 = vector.load %arg14[%c2_131, %c0_132] : memref<7x448xf32, #tpu.memory_space<vmem>>, vector<1x448xf32>
    tpu.vector_store %arg14[%c2_131, %c0_132], %171 {strides = array<i32>} : memref<7x448xf32, #tpu.memory_space<vmem>>, vector<1x448xf32>,
    %173 = vector.extract_strided_slice %160 {offsets = [6, 0], sizes = [1, 448], strides = [1, 1]} : vector<14x448xf32> to vector<1x448xf32>
    %174 = vector.extract_strided_slice %160 {offsets = [7, 0], sizes = [1, 448], strides = [1, 1]} : vector<14x448xf32> to vector<1x448xf32>
    %175 = arith.maximumf %173, %174 : vector<1x448xf32>
    %c3_133 = arith.constant 3 : index
    %c0_134 = arith.constant 0 : index
    %176 = vector.load %arg14[%c3_133, %c0_134] : memref<7x448xf32, #tpu.memory_space<vmem>>, vector<1x448xf32>
    tpu.vector_store %arg14[%c3_133, %c0_134], %175 {strides = array<i32>} : memref<7x448xf32, #tpu.memory_space<vmem>>, vector<1x448xf32>,
    %177 = vector.extract_strided_slice %160 {offsets = [8, 0], sizes = [1, 448], strides = [1, 1]} : vector<14x448xf32> to vector<1x448xf32>
    %178 = vector.extract_strided_slice %160 {offsets = [9, 0], sizes = [1, 448], strides = [1, 1]} : vector<14x448xf32> to vector<1x448xf32>
    %179 = arith.maximumf %177, %178 : vector<1x448xf32>
    %c4_135 = arith.constant 4 : index
    %c0_136 = arith.constant 0 : index
    %180 = vector.load %arg14[%c4_135, %c0_136] : memref<7x448xf32, #tpu.memory_space<vmem>>, vector<1x448xf32>
    tpu.vector_store %arg14[%c4_135, %c0_136], %179 {strides = array<i32>} : memref<7x448xf32, #tpu.memory_space<vmem>>, vector<1x448xf32>,
    %181 = vector.extract_strided_slice %160 {offsets = [10, 0], sizes = [1, 448], strides = [1, 1]} : vector<14x448xf32> to vector<1x448xf32>
    %182 = vector.extract_strided_slice %160 {offsets = [11, 0], sizes = [1, 448], strides = [1, 1]} : vector<14x448xf32> to vector<1x448xf32>
    %183 = arith.maximumf %181, %182 : vector<1x448xf32>
    %c5_137 = arith.constant 5 : index
    %c0_138 = arith.constant 0 : index
    %184 = vector.load %arg14[%c5_137, %c0_138] : memref<7x448xf32, #tpu.memory_space<vmem>>, vector<1x448xf32>
    tpu.vector_store %arg14[%c5_137, %c0_138], %183 {strides = array<i32>} : memref<7x448xf32, #tpu.memory_space<vmem>>, vector<1x448xf32>,
    %185 = vector.extract_strided_slice %160 {offsets = [12, 0], sizes = [1, 448], strides = [1, 1]} : vector<14x448xf32> to vector<1x448xf32>
    %186 = vector.extract_strided_slice %160 {offsets = [13, 0], sizes = [1, 448], strides = [1, 1]} : vector<14x448xf32> to vector<1x448xf32>
    %187 = arith.maximumf %185, %186 : vector<1x448xf32>
    %c6_139 = arith.constant 6 : index
    %c0_140 = arith.constant 0 : index
    %188 = vector.load %arg14[%c6_139, %c0_140] : memref<7x448xf32, #tpu.memory_space<vmem>>, vector<1x448xf32>
    tpu.vector_store %arg14[%c6_139, %c0_140], %187 {strides = array<i32>} : memref<7x448xf32, #tpu.memory_space<vmem>>, vector<1x448xf32>,
    %c0_141 = arith.constant 0 : index
    %c0_142 = arith.constant 0 : index
    %189 = vector.load %arg14[%c0_141, %c0_142] : memref<7x448xf32, #tpu.memory_space<vmem>>, vector<7x32xf32>
    %c0_143 = arith.constant 0 : index
    %c32_144 = arith.constant 32 : index
    %190 = vector.load %arg14[%c0_143, %c32_144] : memref<7x448xf32, #tpu.memory_space<vmem>>, vector<7x32xf32>
    %191 = arith.maximumf %189, %190 : vector<7x32xf32>
    %c0_145 = arith.constant 0 : index
    %c0_146 = arith.constant 0 : index
    %192 = vector.load %arg15[%c0_145, %c0_146] : memref<7x224xf32, #tpu.memory_space<vmem>>, vector<7x32xf32>
    tpu.vector_store %arg15[%c0_145, %c0_146], %191 {strides = array<i32>} : memref<7x224xf32, #tpu.memory_space<vmem>>, vector<7x32xf32>,
    %c0_147 = arith.constant 0 : index
    %c64_148 = arith.constant 64 : index
    %193 = vector.load %arg14[%c0_147, %c64_148] : memref<7x448xf32, #tpu.memory_space<vmem>>, vector<7x32xf32>
    %c0_149 = arith.constant 0 : index
    %c96_150 = arith.constant 96 : index
    %194 = vector.load %arg14[%c0_149, %c96_150] : memref<7x448xf32, #tpu.memory_space<vmem>>, vector<7x32xf32>
    %195 = arith.maximumf %193, %194 : vector<7x32xf32>
    %c0_151 = arith.constant 0 : index
    %c32_152 = arith.constant 32 : index
    %196 = vector.load %arg15[%c0_151, %c32_152] : memref<7x224xf32, #tpu.memory_space<vmem>>, vector<7x32xf32>
    tpu.vector_store %arg15[%c0_151, %c32_152], %195 {strides = array<i32>} : memref<7x224xf32, #tpu.memory_space<vmem>>, vector<7x32xf32>,
    %c0_153 = arith.constant 0 : index
    %c128_154 = arith.constant 128 : index
    %197 = vector.load %arg14[%c0_153, %c128_154] : memref<7x448xf32, #tpu.memory_space<vmem>>, vector<7x32xf32>
    %c0_155 = arith.constant 0 : index
    %c160_156 = arith.constant 160 : index
    %198 = vector.load %arg14[%c0_155, %c160_156] : memref<7x448xf32, #tpu.memory_space<vmem>>, vector<7x32xf32>
    %199 = arith.maximumf %197, %198 : vector<7x32xf32>
    %c0_157 = arith.constant 0 : index
    %c64_158 = arith.constant 64 : index
    %200 = vector.load %arg15[%c0_157, %c64_158] : memref<7x224xf32, #tpu.memory_space<vmem>>, vector<7x32xf32>
    tpu.vector_store %arg15[%c0_157, %c64_158], %199 {strides = array<i32>} : memref<7x224xf32, #tpu.memory_space<vmem>>, vector<7x32xf32>,
    %c0_159 = arith.constant 0 : index
    %c192_160 = arith.constant 192 : index
    %201 = vector.load %arg14[%c0_159, %c192_160] : memref<7x448xf32, #tpu.memory_space<vmem>>, vector<7x32xf32>
    %c0_161 = arith.constant 0 : index
    %c224_162 = arith.constant 224 : index
    %202 = vector.load %arg14[%c0_161, %c224_162] : memref<7x448xf32, #tpu.memory_space<vmem>>, vector<7x32xf32>
    %203 = arith.maximumf %201, %202 : vector<7x32xf32>
    %c0_163 = arith.constant 0 : index
    %c96_164 = arith.constant 96 : index
    %204 = vector.load %arg15[%c0_163, %c96_164] : memref<7x224xf32, #tpu.memory_space<vmem>>, vector<7x32xf32>
    tpu.vector_store %arg15[%c0_163, %c96_164], %203 {strides = array<i32>} : memref<7x224xf32, #tpu.memory_space<vmem>>, vector<7x32xf32>,
    %c0_165 = arith.constant 0 : index
    %c256_166 = arith.constant 256 : index
    %205 = vector.load %arg14[%c0_165, %c256_166] : memref<7x448xf32, #tpu.memory_space<vmem>>, vector<7x32xf32>
    %c0_167 = arith.constant 0 : index
    %c288_168 = arith.constant 288 : index
    %206 = vector.load %arg14[%c0_167, %c288_168] : memref<7x448xf32, #tpu.memory_space<vmem>>, vector<7x32xf32>
    %207 = arith.maximumf %205, %206 : vector<7x32xf32>
    %c0_169 = arith.constant 0 : index
    %c128_170 = arith.constant 128 : index
    %208 = vector.load %arg15[%c0_169, %c128_170] : memref<7x224xf32, #tpu.memory_space<vmem>>, vector<7x32xf32>
    tpu.vector_store %arg15[%c0_169, %c128_170], %207 {strides = array<i32>} : memref<7x224xf32, #tpu.memory_space<vmem>>, vector<7x32xf32>,
    %c0_171 = arith.constant 0 : index
    %c320_172 = arith.constant 320 : index
    %209 = vector.load %arg14[%c0_171, %c320_172] : memref<7x448xf32, #tpu.memory_space<vmem>>, vector<7x32xf32>
    %c0_173 = arith.constant 0 : index
    %c352_174 = arith.constant 352 : index
    %210 = vector.load %arg14[%c0_173, %c352_174] : memref<7x448xf32, #tpu.memory_space<vmem>>, vector<7x32xf32>
    %211 = arith.maximumf %209, %210 : vector<7x32xf32>
    %c0_175 = arith.constant 0 : index
    %c160_176 = arith.constant 160 : index
    %212 = vector.load %arg15[%c0_175, %c160_176] : memref<7x224xf32, #tpu.memory_space<vmem>>, vector<7x32xf32>
    tpu.vector_store %arg15[%c0_175, %c160_176], %211 {strides = array<i32>} : memref<7x224xf32, #tpu.memory_space<vmem>>, vector<7x32xf32>,
    %c0_177 = arith.constant 0 : index
    %c384_178 = arith.constant 384 : index
    %213 = vector.load %arg14[%c0_177, %c384_178] : memref<7x448xf32, #tpu.memory_space<vmem>>, vector<7x32xf32>
    %c0_179 = arith.constant 0 : index
    %c416_180 = arith.constant 416 : index
    %214 = vector.load %arg14[%c0_179, %c416_180] : memref<7x448xf32, #tpu.memory_space<vmem>>, vector<7x32xf32>
    %215 = arith.maximumf %213, %214 : vector<7x32xf32>
    %c0_181 = arith.constant 0 : index
    %c192_182 = arith.constant 192 : index
    %216 = vector.load %arg15[%c0_181, %c192_182] : memref<7x224xf32, #tpu.memory_space<vmem>>, vector<7x32xf32>
    tpu.vector_store %arg15[%c0_181, %c192_182], %215 {strides = array<i32>} : memref<7x224xf32, #tpu.memory_space<vmem>>, vector<7x32xf32>,
    %c0_183 = arith.constant 0 : index
    %c0_184 = arith.constant 0 : index
    %217 = vector.load %arg7[%c0_183, %c0_184] : memref<1x32xf32, #tpu.memory_space<vmem>>, vector<1x32xf32>
    %c0_185 = arith.constant 0 : index
    %c0_186 = arith.constant 0 : index
    %218 = vector.load %arg15[%c0_185, %c0_186] : memref<7x224xf32, #tpu.memory_space<vmem>>, vector<1x224xf32>
    %c0_187 = arith.constant 0 : index
    %c0_188 = arith.constant 0 : index
    %c0_189 = arith.constant 0 : index
    %219 = vector.load %arg6[%c0_187, %c0_188, %c0_189] : memref<7x224x32xf32, #tpu.memory_space<vmem>>, vector<1x224x32xf32>
    %220 = vector.shape_cast %219 : vector<1x224x32xf32> to vector<224x32xf32>
    %cst_190 = arith.constant dense<0.000000e+00> : vector<1x32xf32>
    %221 = tpu.matmul %218, %220, %cst_190 {dimension_numbers = #tpu.dot_dimension_numbers<[1], [0], [0], [1], [0, 0, 1, 1], [], []>} : vector<1x224xf32>, vector<224x32xf32>, vector<1x32xf32> -> vector<1x32xf32>
    %222 = arith.addf %217, %221 : vector<1x32xf32>
    %c1_191 = arith.constant 1 : index
    %c0_192 = arith.constant 0 : index
    %223 = vector.load %arg15[%c1_191, %c0_192] : memref<7x224xf32, #tpu.memory_space<vmem>>, vector<1x224xf32>
    %c1_193 = arith.constant 1 : index
    %c0_194 = arith.constant 0 : index
    %c0_195 = arith.constant 0 : index
    %224 = vector.load %arg6[%c1_193, %c0_194, %c0_195] : memref<7x224x32xf32, #tpu.memory_space<vmem>>, vector<1x224x32xf32>
    %225 = vector.shape_cast %224 : vector<1x224x32xf32> to vector<224x32xf32>
    %cst_196 = arith.constant dense<0.000000e+00> : vector<1x32xf32>
    %226 = tpu.matmul %223, %225, %cst_196 {dimension_numbers = #tpu.dot_dimension_numbers<[1], [0], [0], [1], [0, 0, 1, 1], [], []>} : vector<1x224xf32>, vector<224x32xf32>, vector<1x32xf32> -> vector<1x32xf32>
    %227 = arith.addf %222, %226 : vector<1x32xf32>
    %c2_197 = arith.constant 2 : index
    %c0_198 = arith.constant 0 : index
    %228 = vector.load %arg15[%c2_197, %c0_198] : memref<7x224xf32, #tpu.memory_space<vmem>>, vector<1x224xf32>
    %c2_199 = arith.constant 2 : index
    %c0_200 = arith.constant 0 : index
    %c0_201 = arith.constant 0 : index
    %229 = vector.load %arg6[%c2_199, %c0_200, %c0_201] : memref<7x224x32xf32, #tpu.memory_space<vmem>>, vector<1x224x32xf32>
    %230 = vector.shape_cast %229 : vector<1x224x32xf32> to vector<224x32xf32>
    %cst_202 = arith.constant dense<0.000000e+00> : vector<1x32xf32>
    %231 = tpu.matmul %228, %230, %cst_202 {dimension_numbers = #tpu.dot_dimension_numbers<[1], [0], [0], [1], [0, 0, 1, 1], [], []>} : vector<1x224xf32>, vector<224x32xf32>, vector<1x32xf32> -> vector<1x32xf32>
    %232 = arith.addf %227, %231 : vector<1x32xf32>
    %c3_203 = arith.constant 3 : index
    %c0_204 = arith.constant 0 : index
    %233 = vector.load %arg15[%c3_203, %c0_204] : memref<7x224xf32, #tpu.memory_space<vmem>>, vector<1x224xf32>
    %c3_205 = arith.constant 3 : index
    %c0_206 = arith.constant 0 : index
    %c0_207 = arith.constant 0 : index
    %234 = vector.load %arg6[%c3_205, %c0_206, %c0_207] : memref<7x224x32xf32, #tpu.memory_space<vmem>>, vector<1x224x32xf32>
    %235 = vector.shape_cast %234 : vector<1x224x32xf32> to vector<224x32xf32>
    %cst_208 = arith.constant dense<0.000000e+00> : vector<1x32xf32>
    %236 = tpu.matmul %233, %235, %cst_208 {dimension_numbers = #tpu.dot_dimension_numbers<[1], [0], [0], [1], [0, 0, 1, 1], [], []>} : vector<1x224xf32>, vector<224x32xf32>, vector<1x32xf32> -> vector<1x32xf32>
    %237 = arith.addf %232, %236 : vector<1x32xf32>
    %c4_209 = arith.constant 4 : index
    %c0_210 = arith.constant 0 : index
    %238 = vector.load %arg15[%c4_209, %c0_210] : memref<7x224xf32, #tpu.memory_space<vmem>>, vector<1x224xf32>
    %c4_211 = arith.constant 4 : index
    %c0_212 = arith.constant 0 : index
    %c0_213 = arith.constant 0 : index
    %239 = vector.load %arg6[%c4_211, %c0_212, %c0_213] : memref<7x224x32xf32, #tpu.memory_space<vmem>>, vector<1x224x32xf32>
    %240 = vector.shape_cast %239 : vector<1x224x32xf32> to vector<224x32xf32>
    %cst_214 = arith.constant dense<0.000000e+00> : vector<1x32xf32>
    %241 = tpu.matmul %238, %240, %cst_214 {dimension_numbers = #tpu.dot_dimension_numbers<[1], [0], [0], [1], [0, 0, 1, 1], [], []>} : vector<1x224xf32>, vector<224x32xf32>, vector<1x32xf32> -> vector<1x32xf32>
    %242 = arith.addf %237, %241 : vector<1x32xf32>
    %c5_215 = arith.constant 5 : index
    %c0_216 = arith.constant 0 : index
    %243 = vector.load %arg15[%c5_215, %c0_216] : memref<7x224xf32, #tpu.memory_space<vmem>>, vector<1x224xf32>
    %c5_217 = arith.constant 5 : index
    %c0_218 = arith.constant 0 : index
    %c0_219 = arith.constant 0 : index
    %244 = vector.load %arg6[%c5_217, %c0_218, %c0_219] : memref<7x224x32xf32, #tpu.memory_space<vmem>>, vector<1x224x32xf32>
    %245 = vector.shape_cast %244 : vector<1x224x32xf32> to vector<224x32xf32>
    %cst_220 = arith.constant dense<0.000000e+00> : vector<1x32xf32>
    %246 = tpu.matmul %243, %245, %cst_220 {dimension_numbers = #tpu.dot_dimension_numbers<[1], [0], [0], [1], [0, 0, 1, 1], [], []>} : vector<1x224xf32>, vector<224x32xf32>, vector<1x32xf32> -> vector<1x32xf32>
    %247 = arith.addf %242, %246 : vector<1x32xf32>
    %c6_221 = arith.constant 6 : index
    %c0_222 = arith.constant 0 : index
    %248 = vector.load %arg15[%c6_221, %c0_222] : memref<7x224xf32, #tpu.memory_space<vmem>>, vector<1x224xf32>
    %c6_223 = arith.constant 6 : index
    %c0_224 = arith.constant 0 : index
    %c0_225 = arith.constant 0 : index
    %249 = vector.load %arg6[%c6_223, %c0_224, %c0_225] : memref<7x224x32xf32, #tpu.memory_space<vmem>>, vector<1x224x32xf32>
    %250 = vector.shape_cast %249 : vector<1x224x32xf32> to vector<224x32xf32>
    %cst_226 = arith.constant dense<0.000000e+00> : vector<1x32xf32>
    %251 = tpu.matmul %248, %250, %cst_226 {dimension_numbers = #tpu.dot_dimension_numbers<[1], [0], [0], [1], [0, 0, 1, 1], [], []>} : vector<1x224xf32>, vector<224x32xf32>, vector<1x32xf32> -> vector<1x32xf32>
    %252 = arith.addf %247, %251 : vector<1x32xf32>
    %cst_227 = arith.constant 0.000000e+00 : f32
    %253 = vector.broadcast %cst_227 : f32 to vector<1x32xf32>
    %254 = arith.maximumf %252, %253 : vector<1x32xf32>
    %c0_228 = arith.constant 0 : index
    %c0_229 = arith.constant 0 : index
    %255 = vector.load %arg8[%c0_228, %c0_229] : memref<32x10xf32, #tpu.memory_space<vmem>>, vector<32x10xf32>
    %cst_230 = arith.constant dense<0.000000e+00> : vector<1x10xf32>
    %256 = tpu.matmul %254, %255, %cst_230 {dimension_numbers = #tpu.dot_dimension_numbers<[1], [0], [0], [1], [0, 0, 1, 1], [], []>} : vector<1x32xf32>, vector<32x10xf32>, vector<1x10xf32> -> vector<1x10xf32>
    %c0_231 = arith.constant 0 : index
    %c0_232 = arith.constant 0 : index
    %257 = vector.load %arg9[%c0_231, %c0_232] : memref<1x10xf32, #tpu.memory_space<vmem>>, vector<1x10xf32>
    %258 = arith.addf %256, %257 : vector<1x10xf32>
    %c0_233 = arith.constant 0 : index
    %c0_234 = arith.constant 0 : index
    %c0_235 = arith.constant 0 : index
    %259 = vector.load %arg10[%c0_233, %c0_234, %c0_235] : memref<1x1x10xf32, #tpu.memory_space<vmem>>, vector<1x1x10xf32>
    %260 = vector.shape_cast %259 : vector<1x1x10xf32> to vector<1x10xf32>
    %261 = vector.shape_cast %258 : vector<1x10xf32> to vector<1x1x10xf32>
    tpu.vector_store %arg10[%c0_233, %c0_234, %c0_235], %261 {strides = array<i32>} : memref<1x1x10xf32, #tpu.memory_space<vmem>>, vector<1x1x10xf32>,
    return
  }
  func.func @transform_0(%arg0: i32) -> (i32, i32, i32) {
    %c0_i32 = arith.constant 0 : i32
    %c0_i32_0 = arith.constant 0 : i32
    %c0_i32_1 = arith.constant 0 : i32
    return %arg0, %c0_i32, %c0_i32_0 : i32, i32, i32
  }
  func.func @transform_1(%arg0: i32) -> (i32, i32, i32) {
    %c0_i32 = arith.constant 0 : i32
    %c0_i32_0 = arith.constant 0 : i32
    %c0_i32_1 = arith.constant 0 : i32
    %c0_i32_2 = arith.constant 0 : i32
    return %c0_i32, %c0_i32_0, %c0_i32_1 : i32, i32, i32
  }
  func.func @transform_2(%arg0: i32) -> (i32, i32) {
    %c0_i32 = arith.constant 0 : i32
    %c0_i32_0 = arith.constant 0 : i32
    %c0_i32_1 = arith.constant 0 : i32
    return %c0_i32, %c0_i32_0 : i32, i32
  }
  func.func @transform_3(%arg0: i32) -> (i32, i32, i32) {
    %c0_i32 = arith.constant 0 : i32
    %c0_i32_0 = arith.constant 0 : i32
    %c0_i32_1 = arith.constant 0 : i32
    %c0_i32_2 = arith.constant 0 : i32
    return %c0_i32, %c0_i32_0, %c0_i32_1 : i32, i32, i32
  }
  func.func @transform_4(%arg0: i32) -> (i32, i32) {
    %c0_i32 = arith.constant 0 : i32
    %c0_i32_0 = arith.constant 0 : i32
    %c0_i32_1 = arith.constant 0 : i32
    return %c0_i32, %c0_i32_0 : i32, i32
  }
  func.func @transform_5(%arg0: i32) -> (i32, i32, i32) {
    %c0_i32 = arith.constant 0 : i32
    %c0_i32_0 = arith.constant 0 : i32
    %c0_i32_1 = arith.constant 0 : i32
    %c0_i32_2 = arith.constant 0 : i32
    return %c0_i32, %c0_i32_0, %c0_i32_1 : i32, i32, i32
  }
  func.func @transform_6(%arg0: i32) -> (i32, i32) {
    %c0_i32 = arith.constant 0 : i32
    %c0_i32_0 = arith.constant 0 : i32
    %c0_i32_1 = arith.constant 0 : i32
    return %c0_i32, %c0_i32_0 : i32, i32
  }
  func.func @transform_7(%arg0: i32) -> (i32, i32) {
    %c0_i32 = arith.constant 0 : i32
    %c0_i32_0 = arith.constant 0 : i32
    %c0_i32_1 = arith.constant 0 : i32
    return %c0_i32, %c0_i32_0 : i32, i32
  }
  func.func @transform_8(%arg0: i32) -> (i32, i32) {
    %c0_i32 = arith.constant 0 : i32
    %c0_i32_0 = arith.constant 0 : i32
    %c0_i32_1 = arith.constant 0 : i32
    return %c0_i32, %c0_i32_0 : i32, i32
  }
  func.func @transform_9(%arg0: i32) -> (i32, i32, i32) {
    %c0_i32 = arith.constant 0 : i32
    %c0_i32_0 = arith.constant 0 : i32
    %c0_i32_1 = arith.constant 0 : i32
    return %arg0, %c0_i32, %c0_i32_0 : i32, i32, i32
  }
}

</mosaic_0001>

<bundles_post_ra>
// kernel: cnn_forward.1
= control target key start
LH: loop header
LB: loop body
LE: loop exit
PB: predicated region body
PF: predicated region fallthrough
CT: control target
= control target key end

     0   :  { %s7088_s0 = inlined_call_operand.vmem [shape: f32[2,28,28], index: 0, kind: input, shape index: {}]   ;;  %s7089_s1 = inlined_call_operand.hbm [shape: f32[3,28,448], index: 1, kind: input, shape index: {}]   ;;  %s7090_s2 = inlined_call_operand.hbm [shape: f32[1,448], index: 2, kind: input, shape index: {}]   ;;  %s7091_s3 = inlined_call_operand.hbm [shape: f32[3,224,448], index: 3, kind: input, shape index: {}]   ;;  %s7092_s4 = inlined_call_operand.hbm [shape: f32[1,448], index: 4, kind: input, shape index: {}]   ;;  %s7093_s5 = inlined_call_operand.vmem [shape: f32[7,224,32], index: 5, kind: input, shape index: {}]   ;;  %s7094_s6 = inlined_call_operand.hbm [shape: f32[1,32], index: 6, kind: input, shape index: {}]   ;;  %s7095_s7 = inlined_call_operand.vmem [shape: f32[32,10], index: 7, kind: input, shape index: {}]   ;;  %s7096_s8 = inlined_call_operand.hbm [shape: f32[1,10], index: 8, kind: input, shape index: {}]   ;;  %s7097_s9 = inlined_call_operand.hbm [shape: f32[2,1,10], index: 9, kind: output, shape index: {}]  }
   0x1   :  { %7106 = sst [smem:[#allocation29_spill]] %s7090_s2 }
   0x2   :  { %7107 = sst [smem:[#allocation30_spill]] %s7092_s4 }
   0x3   :  { %14 = vsyncpa [#allocation8], 0 }
   0x4   :  { %15 = vsyncpa [#allocation11], 0 }
   0x5   :  { %16 = vsyncpa [#allocation14], 0 }
   0x6   :  { %17 = vsyncpa [#allocation17], 0 }
   0x7   :  { %18 = vsyncpa [#allocation9], 0 }
   0x8   :  { %20 = vsyncpa [#allocation9 + $0x1], 0  ;;  %s5443_s30 = smov 0   ;;  %s5445_s10 = smov 0  }
   0x9   :  { %s5447_s11 = smov 0   ;;  %s5449_s12 = smov 0  }
   0xa LB: > { %7108 = sst [smem:[#allocation24_spill]] %s5358_s30  ;;  %s5464_s13 = sadd.s32 4294967295, %s5370_s12   ;;  %s5370_s12 = sphi %s5449_s12, %s7137_s12   ;;  %s5366_s11 = sphi %s5447_s11, %s7139_s11   ;;  %s5362_s10 = sphi %s5445_s10, %s7141_s10   ;;  %s5358_s30 = sphi %s5443_s30, %s7140_s30  }
   0xb   : > { %7109 = sst [smem:[#allocation25_spill]] %s5366_s11  ;;  %s3987_s14 = sadd.s32 4294967294, %s5370_s12  }
   0xc   : > { %s5468_s15 = sadd.s32 1, %s5370_s12   ;;  %s227_s16 = sadd.s32 1, %s5366_s11 }
   0xd   : > { %7110 = sst [smem:[#allocation26_spill]] %s5468_s15  ;;  %s224_s17 = ssub.s32 %s5370_s12, %s5468_s15 }
   0xe   : > { %p237_p0 = scmp.ne.s32.totalorder %s5366_s11, %s5362_s10  ;;  %p225_p1 = scmp.eq.s32.totalorder %s224_s17, 0 }
   0xf   : > { %p238_p2 = scmp.eq.s32.totalorder %s5464_s13, 1  ;;  %p243_p3 = scmp.ne.s32.totalorder %s5362_s10, %s5358_s30 }
  0x10   : > { %p244_p4 = scmp.eq.s32.totalorder %s3987_s14, 1  ;;  %p3988_p7 = scmp.ge.s32.totalorder %s5370_s12, 1 }
  0x11   : > { %s5479_s18 = scalar_select %p225_p1, %s5366_s11, %s227_s16  }
  0x12   : > { %p5481_p5 = por %p238_p2, %p237_p0  ;;  %p5485_p6 = por %p244_p4, %p243_p3 }
  0x13   : > { %7111 = sst [smem:[#allocation27_spill]] %s5479_s18  ;;  %p251_p8 = scmp.lt.s32.totalorder %s5370_s12, 3 }
  0x14   : > { %s7112_s19 = scalar_select %p5481_p5, 1, 0 }
  0x15   : > { %s7113_s20 = scalar_select %p5485_p6, 1, 0 }
  0x16   : > { %p7098_p9 = scmp.eq.s32.totalorder %s5464_s13, 0  ;;  %p5492_p10 = pnand %p3988_p7, %p251_p8 }
  0x17   : > { %7114 = sst [smem:[#allocation28_spill]] %s7113_s20  ;;  %s5372_s22 = smov [#allocation10]  }
  0x18   : > { %s7115_s21 = scalar_select %p5492_p10, 1, 0 }
  0x19   : > { %s277_s23 = sshll.u32 %s5372_s22, 4  ;;  %p5036_p11 = pneg %p5492_p10  ;;  %s278_s23 = int_to_ptr.vmem [resolvable:$true] %s277_s23 }
  0x1a   : > { %s5373_s24 = smov [#allocation13]   ;;  %s5374_s27 = smov [#allocation7]  }
  0x1b   : > { %s301_s25 = sshll.u32 %s5373_s24, 4  ;;  %p5500_p12 = pnand %p7098_p9, %p5036_p11  ;;  %s5504_s25 = int_to_ptr.vmem [resolvable:$true] %s301_s25 }
  0x1c   : > { %s263_s28 = sshll.u32 %s5374_s27, 4  ;;  %s7117_s2 = sld [smem:[#allocation29_spill]]  ;;  %s5506_s28 = int_to_ptr.vmem [resolvable:$true] %s263_s28 }
  0x1d   : > { %p5516_p0 = pneg %p5500_p12 }
  0x22   : > { %s5124_s16 = scalar_lea.hbm %s7117_s2, 64 }
  0x23   : > { %p5125_p13 = scmp.ne.s32.totalorder %s7117_s2, %s5124_s16  ;;  %p5131_p3 = scmp.lt.u32.totalorder %s5124_s16, %s7117_s2 }
  0x25   : > { %p5127_p1 = pnand %p5516_p0, %p5125_p13 }
  0x27   : > { %p5128_p2 = pneg %p5127_p1 }
  0x29   : > { %p5133_p4 = pnand %p5131_p3, %p5128_p2 }
  0x2b   : > { %5136 = shalt.err (!%p5133_p4)
}
  0x2c   : > { %s5137_s29 = scalar_lea.vmem %s278_s23, 64  ;;  %p5145_p9 = scmp.lt.s32.totalorder %s278_s23, %s278_s23 }
  0x2d   : > { %p5138_p7 = scmp.ne.s32.totalorder %s278_s23, %s5137_s29  ;;  %p5146_p6 = scmp.lt.s32.totalorder %s5137_s29, %s5137_s29 }
  0x2f   : > { %p5140_p8 = pnand %p5138_p7, %p5516_p0  ;;  %p5147_p5 = por %p5146_p6, %p5145_p9 }
  0x31   : > { %p5141_p11 = pneg %p5140_p8 }
  0x33   : > { %p5148_p10 = pnand %p5147_p5, %p5141_p11 }
  0x35   : > { %5151 = shalt.err (!%p5148_p10)
}
  0x36   : > { %5042 = dma.hbm_to_vmem [thread:$0]  (!%p5500_p12), %s7117_s2, 64, %s278_s23, [#allocation11]  }
  0x37   : > { %s7119_s4 = sld [smem:[#allocation30_spill]] }
  0x3d   : > { %s5152_s22 = scalar_lea.hbm %s7119_s4, 64 }
  0x3e   : > { %p5153_p13 = scmp.ne.s32.totalorder %s7119_s4, %s5152_s22  ;;  %p5159_p5 = scmp.lt.u32.totalorder %s5152_s22, %s7119_s4 }
  0x40   : > { %p5155_p1 = pnand %p5153_p13, %p5516_p0 }
  0x42   : > { %p5156_p6 = pneg %p5155_p1 }
  0x44   : > { %p5161_p9 = pnand %p5159_p5, %p5156_p6 }
  0x46   : > { %5164 = shalt.err (!%p5161_p9)
}
  0x47   : > { %s5165_s23 = scalar_lea.vmem %s5504_s25, 64  ;;  %p5173_p4 = scmp.lt.s32.totalorder %s5504_s25, %s5504_s25 }
  0x48   : > { %p5166_p10 = scmp.ne.s32.totalorder %s5504_s25, %s5165_s23  ;;  %p5174_p7 = scmp.lt.s32.totalorder %s5165_s23, %s5165_s23 }
  0x4a   : > { %p5168_p2 = pnand %p5166_p10, %p5516_p0  ;;  %p5175_p8 = por %p5174_p7, %p5173_p4 }
  0x4c   : > { %p5169_p3 = pneg %p5168_p2 }
  0x4e   : > { %p5176_p11 = pnand %p5175_p8, %p5169_p3 }
  0x50   : > { %5179 = shalt.err (!%p5176_p11)
}
  0x51   : > { %5048 = dma.hbm_to_vmem [thread:$0]  (!%p5500_p12), %s7119_s4, 64, %s5504_s25, [#allocation14]  }
  0x52   : > { %s5180_s18 = scalar_lea.hbm %s7089_s1, 6144 }
  0x53   : > { %p5181_p13 = scmp.ne.s32.totalorder %s7089_s1, %s5180_s18  ;;  %p5187_p5 = scmp.lt.u32.totalorder %s5180_s18, %s7089_s1 }
  0x55   : > { %p5183_p1 = pnand %p5181_p13, %p5516_p0 }
  0x57   : > { %p5184_p6 = pneg %p5183_p1 }
  0x59   : > { %p5189_p9 = pnand %p5187_p5, %p5184_p6 }
  0x5b   : > { %5192 = shalt.err (!%p5189_p9)
}
  0x5c   : > { %s5193_s25 = scalar_lea.vmem %s5506_s28, 6144  ;;  %p5201_p4 = scmp.lt.s32.totalorder %s5506_s28, %s5506_s28 }
  0x5d   : > { %p5194_p10 = scmp.ne.s32.totalorder %s5506_s28, %s5193_s25  ;;  %p5202_p7 = scmp.lt.s32.totalorder %s5193_s25, %s5193_s25 }
  0x5f   : > { %p5196_p2 = pnand %p5194_p10, %p5516_p0  ;;  %p5203_p8 = por %p5202_p7, %p5201_p4 }
  0x61   : > { %p5197_p3 = pneg %p5196_p2 }
  0x63   : > { %p5204_p11 = pnand %p5203_p8, %p5197_p3 }
  0x65   : > { %5207 = shalt.err (!%p5204_p11)
}
  0x66   : > { %s5375_s23 = smov 512   ;;  %s5376_s11 = smov 32  }
  0x67   : > { %5039 = dma.hbm_to_vmem [thread:$0]  (!%p5500_p12), %s7089_s1, 6144, %s5506_s28, [#allocation8], %s5375_s23, %s5375_s23, %s5376_s11  }
  0x68   : > { %s5377_s17 = smov [#allocation12]   ;;  %s5378_s16 = smov [#allocation15]  }
  0x69   : > { %s287_s18 = sshll.u32 %s5377_s17, 4  ;;  %s315_s22 = sshll.u32 %s5378_s16, 4  ;;  %s288_s18 = int_to_ptr.vmem [resolvable:$true] %s287_s18  ;;  %s316_s22 = int_to_ptr.vmem [resolvable:$true] %s315_s22 }
  0x6a   : > { %s5208_s25 = scalar_lea.hbm %s7091_s3, 43008 }
  0x6b   : > { %p5209_p13 = scmp.ne.s32.totalorder %s7091_s3, %s5208_s25  ;;  %p5215_p5 = scmp.lt.u32.totalorder %s5208_s25, %s7091_s3 }
  0x6d   : > { %p5211_p1 = pnand %p5209_p13, %p5516_p0 }
  0x6f   : > { %p5212_p6 = pneg %p5211_p1 }
  0x71   : > { %p5217_p9 = pnand %p5215_p5, %p5212_p6 }
  0x73   : > { %5220 = shalt.err (!%p5217_p9)
}
  0x74   : > { %s5221_s28 = scalar_lea.vmem %s288_s18, 43008  ;;  %p5229_p4 = scmp.lt.s32.totalorder %s288_s18, %s288_s18 }
  0x75   : > { %p5222_p10 = scmp.ne.s32.totalorder %s288_s18, %s5221_s28  ;;  %p5230_p7 = scmp.lt.s32.totalorder %s5221_s28, %s5221_s28 }
  0x77   : > { %p5224_p2 = pnand %p5222_p10, %p5516_p0  ;;  %p5231_p8 = por %p5230_p7, %p5229_p4 }
  0x79   : > { %p5225_p3 = pneg %p5224_p2 }
  0x7b   : > { %p5232_p11 = pnand %p5231_p8, %p5225_p3 }
  0x7d   : > { %5235 = shalt.err (!%p5232_p11)
}
  0x7e   : > { %5045 = dma.hbm_to_vmem [thread:$0]  (!%p5500_p12), %s7091_s3, 43008, %s288_s18, [#allocation11], %s5375_s23, %s5375_s23, %s5376_s11  }
  0x7f   : > { %s5236_s15 = scalar_lea.hbm %s7094_s6, 16 }
  0x80   : > { %p5237_p13 = scmp.ne.s32.totalorder %s7094_s6, %s5236_s15  ;;  %p5243_p5 = scmp.lt.u32.totalorder %s5236_s15, %s7094_s6 }
  0x82   : > { %p5239_p1 = pnand %p5237_p13, %p5516_p0 }
  0x84   : > { %p5240_p6 = pneg %p5239_p1 }
  0x86   : > { %p5245_p9 = pnand %p5243_p5, %p5240_p6 }
  0x88   : > { %5248 = shalt.err (!%p5245_p9)
}
  0x89   : > { %s5249_s29 = scalar_lea.vmem %s316_s22, 16  ;;  %s5256_s23 = scalar_lea.vmem %s316_s22, 32 }
  0x8a   : > { %p5250_p10 = scmp.ne.s32.totalorder %s316_s22, %s5249_s29  ;;  %p5257_p4 = scmp.lt.s32.totalorder %s316_s22, %s316_s22 }
  0x8b   : > { %p5258_p7 = scmp.lt.s32.totalorder %s5256_s23, %s5249_s29 }
  0x8c   : > { %p5252_p2 = pnand %p5250_p10, %p5516_p0 }
  0x8d   : > { %p5259_p8 = por %p5258_p7, %p5257_p4 }
  0x8e   : > { %p5253_p3 = pneg %p5252_p2 }
  0x90   : > { %p5260_p11 = pnand %p5259_p8, %p5253_p3 }
  0x92   : > { %5263 = shalt.err (!%p5260_p11)
}
  0x93   : > { %5051 = dma.hbm_to_vmem [thread:$0]  (!%p5500_p12), %s7094_s6, 16, %s316_s22, [#allocation14]  }
  0x94   : > { %s5379_s25 = smov [#allocation16]   ;;  %s5264_s30 = scalar_lea.hbm %s7096_s8, 16 }
  0x95   : > { %s329_s28 = sshll.u32 %s5379_s25, 4  ;;  %p5265_p13 = scmp.ne.s32.totalorder %s7096_s8, %s5264_s30  ;;  %s330_s28 = int_to_ptr.vmem [resolvable:$true] %s329_s28 }
  0x96   : > { %p5271_p5 = scmp.lt.u32.totalorder %s5264_s30, %s7096_s8 }
  0x97   : > { %p5267_p1 = pnand %p5265_p13, %p5516_p0 }
  0x99   : > { %p5268_p6 = pneg %p5267_p1 }
  0x9b   : > { %p5273_p9 = pnand %p5271_p5, %p5268_p6 }
  0x9d   : > { %5276 = shalt.err (!%p5273_p9)
}
  0x9e   : > { %s5277_s22 = scalar_lea.vmem %s330_s28, 16  ;;  %s5284_s16 = scalar_lea.vmem %s330_s28, 32 }
  0x9f   : > { %p5278_p10 = scmp.ne.s32.totalorder %s330_s28, %s5277_s22  ;;  %p5285_p4 = scmp.lt.s32.totalorder %s330_s28, %s330_s28 }
  0xa0   : > { %p5286_p7 = scmp.lt.s32.totalorder %s5284_s16, %s5277_s22 }
  0xa1   : > { %p5280_p2 = pnand %p5278_p10, %p5516_p0 }
  0xa2   : > { %p5287_p8 = por %p5286_p7, %p5285_p4 }
  0xa3   : > { %p5281_p3 = pneg %p5280_p2 }
  0xa5   : > { %p5288_p11 = pnand %p5287_p8, %p5281_p3 }
  0xa7   : > { %5291 = shalt.err (!%p5288_p11)
}
  0xa8   : > { %5054 = dma.hbm_to_vmem [thread:$0]  (!%p5500_p12), %s7096_s8, 16, %s330_s28, [#allocation17]  }
  0xa9   : > { %p7120_p13 = scmp.ne.s32.totalorder %s7115_s21, 0 }
  0xaa   : > { %p7121_p1 = scmp.eq.s32.totalorder (!%p7120_p13), %s5464_s13, 0 }
  0xab   : > { %350 = sbr.rel (%p7120_p13) target bundleno = 2384 (0x950), region = 56 }
  0xb2   : > { %5337 = dma.done.wait (%p7121_p1), [#allocation8], 6144   ;;  %p7122_p0 = pmov %p7121_p1 }
  0xb4   : > { %5339 = vsyncadd (%p7122_p0), [#allocation8], 4294961152  ;;  %p7123_p6 = pmov %p7122_p0 }
  0xb5   : > { %p7124_p5 = pmov %p7122_p0 }
  0xb6   : > { %5341 = dma.done.wait (%p7123_p6), [#allocation11], 43072  }
  0xb7   : > { %5343 = vsyncadd (%p7124_p5), [#allocation11], 4294924224  ;;  %p7125_p9 = pmov %p7122_p0 }
  0xb8   : > { %p7126_p12 = pmov %p7122_p0 }
  0xb9   : > { %5345 = dma.done.wait (%p7125_p9), [#allocation14], 80  }
  0xba   : > { %5347 = vsyncadd (%p7126_p12), [#allocation14], 4294967216  ;;  %p7127_p10 = pmov %p7122_p0 }
  0xbb   : > { %p7128_p2 = pmov %p7122_p0 }
  0xbc   : > { %5349 = dma.done.wait (%p7127_p10), [#allocation17], 16  }
  0xbd   : > { %5351 = vsyncadd (%p7128_p2), [#allocation17], 4294967280  ;;  %p405_p3 = scmp.lt.s32.totalorder %s5464_s13, 1  ;;  %v5380_v0 = vmov 0.0   ;;  %vm410_vm0 = vcmask 221184   ;;  %vm476_vm1 = vcmask 1043456   ;;  %v1110_v1 = vlaneseq }
  0xbe   : > { %553 = vmatprep.mubr.f32.mxu1 %v5380_v0  ;;  %755 = vmatprep.mubr.f32.mxu0 %v5380_v0  ;;  %411 = vst.msk [vmem:[#allocation2] sm:$0x1] %vm410_vm0, %v5380_v0  ;;  %412 = vst.msk [vmem:[#allocation2 + $0x1d] sm:$0x1] %vm410_vm0, %v5380_v0  ;;  %vm5381_vm2 = vmmov 1   ;;  %v449_v2 = vld [vmem:[#allocation7 + $0x88] sm:$0xff] }
  0xbf   : > { %s406_s21 = scalar_select %p405_p3, %s5464_s13, 1  ;;  %vm5656_vm3 = vmpackc.low %vm476_vm1, %vm5381_vm2  ;;  %v453_v3 = vld [vmem:[#allocation7 + $0xa8] sm:$0xff]  ;;  %v448_v7 = vld [vmem:[#allocation7 + $0x80] sm:$0xff]  ;;  %vm417_vm4 = vcmask 228352   ;;  %vm421_vm5 = vcmask 224256   ;;  %vm5839_vm6 = vcmp.lt.s32.totalorder %v1110_v1, 448 }
  0xc0   : > { %v428_v4 = vld [vmem:[#allocation7 + $0x8] sm:$0xff]  ;;  %v4249_v5 = vpack.c.bf16 %v453_v3, %v449_v2  ;;  %v452_v8 = vld [vmem:[#allocation7 + $0xa0] sm:$0xff]  ;;  %v451_v26 = vld [vmem:[#allocation7 + $0x98] sm:$0xff]  ;;  %s5383_s18 = smov 112   ;;  %s5384_s25 = smov 96   ;;  %vm1476_vm7 = vcmp.lt.s32.totalorder %v1110_v1, 224 }
  0xc1   : > { %s4232_s26 = sshll.u32 %s406_s21, 5  ;;  %v432_v6 = vld [vmem:[#allocation7 + $0x28] sm:$0xff]  ;;  %v4251_v10 = vpack.c.bf16 %v452_v8, %v448_v7  ;;  %v427_v11 = vld [vmem:[#allocation7] sm:$0xff]  ;;  %v455_v28 = vld [vmem:[#allocation7 + $0xb8] sm:$0xff]  ;;  %s5385_s28 = smov 80   ;;  %vm1497_vm8 = vcmask 1040384  }
  0xc2   : > { %v5660_v9 = vpack.c.bf16 %v432_v6, %v428_v4  ;;  %v431_v12 = vld [vmem:[#allocation7 + $0x20] sm:$0xff]  ;;  %v457_v13 = vld [vmem:[#allocation7 + $0xc8] sm:$0xff]  ;;  %s5665_s11 = scalar_lea.vmem %s7088_s0, %s4232_s26  ;;  %4250 = vmatprep.subr.bf16.mxu1 %v4249_v5  ;;  %v4259_v31 = vpack.c.bf16 %v455_v28, %v451_v26  ;;  %v450_v33 = vld [vmem:[#allocation7 + $0x90] sm:$0xff]  ;;  %v5783_v28 = vshrl.u32 %v1110_v1, 7  ;;  %s5386_s2 = smov 64   ;;  %vm1503_vm9 = vcmask 130049  }
  0xc3   : > { %v5667_v14 = vpack.c.bf16 %v431_v12, %v427_v11  ;;  %v461_v15 = vld [vmem:[#allocation7 + $0xe8] sm:$0xf]  ;;  %4252 = vmatpush1.bf16.msra.mxu1 %v4251_v10  ;;  %v456_v20 = vld [vmem:[#allocation7 + $0xc0] sm:$0xff]  ;;  %v413_v25 = vld [vmem:[%s5665_s11] sm:$0xff]  ;;  %s5387_s4 = smov 48   ;;  %s5388_s30 = smov 32  }
  0xc4   : > { %v436_v16 = vld [vmem:[#allocation7 + $0x48] sm:$0xff]  ;;  %4270 = vmatprep.subr.bf16.mxu0 %v5660_v9  ;;  %v4253_v18 = vpack.c.bf16 %v461_v15, %v457_v13  ;;  %v460_v21 = vld [vmem:[#allocation7 + $0xe0] sm:$0xf]  ;;  %418 = vst.msk [vmem:[#allocation2 + $0x1] sm:$0xff] %vm417_vm4, %v413_v25  ;;  %v454_v34 = vld [vmem:[#allocation7 + $0xb0] sm:$0xff]  ;;  %s5389_s20 = smov 16  }
  0xc5   : > { %v440_v17 = vld [vmem:[#allocation7 + $0x68] sm:$0xf]  ;;  %v435_v22 = vld [vmem:[#allocation7 + $0x40] sm:$0xff]  ;;  %4272 = vmatpush1.bf16.msra.mxu0 %v5667_v14  ;;  %v4256_v23 = vpack.c.bf16 %v460_v21, %v456_v20  ;;  %v414_v37 = vld [vmem:[%s5665_s11 + $0x8] sm:$0xff]  ;;  %v4261_v43 = vpack.c.bf16 %v454_v34, %v450_v33  ;;  %v5791_v34 = vsub.s32 1, %v5783_v28  ;;  %vm1505_vm10 = vcmask 129024  }
  0xc6   : > { %v5670_v19 = vpack.c.bf16 %v440_v17, %v436_v16  ;;  %v439_v24 = vld [vmem:[#allocation7 + $0x60] sm:$0xf]  ;;  %4255 = vmatprep.subr.msk.bf16.mxu1 %vm5656_vm3, %v4253_v18  ;;  %v875_v29 = vld [vmem:[#allocation7 + $0x108] sm:$0xff]  ;;  %419 = vst.msk [vmem:[#allocation2 + $0x9] sm:$0xff] %vm417_vm4, %v414_v37  ;;  %v459_v41 = vld [vmem:[#allocation7 + $0xd8] sm:$0xff]  ;;  %vm1530_vm11 = vcmask 261249  }
  0xc7   : > { %v5679_v27 = vpack.c.bf16 %v439_v24, %v435_v22  ;;  %v879_v30 = vld [vmem:[#allocation7 + $0x128] sm:$0xff]  ;;  %4258 = vmatpush1.bf16.msk.msra.mxu1 %vm5656_vm3, %v4256_v23  ;;  %v874_v35 = vld [vmem:[#allocation7 + $0x100] sm:$0xff]  ;;  %v463_v42 = vld [vmem:[#allocation7 + $0xf8] sm:$0xf]  ;;  %vm1557_vm12 = vcmask 392449   ;;  %vm1584_vm13 = vcmask 523649  }
  0xc8   : > { %4275 = vmatprep.subr.msk.bf16.mxu0 %vm5656_vm3, %v5670_v19  ;;  %v4289_v32 = vpack.c.bf16 %v879_v30, %v875_v29  ;;  %v878_v36 = vld [vmem:[#allocation7 + $0x120] sm:$0xff]  ;;  %4260 = vmatprep.subr.bf16.mxu1 %v4259_v31  ;;  %v883_v38 = vld [vmem:[#allocation7 + $0x148] sm:$0xff]  ;;  %v458_v48 = vld [vmem:[#allocation7 + $0xd0] sm:$0xff]  ;;  %v4263_v52 = vpack.c.bf16 %v463_v42, %v459_v41  ;;  %v5786_v31 = vsub.s32 0, %v5783_v28  ;;  %vm1611_vm14 = vcmask 654849   ;;  %s4229_s26 = sshll.u32 %s5464_s13, 4 }
  0xc9   : > { %4278 = vmatpush1.bf16.msk.msra.mxu0 %vm5656_vm3, %v5679_v27  ;;  %v887_v39 = vld [vmem:[#allocation7 + $0x168] sm:$0xf]  ;;  %v415_v40 = vld [vmem:[%s5665_s11 + $0x10] sm:$0xff]  ;;  %v4291_v44 = vpack.c.bf16 %v878_v36, %v874_v35  ;;  %v462_v53 = vld [vmem:[#allocation7 + $0xf0] sm:$0xf]  ;;  %vm1638_vm15 = vcmask 786049  }
  0xca   : > { %4290 = vmatprep.subr.bf16.mxu0 %v4289_v32  ;;  %420 = vst.msk [vmem:[#allocation2 + $0x11] sm:$0xff] %vm417_vm4, %v415_v40  ;;  %v416_v45 = vld [vmem:[%s5665_s11 + $0x18] sm:$0xf]  ;;  %v882_v46 = vld [vmem:[#allocation7 + $0x140] sm:$0xff]  ;;  %v4293_v51 = vpack.c.bf16 %v887_v39, %v883_v38  ;;  %v4266_v57 = vpack.c.bf16 %v462_v53, %v458_v48  ;;  %v430_v63 = vld [vmem:[#allocation7 + $0x18] sm:$0xff]  ;;  %vm1665_vm0 = vcmask 917249  }
  0xcb   : > { %v886_v47 = vld [vmem:[#allocation7 + $0x160] sm:$0xf]  ;;  %422 = vst.msk [vmem:[#allocation2 + $0x19] sm:$0xf] %vm421_vm5, %v416_v45  ;;  %v443_v49 = vld [vmem:[#allocation2 + $0x1] sm:$0xff]  ;;  %v1991_v1 = vld [vmem:[#allocation12 + $0x460] sm:$0xff] }
  0xcc   : > { %v5692_v50 = vld [vmem:[#allocation2] sm:$0xff]  ;;  %4007 = vmatmul.mubr.msk.f32.vlgmr.msra.gmra.mrb[0].mxu1 %vm417_vm4, %v443_v49  ;;  %v4296_v54 = vpack.c.bf16 %v886_v47, %v882_v46  ;;  %v434_v2 = vld [vmem:[#allocation7 + $0x38] sm:$0xff]  ;;  %v5788_v33 = vld [vmem:[#allocation10] sm:$0xf]  ;;  %vm1532_vm1 = vcmask 260224   ;;  %vm1559_vm2 = vcmask 391424  }
  0xcd   : > { %4019 = vmatmul.mubr.msk.f32.vlgmr.msra.gmra.mrb[0].mxu0 %vm417_vm4, %v5692_v50  ;;  %4262 = vmatpush1.bf16.msra.mxu1 %v4261_v43  ;;  %v444_v55 = vld [vmem:[#allocation2 + $0x9] sm:$0xff]  ;;  %v4279_v4 = vpack.c.bf16 %v434_v2, %v430_v63  ;;  %v429_v5 = vld [vmem:[#allocation7 + $0x10] sm:$0xff]  ;;  %v1113_v36 = vrot.slane %v5788_v33, %v5786_v31  ;;  %v1117_v38 = vrot.slane %v5788_v33, %v5791_v34  ;;  %vm1613_vm5 = vcmask 653824   ;;  %p7133_p7 = scmp.ne.s32.totalorder %s7112_s19, 0  ;;  %s5392_s13 = smov [#allocation18]  }
  0xce   : > { %4292 = vmatpush1.bf16.msra.mxu0 %v4291_v44  ;;  %559 = vmatprep.mubr.f32.mxu1 %v5380_v0  ;;  %v5699_v56 = vld [vmem:[#allocation2 + $0x8] sm:$0xff]  ;;  %v433_v6 = vld [vmem:[#allocation7 + $0x30] sm:$0xff]  ;;  %1478 = vst.msk [vmem:[#allocation4] ss:$8 sm:$0x3] %vm1476_vm7, %v5380_v0  ;;  %s5296_s15 = sshll.u32 %s5392_s13, 4  ;;  %s5297_s15 = int_to_ptr.vmem [resolvable:$false] %s5296_s15 }
  0xcf   : > { %761 = vmatprep.mubr.f32.mxu0 %v5380_v0  ;;  %4295 = vmatprep.subr.msk.bf16.mxu0 %vm5656_vm3, %v4293_v51  ;;  %v5711_v59 = vld [vmem:[#allocation2 + $0x2] sm:$0xff]  ;;  %v4281_v10 = vpack.c.bf16 %v433_v6, %v429_v5  ;;  %1481 = vst.msk [vmem:[#allocation4 + $0x17] ss:$8 sm:$0x3] %vm1476_vm7, %v5380_v0  ;;  %vm1640_vm7 = vcmask 785024   ;;  %s5298_s14 = scalar_lea.vmem %s5297_s15, 32 }
  0xd0   : > { %4265 = vmatprep.subr.msk.bf16.mxu1 %vm5656_vm3, %v4263_v52  ;;  %4008 = vmatmul.mubr.msk.f32.gmra.mrb[2].mxu1 %vm417_vm4, %v444_v55  ;;  %v438_v7 = vld [vmem:[#allocation7 + $0x58] sm:$0xff]  ;;  %v437_v12 = vld [vmem:[#allocation7 + $0x50] sm:$0xff] }
  0xd1   : > { %4020 = vmatmul.mubr.msk.f32.gmra.mrb[2].mxu0 %vm417_vm4, %v5699_v56  ;;  %565 = vmatprep.mubr.f32.mxu1 %v5380_v0  ;;  %v445_v58 = vld [vmem:[#allocation2 + $0x11] sm:$0xff]  ;;  %v442_v8 = vld [vmem:[#allocation7 + $0x78] sm:$0xf]  ;;  %v441_v13 = vld [vmem:[#allocation7 + $0x70] sm:$0xf] }
  0xd2   : > { %4298 = vmatpush1.bf16.msk.msra.mxu0 %vm5656_vm3, %v4296_v54  ;;  %978 = vmatprep.mubr.f32.mxu0 %v5380_v0  ;;  %v446_v60 = vld [vmem:[#allocation2 + $0x19] sm:$0xf]  ;;  %v5722_v61 = vld [vmem:[#allocation2 + $0xa] sm:$0xff]  ;;  %v4283_v11 = vpack.c.bf16 %v442_v8, %v438_v7  ;;  %v4286_v17 = vpack.c.bf16 %v441_v13, %v437_v12  ;;  %v880_v20 = vld [vmem:[#allocation7 + $0x130] sm:$0xff] }
  0xd3   : > { %4268 = vmatpush1.bf16.msk.msra.mxu1 %vm5656_vm3, %v4266_v57  ;;  %v5729_v62 = vld [vmem:[#allocation2 + $0x12] sm:$0xff]  ;;  %v872_v3 = vld [vmem:[#allocation2 + $0x1a] sm:$0xf]  ;;  %v881_v15 = vld [vmem:[#allocation7 + $0x138] sm:$0xff] }
  0xd4   : > { %4945 = vmatprep.subr.bf16.mxu1 %v5660_v9  ;;  %4009 = vmatmul.mubr.msk.f32.gmra.mrb[4].mxu1 %vm417_vm4, %v445_v58  ;;  %v425_v9 = vld [vmem:[#allocation2 + $0x10] sm:$0xff]  ;;  %v426_v16 = vld [vmem:[#allocation2 + $0x18] sm:$0xf]  ;;  %v885_v21 = vld [vmem:[#allocation7 + $0x158] sm:$0xff] }
  0xd5   : > { %4031 = vmatmul.mubr.msk.f32.vlgmr.msra.gmra.mrb[0].mxu0 %vm417_vm4, %v5711_v59  ;;  %571 = vmatprep.mubr.f32.mxu1 %v5380_v0  ;;  %v889_v22 = vld [vmem:[#allocation7 + $0x178] sm:$0xf]  ;;  %v884_v25 = vld [vmem:[#allocation7 + $0x150] sm:$0xff] }
  0xd6   : > { %984 = vmatprep.mubr.f32.mxu0 %v5380_v0  ;;  %v4303_v24 = vpack.c.bf16 %v889_v22, %v885_v21  ;;  %v888_v26 = vld [vmem:[#allocation7 + $0x170] sm:$0xf] }
  0xd8   : > { %4010 = vmatmul.mubr.msk.f32.gmra.mrb[6].mxu1 %vm417_vm4, %v446_v60 }
  0xd9   : > { %4032 = vmatmul.mubr.msk.f32.gmra.mrb[2].mxu0 %vm417_vm4, %v5722_v61  ;;  %642 = vmatprep.mubr.f32.mxu1 %v5380_v0 }
  0xda   : > { %990 = vmatprep.mubr.f32.mxu0 %v5380_v0 }
  0xdc   : > { %4013 = vmatmul.mubr.msk.f32.vlgmr.msra.gmra.mrb[8].mxu1 %vm417_vm4, %v443_v49 }
  0xdd   : > { %4033 = vmatmul.mubr.msk.f32.gmra.mrb[4].mxu0 %vm417_vm4, %v5729_v62  ;;  %4947 = vmatpush1.bf16.msra.mxu1 %v5667_v14  ;;  %v877_v14 = vld [vmem:[#allocation7 + $0x118] sm:$0xff] }
  0xde   : > { %648 = vmatprep.mubr.f32.mxu1 %v5380_v0  ;;  %4946 = vmatprep.subr.msk.bf16.mxu1 %vm5656_vm3, %v5670_v19  ;;  %v4299_v18 = vpack.c.bf16 %v881_v15, %v877_v14  ;;  %v876_v19 = vld [vmem:[#allocation7 + $0x110] sm:$0xff] }
  0xdf   : > { %996 = vmatprep.mubr.f32.mxu0 %v5380_v0  ;;  %v4301_v23 = vpack.c.bf16 %v880_v20, %v876_v19 }
  0xe0   : > { %4014 = vmatmul.mubr.msk.f32.gmra.mrb[10].mxu1 %vm417_vm4, %v444_v55 }
  0xe1   : > { %4034 = vmatmul.mubr.msk.f32.gmra.mrb[6].mxu0 %vm417_vm4, %v872_v3  ;;  %654 = vmatprep.mubr.f32.mxu1 %v5380_v0 }
  0xe2   : > { %4948 = vmatpush1.bf16.msk.msra.mxu1 %vm5656_vm3, %v5679_v27  ;;  %v4306_v27 = vpack.c.bf16 %v888_v26, %v884_v25 }
  0xe3   : > { %4280 = vmatprep.subr.bf16.mxu1 %v4279_v4 }
  0xe4   : > { %4015 = vmatmul.mubr.msk.f32.gmra.mrb[12].mxu1 %vm417_vm4, %v445_v58 }
  0xe5   : > { %660 = vmatprep.mubr.f32.mxu1 %v5380_v0 }
  0xe8   : > { %4016 = vmatmul.mubr.msk.f32.gmra.mrb[14].mxu1 %vm417_vm4, %v446_v60 }
  0xe9   : > { %767 = vmatprep.mubr.f32.mxu1 %v5380_v0 }
  0xec   : > { %4021 = vmatmul.mubr.msk.f32.vlgmr.msra.gmra.mrb[4].mxu1 %vm417_vm4, %v425_v9 }
  0xed   : > { %4282 = vmatpush1.bf16.msra.mxu1 %v4281_v10  ;;  %773 = vmatprep.mubr.f32.mxu1 %v5380_v0 }
  0xee   : > { %4285 = vmatprep.subr.msk.bf16.mxu1 %vm5656_vm3, %v4283_v11 }
  0xf0   : > { %4022 = vmatmul.mubr.msk.f32.gmra.mrb[6].mxu1 %vm417_vm4, %v426_v16 }
  0xf1   : > { %4288 = vmatpush1.bf16.msk.msra.mxu1 %vm5656_vm3, %v4286_v17  ;;  %844 = vmatprep.mubr.f32.mxu1 %v5380_v0 }
  0xf2   : > { %4300 = vmatprep.subr.bf16.mxu1 %v4299_v18 }
  0xf4   : > { %4025 = vmatmul.mubr.msk.f32.vlgmr.msra.gmra.mrb[8].mxu1 %vm417_vm4, %v5692_v50 }
  0xf5   : > { %4302 = vmatpush1.bf16.msra.mxu1 %v4301_v23  ;;  %850 = vmatprep.mubr.f32.mxu1 %v5380_v0 }
  0xf6   : > { %4305 = vmatprep.subr.msk.bf16.mxu1 %vm5656_vm3, %v4303_v24 }
  0xf8   : > { %4026 = vmatmul.mubr.msk.f32.gmra.mrb[10].mxu1 %vm417_vm4, %v5699_v56 }
  0xf9   : > { %856 = vmatprep.mubr.f32.mxu1 %v5380_v0  ;;  %4308 = vmatpush1.bf16.msk.msra.mxu1 %vm5656_vm3, %v4306_v27  ;;  %vm1692_vm3 = vcmask 1048449  }
  0xfc   : > { %4027 = vmatmul.mubr.msk.f32.gmra.mrb[12].mxu1 %vm417_vm4, %v425_v9 }
  0xfd   : > { %862 = vmatprep.mubr.f32.mxu1 %v5380_v0 }
 0x100   : > { %4028 = vmatmul.mubr.msk.f32.gmra.mrb[14].mxu1 %vm417_vm4, %v426_v16 }
 0x101   : > { %1067 = vmatprep.mubr.f32.mxu1 %v5380_v0 }
 0x104   : > { %4037 = vmatmul.mubr.msk.f32.vlgmr.msra.gmra.mrb[8].mxu1 %vm417_vm4, %v5711_v59 }
 0x105   : > { %1073 = vmatprep.mubr.f32.mxu1 %v5380_v0 }
 0x108   : > { %4038 = vmatmul.mubr.msk.f32.gmra.mrb[10].mxu1 %vm417_vm4, %v5722_v61 }
 0x109   : > { %1079 = vmatprep.mubr.f32.mxu1 %v5380_v0 }
 0x10c   : > { %4039 = vmatmul.mubr.msk.f32.gmra.mrb[12].mxu1 %vm417_vm4, %v5729_v62 }
 0x10d   : > { %1085 = vmatprep.mubr.f32.mxu1 %v5380_v0 }
 0x110   : > { %4040 = vmatmul.mubr.msk.f32.gmra.mrb[14].mxu1 %vm417_vm4, %v872_v3  ;;  %vm1586_vm4 = vcmask 522624  }
 0x19f   : > { %v555_v29 = vpop.f32.mrb[0].mxu1 }
 0x1a0   : > { %v557_v30 = vpop.f32.mrb[1].mxu1 }
 0x1a3   : > { %v561_v32 = vpop.f32.mrb[2].mxu1 }
 0x1a4   : > { %v563_v35 = vpop.f32.mrb[3].mxu1 }
 0x1a8   : > { %v980_v37 = vpop.f32.mrb[0].mxu0 }
 0x1a9   : > { %v4949_v39 = vadd.f32 %v980_v37, %v555_v29  ;;  %v982_v40 = vpop.f32.mrb[1].mxu0 }
 0x1aa   : > { %v4950_v41 = vadd.f32 %v982_v40, %v557_v30  ;;  %v1124_v40 = vsub.s32 3, %v5783_v28 }
 0x1ab   : > { %v1130_v42 = vadd.f32 %v4949_v39, %v1113_v36 }
 0x1ac   : > { %v1131_v43 = vadd.f32 %v4950_v41, %v1117_v38  ;;  %v986_v44 = vpop.f32.mrb[2].mxu0 }
 0x1ad   : > { %v1146_v45 = vmax.f32 %v1130_v42, 0.0  ;;  %v4951_v46 = vadd.f32 %v986_v44, %v561_v32  ;;  %v988_v47 = vpop.f32.mrb[3].mxu0  ;;  %v1125_v42 = vrot.slane %v5788_v33, %v1124_v40 }
 0x1ae   : > { %v1147_v48 = vmax.f32 %v1131_v43, 0.0  ;;  %v4952_v49 = vadd.f32 %v988_v47, %v563_v35  ;;  %v5382_v43 = vmov 1966171168  }
 0x1af   : > { %v1166_v50 = vrot.slane %v1146_v45, 1  ;;  %v1134_v51 = vadd.f32 %v4951_v46, %v1113_v36  ;;  %v1185_v44 = vunpack.c.l.s4 %v5382_v43 }
 0x1b0   : > { %v1167_v52 = vrot.slane %v1147_v48, 1  ;;  %v1135_v53 = vadd.f32 %v4952_v49, %v1117_v38  ;;  %v992_v54 = vpop.f32.mrb[4].mxu0 }
 0x1b1   : > { %v5797_v55 = vmax.f32 %v1146_v45, %v1166_v50  ;;  %v1150_v56 = vmax.f32 %v1134_v51, 0.0  ;;  %v994_v57 = vpop.f32.mrb[5].mxu0  ;;  %v1186_v49 = vunpack.c.0.s8 %v1185_v44 }
 0x1b2   : > { %v5799_v58 = vmax.f32 %v1147_v48, %v1167_v52  ;;  %v1151_v59 = vmax.f32 %v1135_v53, 0.0 }
 0x1b3   : > { %v1255_v60 = vrot.slane %v1150_v56, 1 }
 0x1b4   : > { %v1182_v61 = vcombine.low %v5797_v55, %v5799_v58  ;;  %v1218_v62 = vcombine.high %v5797_v55, %v5799_v58  ;;  %v1256_v63 = vrot.slane %v1151_v59, 1  ;;  %v998_v2 = vpop.f32.mrb[6].mxu0 }
 0x1b5   : > { %v5805_v3 = vmax.f32 %v1150_v56, %v1255_v60  ;;  %v1000_v4 = vpop.f32.mrb[7].mxu0  ;;  %v5836_v60 = vsub.s32 %v1186_v49, %v5783_v28 }
 0x1b6   : > { %v5807_v5 = vmax.f32 %v1151_v59, %v1256_v63 }
 0x1b8   : > { %v1271_v6 = vcombine.low %v5805_v3, %v5807_v5  ;;  %v1304_v7 = vcombine.high %v5805_v3, %v5807_v5 }
 0x1ba   : > { %v1312_v55 = vrot.slane %v1304_v7, %v5836_v60 }
 0x1bf   : > { %v769_v8 = vpop.f32.mrb[4].mxu1 }
 0x1c0   : > { %v4953_v9 = vadd.f32 %v992_v54, %v769_v8  ;;  %v771_v10 = vpop.f32.mrb[5].mxu1 }
 0x1c1   : > { %v4954_v11 = vadd.f32 %v994_v57, %v771_v10 }
 0x1c2   : > { %v1138_v12 = vadd.f32 %v4953_v9, %v1113_v36  ;;  %v5390_v9 = vmov 0.0|0.0  }
 0x1c3   : > { %v1139_v13 = vadd.f32 %v4954_v11, %v1117_v38  ;;  %v775_v14 = vpop.f32.mrb[6].mxu1  ;;  %4645 = vmatprep.subr.bf16.mxu0 %v5390_v9 }
 0x1c4   : > { %v1154_v15 = vmax.f32 %v1138_v12, 0.0  ;;  %v4955_v16 = vadd.f32 %v998_v2, %v775_v14  ;;  %v777_v17 = vpop.f32.mrb[7].mxu1 }
 0x1c5   : > { %v1155_v18 = vmax.f32 %v1139_v13, 0.0  ;;  %v4956_v19 = vadd.f32 %v1000_v4, %v777_v17  ;;  %v1190_v17 = vrot.slane %v1182_v61, %v5836_v60 }
 0x1c6   : > { %v1341_v20 = vrot.slane %v1154_v15, 1  ;;  %v1142_v21 = vadd.f32 %v4955_v16, %v1113_v36 }
 0x1c7   : > { %v1342_v22 = vrot.slane %v1155_v18, 1  ;;  %v1143_v23 = vadd.f32 %v4956_v19, %v1117_v38  ;;  %v1120_v38 = vsub.s32 2, %v5783_v28 }
 0x1c8   : > { %v5813_v24 = vmax.f32 %v1154_v15, %v1341_v20  ;;  %v1158_v25 = vmax.f32 %v1142_v21, 0.0 }
 0x1c9   : > { %v5815_v26 = vmax.f32 %v1155_v18, %v1342_v22  ;;  %v1159_v27 = vmax.f32 %v1143_v23, 0.0  ;;  %v1121_v41 = vrot.slane %v5788_v33, %v1120_v38  ;;  %v1226_v18 = vrot.slane %v1218_v62, %v5836_v60 }
 0x1ca   : > { %v1427_v29 = vrot.slane %v1158_v25, 1 }
 0x1cb   : > { %v1357_v30 = vcombine.low %v5813_v24, %v5815_v26  ;;  %v1390_v32 = vcombine.high %v5813_v24, %v5815_v26  ;;  %v1428_v35 = vrot.slane %v1159_v27, 1 }
 0x1cc   : > { %v5821_v37 = vmax.f32 %v1158_v25, %v1427_v29  ;;  %v1279_v29 = vrot.slane %v1271_v6, %v5836_v60 }
 0x1cd   : > { %v5823_v39 = vmax.f32 %v1159_v27, %v1428_v35 }
 0x1cf   : > { %v1443_v36 = vcombine.low %v5821_v37, %v5823_v39 }
 0x1d1   : > { %v1451_v24 = vrot.slane %v1443_v36, %v5836_v60 }
 0x1d7   : > { %v1069_v45 = vpop.f32.mrb[8].mxu1 }
 0x1d8   : > { %v1132_v46 = vadd.f32 %v1121_v41, %v1069_v45  ;;  %v1071_v47 = vpop.f32.mrb[9].mxu1 }
 0x1d9   : > { %v1133_v48 = vadd.f32 %v1125_v42, %v1071_v47 }
 0x1da   : > { %v1148_v50 = vmax.f32 %v1132_v46, 0.0 }
 0x1db   : > { %v1149_v51 = vmax.f32 %v1133_v48, 0.0  ;;  %v1075_v52 = vpop.f32.mrb[10].mxu1 }
 0x1dc   : > { %v1168_v53 = vrot.slane %v1148_v50, 1  ;;  %v1136_v54 = vadd.f32 %v1121_v41, %v1075_v52  ;;  %v1077_v56 = vpop.f32.mrb[11].mxu1 }
 0x1dd   : > { %v1169_v57 = vrot.slane %v1149_v51, 1  ;;  %v1137_v59 = vadd.f32 %v1125_v42, %v1077_v56 }
 0x1de   : > { %v1176_v63 = vmax.f32 %v1148_v50, %v1168_v53  ;;  %v1152_v33 = vmax.f32 %v1136_v54, 0.0 }
 0x1df   : > { %v1177_v2 = vmax.f32 %v1149_v51, %v1169_v57  ;;  %v1153_v4 = vmax.f32 %v1137_v59, 0.0  ;;  %v1081_v8 = vpop.f32.mrb[12].mxu1 }
 0x1e0   : > { %v1257_v10 = vrot.slane %v1152_v33, 1  ;;  %v1140_v11 = vadd.f32 %v1121_v41, %v1081_v8  ;;  %v1083_v12 = vpop.f32.mrb[13].mxu1  ;;  %v1398_v8 = vrot.slane %v1390_v32, %v5836_v60 }
 0x1e1   : > { %v1183_v13 = vcombine.low %v1176_v63, %v1177_v2  ;;  %v1219_v14 = vcombine.high %v1176_v63, %v1177_v2  ;;  %v1258_v15 = vrot.slane %v1153_v4, 1  ;;  %v1141_v16 = vadd.f32 %v1125_v42, %v1083_v12 }
 0x1e2   : > { %v1265_v19 = vmax.f32 %v1152_v33, %v1257_v10  ;;  %v1156_v20 = vmax.f32 %v1140_v11, 0.0  ;;  %v1365_v33 = vrot.slane %v1357_v30, %v5836_v60 }
 0x1e3   : > { %v1197_v21 = vrot.slane %v1183_v13, %v5836_v60  ;;  %v1233_v22 = vrot.slane %v1219_v14, %v5836_v60  ;;  %v1266_v23 = vmax.f32 %v1153_v4, %v1258_v15  ;;  %v1157_v25 = vmax.f32 %v1141_v16, 0.0  ;;  %v1087_v27 = vpop.f32.mrb[14].mxu1 }
 0x1e4   : > { %v1343_v58 = vrot.slane %v1156_v20, 1  ;;  %v1144_v61 = vadd.f32 %v1121_v41, %v1087_v27  ;;  %v1089_v62 = vpop.f32.mrb[15].mxu1 }
 0x1e5   : > { %v1198_v35 = vcombine.low %v1190_v17, %v1197_v21  ;;  %v1234_v43 = vcombine.low %v1226_v18, %v1233_v22  ;;  %v1272_v44 = vcombine.low %v1265_v19, %v1266_v23  ;;  %v1305_v45 = vcombine.high %v1265_v19, %v1266_v23 }
 0x1e6   : > { %v1351_v46 = vmax.f32 %v1156_v20, %v1343_v58  ;;  %v1344_v47 = vrot.slane %v1157_v25, 1  ;;  %v1160_v48 = vmax.f32 %v1144_v61, 0.0  ;;  %v1145_v49 = vadd.f32 %v1125_v42, %v1089_v62 }
 0x1e7   : > { %v1205_v50 = vrot.slane %v1198_v35, %v5836_v60  ;;  %v1241_v6 = vrot.slane %v1234_v43, %v5836_v60  ;;  %v1286_v51 = vrot.slane %v1272_v44, %v5836_v60  ;;  %v1319_v3 = vrot.slane %v1305_v45, %v5836_v60 }
 0x1e8   : > { %v1352_v5 = vmax.f32 %v1157_v25, %v1344_v47  ;;  %v1429_v7 = vrot.slane %v1160_v48, 1  ;;  %v1161_v41 = vmax.f32 %v1145_v49, 0.0 }
 0x1e9   : > { %1211 = vst.msk [vmem:[#allocation3] ss:$8 sm:$0xf] %vm5839_vm6, %v1205_v50  ;;  %v1213_v52 = vcombine.high %v1205_v50, %v1205_v50  ;;  %1244 = vst.msk [vmem:[#allocation3 + $0x2] ss:$8 sm:$0xf] %vm5839_vm6, %v1241_v6  ;;  %v1246_v53 = vcombine.high %v1241_v6, %v1241_v6  ;;  %v1287_v42 = vcombine.low %v1279_v29, %v1286_v51 }
 0x1ea   : > { %v1320_v54 = vcombine.low %v1312_v55, %v1319_v3  ;;  %v1358_v56 = vcombine.low %v1351_v46, %v1352_v5  ;;  %v1391_v57 = vcombine.high %v1351_v46, %v1352_v5  ;;  %v1437_v59 = vmax.f32 %v1160_v48, %v1429_v7 }
 0x1eb   : > { %v1430_v63 = vrot.slane %v1161_v41, 1  ;;  %1216 = vst.msk [vmem:[#allocation3 + $0x1] ss:$8 sm:$0xf] %vm5839_vm6, %v1213_v52  ;;  %v1294_v2 = vrot.slane %v1287_v42, %v5836_v60 }
 0x1ec   : > { %1249 = vst.msk [vmem:[#allocation3 + $0x3] ss:$8 sm:$0xf] %vm5839_vm6, %v1246_v53  ;;  %v1327_v4 = vrot.slane %v1320_v54, %v5836_v60  ;;  %v1372_v10 = vrot.slane %v1358_v56, %v5836_v60  ;;  %v1405_v11 = vrot.slane %v1391_v57, %v5836_v60 }
 0x1ed   : > { %v1438_v30 = vmax.f32 %v1161_v41, %v1430_v63  ;;  %1297 = vst.msk [vmem:[#allocation3 + $0x4] ss:$8 sm:$0xf] %vm5839_vm6, %v1294_v2  ;;  %v1299_v12 = vcombine.high %v1294_v2, %v1294_v2 }
 0x1ee   : > { %1330 = vst.msk [vmem:[#allocation3 + $0x6] ss:$8 sm:$0xf] %vm5839_vm6, %v1327_v4  ;;  %v1332_v13 = vcombine.high %v1327_v4, %v1327_v4  ;;  %v1373_v14 = vcombine.low %v1365_v33, %v1372_v10  ;;  %v1406_v15 = vcombine.low %v1398_v8, %v1405_v11 }
 0x1ef   : > { %v1444_v16 = vcombine.low %v1437_v59, %v1438_v30  ;;  %1302 = vst.msk [vmem:[#allocation3 + $0x5] ss:$8 sm:$0xf] %vm5839_vm6, %v1299_v12 }
 0x1f0   : > { %1335 = vst.msk [vmem:[#allocation3 + $0x7] ss:$8 sm:$0xf] %vm5839_vm6, %v1332_v13  ;;  %v1380_v26 = vrot.slane %v1373_v14, %v5836_v60  ;;  %v1413_v32 = vrot.slane %v1406_v15, %v5836_v60  ;;  %v1964_v14 = vld [vmem:[#allocation12 + $0x388] sm:$0xff] }
 0x1f1   : > { %v1458_v17 = vrot.slane %v1444_v16, %v5836_v60  ;;  %v1968_v15 = vld [vmem:[#allocation12 + $0x3a8] sm:$0xff] }
 0x1f2   : > { %1383 = vst.msk [vmem:[#allocation3 + $0x20] ss:$8 sm:$0xf] %vm5839_vm6, %v1380_v26  ;;  %v1385_v18 = vcombine.high %v1380_v26, %v1380_v26  ;;  %1416 = vst.msk [vmem:[#allocation3 + $0x22] ss:$8 sm:$0xf] %vm5839_vm6, %v1413_v32  ;;  %v1418_v19 = vcombine.high %v1413_v32, %v1413_v32 }
 0x1f3   : > { %v1459_v20 = vcombine.low %v1451_v24, %v1458_v17  ;;  %v4309_v24 = vpack.c.bf16 %v1968_v15, %v1964_v14  ;;  %v1979_v14 = vld [vmem:[#allocation12 + $0x400] sm:$0xff] }
 0x1f4   : > { %1388 = vst.msk [vmem:[#allocation3 + $0x21] ss:$8 sm:$0xf] %vm5839_vm6, %v1385_v18  ;;  %1421 = vst.msk [vmem:[#allocation3 + $0x23] ss:$8 sm:$0xf] %vm5839_vm6, %v1418_v19 }
 0x1f5   : > { %v1466_v37 = vrot.slane %v1459_v20, %v5836_v60  ;;  %4310 = vmatprep.subr.bf16.mxu1 %v4309_v24  ;;  %v1963_v18 = vld [vmem:[#allocation12 + $0x380] sm:$0xff] }
 0x1f6   : > { %v1967_v19 = vld [vmem:[#allocation12 + $0x3a0] sm:$0xff] }
 0x1f7   : > { %1469 = vst.msk [vmem:[#allocation3 + $0x24] ss:$8 sm:$0xf] %vm5839_vm6, %v1466_v37  ;;  %v1471_v39 = vcombine.high %v1466_v37, %v1466_v37  ;;  %v5911_v36 = vld [vmem:[#allocation3] sm:$0xff]  ;;  %v5919_v21 = vld [vmem:[#allocation3 + $0x10] sm:$0xff]  ;;  %v5935_v25 = vld [vmem:[#allocation3 + $0x8] sm:$0xff]  ;;  %v4311_v37 = vpack.c.bf16 %v1967_v19, %v1963_v18 }
 0x1f8   : > { %1538 = vrot.lane.b32.xlu1 %v5911_v36, %s5383_s18  ;;  %1511 = vrot.lane.b32.xlu0 %v5911_v36, %s5383_s18  ;;  %v5955_v58 = vld [vmem:[#allocation3 + $0x18] sm:$0xff] }
 0x1f9   : > { %1474 = vst.msk [vmem:[#allocation3 + $0x25] ss:$8 sm:$0xf] %vm5839_vm6, %v1471_v39  ;;  %v1972_v39 = vld [vmem:[#allocation12 + $0x3c8] sm:$0xff]  ;;  %4312 = vmatpush1.bf16.msra.mxu1 %v4311_v37  ;;  %v1983_v15 = vld [vmem:[#allocation12 + $0x420] sm:$0xff] }
 0x1fa   : > { %v4319_v18 = vpack.c.bf16 %v1983_v15, %v1979_v14  ;;  %v1988_v19 = vld [vmem:[#allocation12 + $0x448] sm:$0xff] }
 0x1fb   : > { %v1992_v37 = vld [vmem:[#allocation12 + $0x468] sm:$0xff] }
 0x1fc   : > { %1721 = vrot.lane.b32.xlu0 %v5919_v21, %s5383_s18 }
 0x200   : > { %1565 = vrot.lane.b32.xlu0 %v5911_v36, %s5383_s18  ;;  %v5925_v22 = vld [vmem:[#allocation3 + $0x20] sm:$0x3f]  ;;  %v5931_v23 = vld [vmem:[#allocation3 + $0x30] sm:$0x3f]  ;;  %v5951_v55 = vld [vmem:[#allocation3 + $0x28] sm:$0x3f] }
 0x201   : > { %1540 = vrot.lane.b32.xlu1 %v5925_v22, %s5383_s18  ;;  %v5939_v27 = vld [vmem:[#allocation3 + $0x20] sm:$0x3f]  ;;  %v5945_v29 = vld [vmem:[#allocation3 + $0x30] sm:$0x3f]  ;;  %v5965_v62 = vld [vmem:[#allocation3 + $0x28] sm:$0x3f] }
 0x202   : > { %v5959_v61 = vld [vmem:[#allocation3 + $0x30] sm:$0x3f]  ;;  %v5969_v35 = vld [vmem:[#allocation3 + $0x20] sm:$0x3f]  ;;  %v5971_v43 = vld [vmem:[#allocation3 + $0x38] sm:$0x3f] }
 0x203   : > { %v5977_v44 = vld [vmem:[#allocation3 + $0x28] sm:$0x3f]  ;;  %v5983_v45 = vld [vmem:[#allocation3 + $0x38] sm:$0x3f]  ;;  %v5997_v47 = vld [vmem:[#allocation3 + $0x20] sm:$0x3f] }
 0x204   : > { %1746 = vrot.lane.b32.xlu0 %v5919_v21, %s5383_s18  ;;  %v5989_v46 = vld [vmem:[#allocation3 + $0x28] sm:$0x3f]  ;;  %v6001_v48 = vld [vmem:[#allocation3 + $0x30] sm:$0x3f] }
 0x205   : > { %1723 = vrot.lane.b32.xlu1 %v5931_v23, %s5383_s18 }
 0x208   : > { %1592 = vrot.lane.b32.xlu0 %v5935_v25, %s5383_s18 }
 0x209   : > { %1567 = vrot.lane.b32.xlu1 %v5939_v27, %s5383_s18 }
 0x20c   : > { %1771 = vrot.lane.b32.xlu0 %v5919_v21, %s5383_s18 }
 0x20d   : > { %1748 = vrot.lane.b32.xlu1 %v5945_v29, %s5383_s18 }
 0x210   : > { %1619 = vrot.lane.b32.xlu0 %v5935_v25, %s5383_s18 }
 0x211   : > { %1594 = vrot.lane.b32.xlu1 %v5951_v55, %s5383_s18 }
 0x214   : > { %1796 = vrot.lane.b32.xlu0 %v5955_v58, %s5383_s18 }
 0x215   : > { %1773 = vrot.lane.b32.xlu1 %v5959_v61, %s5383_s18 }
 0x218   : > { %1646 = vrot.lane.b32.xlu0 %v5935_v25, %s5383_s18 }
 0x219   : > { %1621 = vrot.lane.b32.xlu1 %v5965_v62, %s5383_s18 }
 0x21c   : > { %1513 = vrot.lane.b32.xlu0 %v5969_v35, %s5383_s18 }
 0x21d   : > { %1798 = vrot.lane.b32.xlu1 %v5971_v43, %s5383_s18 }
 0x220   : > { %1821 = vrot.lane.b32.xlu0 %v5955_v58, %s5383_s18 }
 0x221   : > { %1648 = vrot.lane.b32.xlu1 %v5977_v44, %s5383_s18 }
 0x224   : > { %1673 = vrot.lane.b32.xlu0 %v5935_v25, %s5383_s18 }
 0x225   : > { %1823 = vrot.lane.b32.xlu1 %v5983_v45, %s5383_s18 }
 0x228   : > { %1487 = vrot.lane.b32.xlu0 %v5911_v36, %s5383_s18 }
 0x229   : > { %1675 = vrot.lane.b32.xlu1 %v5989_v46, %s5383_s18 }
 0x22c   : > { %1700 = vrot.lane.b32.xlu0 %v5919_v21, %s5383_s18 }
 0x22d   : > { %1489 = vrot.lane.b32.xlu1 %v5997_v47, %s5383_s18 }
 0x231   : > { %1702 = vrot.lane.b32.xlu1 %v6001_v48, %s5383_s18 }
 0x26a   : > { %v1539_v49 = vpop.permute.xlu1 %1538  ;;  %v1512_v50 = vpop.permute.xlu0 %1511 }
 0x26b   : > { %v1517_v6 = vmax.f32 %v5911_v36, %v1512_v50  ;;  %v1544_v51 = vmax.f32 %v5911_v36, %v1539_v49  ;;  %v1976_v49 = vld [vmem:[#allocation12 + $0x3e8] sm:$0xff] }
 0x26c   : > { %v4313_v50 = vpack.c.bf16 %v1976_v49, %v1972_v39  ;;  %v1987_v39 = vld [vmem:[#allocation12 + $0x440] sm:$0xff]  ;;  %v4321_v49 = vpack.c.bf16 %v1992_v37, %v1988_v19  ;;  %v2008_v19 = vld [vmem:[#allocation12 + $0x4e8] sm:$0xff] }
 0x26d   : > { %v6007_v3 = vrot.slane %v1517_v6, 7  ;;  %v6011_v7 = vrot.slane %v1544_v51, 7  ;;  %v2003_v37 = vld [vmem:[#allocation12 + $0x4c0] sm:$0xff] }
 0x26e   : > { %v1722_v5 = vpop.permute.xlu0 %1721  ;;  %4314 = vmatprep.subr.bf16.mxu1 %v4313_v50 }
 0x26f   : > { %1524 = vrot.lane.b32.xlu0 %v6007_v3, %s5383_s18  ;;  %v1727_v41 = vmax.f32 %v5919_v21, %v1722_v5 }
 0x271   : > { %v6018_v42 = vrot.slane %v1727_v41, 7  ;;  %v1971_v41 = vld [vmem:[#allocation12 + $0x3c0] sm:$0xff] }
 0x272   : > { %v1566_v52 = vpop.permute.xlu0 %1565 }
 0x273   : > { %v6014_v53 = vpop.permute.xlu1 %1540  ;;  %1551 = vrot.lane.b32.xlu0 %v6011_v7, %s5384_s25  ;;  %v1571_v54 = vmax.f32 %v5911_v36, %v1566_v52  ;;  %v1975_v52 = vld [vmem:[#allocation12 + $0x3e0] sm:$0xff] }
 0x274   : > { %v1545_v24 = vmax.f32 %v5925_v22, %v6014_v53  ;;  %v4323_v53 = vpack.c.bf16 %v1991_v1, %v1987_v39 }
 0x275   : > { %v6025_v59 = vrot.slane %v1571_v54, 7 }
 0x276   : > { %v1747_v56 = vpop.permute.xlu0 %1746 }
 0x277   : > { %v6021_v57 = vpop.permute.xlu1 %1723  ;;  %1734 = vrot.lane.b32.xlu0 %v6018_v42, %s5383_s18  ;;  %v1752_v63 = vmax.f32 %v5919_v21, %v1747_v56  ;;  %v4315_v56 = vpack.c.bf16 %v1975_v52, %v1971_v41 }
 0x279   : > { %v6032_v4 = vrot.slane %v1752_v63, 7  ;;  %v1980_v63 = vld [vmem:[#allocation12 + $0x408] sm:$0xff]  ;;  %4316 = vmatpush1.bf16.msra.mxu1 %v4315_v56 }
 0x27a   : > { %v1593_v33 = vpop.permute.xlu0 %1592 }
 0x27b   : > { %v6028_v2 = vpop.permute.xlu1 %1567  ;;  %1578 = vrot.lane.b32.xlu0 %v6025_v59, %s5385_s28  ;;  %v1598_v8 = vmax.f32 %v5935_v25, %v1593_v33  ;;  %v1984_v33 = vld [vmem:[#allocation12 + $0x428] sm:$0xff] }
 0x27c   : > { %v1572_v15 = vmax.f32 %v5939_v27, %v6028_v2 }
 0x27d   : > { %v6039_v30 = vrot.slane %v1598_v8, 7  ;;  %v4317_v8 = vpack.c.bf16 %v1984_v33, %v1980_v63  ;;  %v1996_v63 = vld [vmem:[#allocation12 + $0x488] sm:$0xff] }
 0x27e   : > { %v1772_v10 = vpop.permute.xlu0 %1771  ;;  %v2000_v33 = vld [vmem:[#allocation12 + $0x4a8] sm:$0xff] }
 0x27f   : > { %v6035_v11 = vpop.permute.xlu1 %1748  ;;  %1759 = vrot.lane.b32.xlu0 %v6032_v4, %s5384_s25  ;;  %v1777_v12 = vmax.f32 %v5919_v21, %v1772_v10  ;;  %4318 = vmatprep.subr.bf16.mxu1 %v4317_v8  ;;  %v1995_v8 = vld [vmem:[#allocation12 + $0x480] sm:$0xff] }
 0x280   : > { %4320 = vmatpush1.bf16.msra.mxu1 %v4319_v18  ;;  %v2004_v18 = vld [vmem:[#allocation12 + $0x4c8] sm:$0xff] }
 0x281   : > { %v6046_v26 = vrot.slane %v1777_v12, 7  ;;  %4322 = vmatprep.subr.bf16.mxu1 %v4321_v49  ;;  %v4329_v39 = vpack.c.bf16 %v2008_v19, %v2004_v18  ;;  %v2007_v49 = vld [vmem:[#allocation12 + $0x4e0] sm:$0xff] }
 0x282   : > { %v1620_v13 = vpop.permute.xlu0 %1619  ;;  %v4331_v27 = vpack.c.bf16 %v2007_v49, %v2003_v37  ;;  %v2028_v37 = vld [vmem:[#allocation12 + $0x588] sm:$0xff]  ;;  %v2027_v49 = vld [vmem:[#allocation12 + $0x580] sm:$0xff] }
 0x283   : > { %v6042_v16 = vpop.permute.xlu1 %1594  ;;  %1605 = vrot.lane.b32.xlu0 %v6039_v30, %s5386_s2  ;;  %v1625_v32 = vmax.f32 %v5935_v25, %v1620_v13 }
 0x284   : > { %4324 = vmatpush1.bf16.msra.mxu1 %v4323_v53 }
 0x285   : > { %v6053_v6 = vrot.slane %v1625_v32, 7 }
 0x286   : > { %v1797_v17 = vpop.permute.xlu0 %1796 }
 0x287   : > { %v6049_v20 = vpop.permute.xlu1 %1773  ;;  %1784 = vrot.lane.b32.xlu0 %v6046_v26, %s5385_s28  ;;  %v1802_v51 = vmax.f32 %v5955_v58, %v1797_v17 }
 0x288   : > { %v1778_v19 = vmax.f32 %v5959_v61, %v6049_v20 }
 0x289   : > { %v6060_v10 = vrot.slane %v1802_v51, 7 }
 0x28a   : > { %v1647_v5 = vpop.permute.xlu0 %1646 }
 0x28b   : > { %v6056_v54 = vpop.permute.xlu1 %1621  ;;  %1632 = vrot.lane.b32.xlu0 %v6053_v6, %s5387_s4  ;;  %v1652_v12 = vmax.f32 %v5935_v25, %v1647_v5  ;;  %v1728_v5 = vmax.f32 %v5931_v23, %v6021_v57 }
 0x28d   : > { %v6073_v50 = vrot.slane %v1652_v12, 7  ;;  %v4325_v12 = vpack.c.bf16 %v2000_v33, %v1996_v63  ;;  %v2015_v63 = vld [vmem:[#allocation12 + $0x520] sm:$0xff] }
 0x28e   : > { %v1514_v13 = vpop.permute.xlu0 %1513 }
 0x28f   : > { %v6066_v32 = vpop.permute.xlu1 %1798  ;;  %v1518_v17 = vmax.f32 %v5969_v35, %v1514_v13  ;;  %1809 = vrot.lane.b32.xlu0 %v6060_v10, %s5386_s2  ;;  %v1549_v35 = vrot.slane %v1545_v24, 7  ;;  %v1999_v13 = vld [vmem:[#allocation12 + $0x4a0] sm:$0xff]  ;;  %4326 = vmatprep.subr.bf16.mxu1 %v4325_v12 }
 0x290   : > { %v4327_v23 = vpack.c.bf16 %v1999_v13, %v1995_v8  ;;  %v1599_v8 = vmax.f32 %v5951_v55, %v6042_v16 }
 0x291   : > { %v1522_v22 = vrot.slane %v1518_v17, 7  ;;  %v1550_v17 = vsel %vm1497_vm8, %v6011_v7, %v1549_v35  ;;  %v2012_v35 = vld [vmem:[#allocation12 + $0x508] sm:$0xff] }
 0x292   : > { %v1822_v51 = vpop.permute.xlu0 %1821  ;;  %4328 = vmatpush1.bf16.msra.mxu1 %v4327_v23  ;;  %v2020_v23 = vld [vmem:[#allocation12 + $0x548] sm:$0xff] }
 0x293   : > { %v6077_v41 = vpop.permute.xlu1 %1648  ;;  %v1827_v52 = vmax.f32 %v5955_v58, %v1822_v51  ;;  %1659 = vrot.lane.b32.xlu0 %v6073_v50, %s5388_s30  ;;  %v1523_v56 = vsel %vm1497_vm8, %v6007_v3, %v1522_v22  ;;  %v1732_v58 = vrot.slane %v1728_v5, 7  ;;  %4330 = vmatprep.subr.bf16.mxu1 %v4329_v39  ;;  %v1753_v22 = vmax.f32 %v5945_v29, %v6035_v11  ;;  %v2016_v5 = vld [vmem:[#allocation12 + $0x528] sm:$0xff] }
 0x294   : > { %1526 = vrot.lane.b32.xlu1 %v1523_v56, %s5383_s18  ;;  %v4333_v56 = vpack.c.bf16 %v2016_v5, %v2012_v35  ;;  %v2032_v39 = vld [vmem:[#allocation12 + $0x5a8] sm:$0xff] }
 0x295   : > { %v6085_v14 = vrot.slane %v1827_v52, 7  ;;  %v1733_v51 = vsel %vm1497_vm8, %v6018_v42, %v1732_v58  ;;  %v2011_v52 = vld [vmem:[#allocation12 + $0x500] sm:$0xff]  ;;  %v2036_v35 = vld [vmem:[#allocation12 + $0x5c8] sm:$0xff] }
 0x296   : > { %v1674_v57 = vpop.permute.xlu0 %1673  ;;  %4332 = vmatpush1.bf16.msra.mxu1 %v4331_v27  ;;  %v4335_v11 = vpack.c.bf16 %v2015_v63, %v2011_v52  ;;  %v2019_v58 = vld [vmem:[#allocation12 + $0x540] sm:$0xff]  ;;  %v2040_v5 = vld [vmem:[#allocation12 + $0x5e8] sm:$0xff] }
 0x297   : > { %v6089_v24 = vpop.permute.xlu1 %1823  ;;  %v1679_v3 = vmax.f32 %v5935_v25, %v1674_v57  ;;  %1834 = vrot.lane.b32.xlu0 %v6085_v14, %s5387_s4  ;;  %v1576_v25 = vrot.slane %v1572_v15, 7  ;;  %4334 = vmatprep.subr.bf16.mxu1 %v4333_v56  ;;  %v2024_v57 = vld [vmem:[#allocation12 + $0x568] sm:$0xff]  ;;  %v4345_v56 = vpack.c.bf16 %v2040_v5, %v2036_v35  ;;  %v2039_v63 = vld [vmem:[#allocation12 + $0x5e0] sm:$0xff] }
 0x298   : > { %1553 = vrot.lane.b32.xlu1 %v1550_v17, %s5384_s25  ;;  %v2023_v17 = vld [vmem:[#allocation12 + $0x560] sm:$0xff] }
 0x299   : > { %v6097_v1 = vrot.slane %v1679_v3, 7  ;;  %v1577_v13 = vsel %vm1497_vm8, %v6025_v59, %v1576_v25  ;;  %v4337_v3 = vpack.c.bf16 %v2024_v57, %v2020_v23  ;;  %v4339_v55 = vpack.c.bf16 %v2023_v17, %v2019_v58  ;;  %v2056_v57 = vld [vmem:[#allocation12 + $0x668] sm:$0xff] }
 0x29a   : > { %v1488_v2 = vpop.permute.xlu0 %1487  ;;  %4336 = vmatpush1.bf16.msra.mxu1 %v4335_v11  ;;  %v4341_v25 = vpack.c.bf16 %v2032_v39, %v2028_v37  ;;  %v1653_v23 = vmax.f32 %v5977_v44, %v6077_v41  ;;  %v2060_v41 = vld [vmem:[#allocation12 + $0x688] sm:$0xff]  ;;  %v2067_v39 = vld [vmem:[#allocation12 + $0x6c0] sm:$0xff] }
 0x29b   : > { %v6101_v53 = vpop.permute.xlu1 %1675  ;;  %v1493_v7 = vmax.f32 %v5911_v36, %v1488_v2  ;;  %1686 = vrot.lane.b32.xlu0 %v6097_v1, %s5389_s20  ;;  %v1757_v36 = vrot.slane %v1753_v22, 7  ;;  %4338 = vmatprep.subr.bf16.mxu1 %v4337_v3  ;;  %v2031_v22 = vld [vmem:[#allocation12 + $0x5a0] sm:$0xff] }
 0x29c   : > { %1736 = vrot.lane.b32.xlu1 %v1733_v51, %s5383_s18  ;;  %v4343_v61 = vpack.c.bf16 %v2031_v22, %v2027_v49  ;;  %v1657_v17 = vrot.slane %v1653_v23, 7  ;;  %v2071_v49 = vld [vmem:[#allocation12 + $0x6e0] sm:$0xff] }
 0x29d   : > { %v1498_v29 = vrot.slane %v1493_v7, 7  ;;  %v1782_v7 = vrot.slane %v1778_v19, 7  ;;  %v2068_v19 = vld [vmem:[#allocation12 + $0x6c8] sm:$0xff] }
 0x29e   : > { %v1701_v33 = vpop.permute.xlu0 %1700  ;;  %4340 = vmatpush1.bf16.msra.mxu1 %v4339_v55  ;;  %v2064_v55 = vld [vmem:[#allocation12 + $0x6a8] sm:$0xff] }
 0x29f   : > { %1504 = vst.msk [vmem:[#allocation4] sm:$0xfe] %vm1503_vm9, %v1498_v29  ;;  %v1706_v42 = vmax.f32 %v5919_v21, %v1701_v33  ;;  %v1490_v12 = vpop.permute.xlu1 %1489  ;;  %v1603_v21 = vrot.slane %v1599_v8, 7  ;;  %4342 = vmatprep.subr.bf16.mxu1 %v4341_v25  ;;  %v2048_v33 = vld [vmem:[#allocation12 + $0x628] sm:$0xff]  ;;  %v1970_v25 = vld [vmem:[#allocation12 + $0x3b8] sm:$0xff] }
 0x2a0   : > { %v1494_v15 = vmax.f32 %v5997_v47, %v1490_v12  ;;  %1580 = vrot.lane.b32.xlu1 %v1577_v13, %s5385_s28  ;;  %v1758_v47 = vsel %vm1497_vm8, %v6032_v4, %v1757_v36  ;;  %v1626_v4 = vmax.f32 %v5965_v62, %v6056_v54  ;;  %v1803_v62 = vmax.f32 %v5971_v43, %v6066_v32  ;;  %v2044_v54 = vld [vmem:[#allocation12 + $0x608] sm:$0xff]  ;;  %v2043_v36 = vld [vmem:[#allocation12 + $0x600] sm:$0xff] }
 0x2a1   : > { %v1710_v18 = vrot.slane %v1706_v42, 7  ;;  %v1604_v51 = vsel %vm1497_vm8, %v6039_v30, %v1603_v21  ;;  %v1783_v30 = vsel %vm1497_vm8, %v6046_v26, %v1782_v7  ;;  %v4349_v8 = vpack.c.bf16 %v2048_v33, %v2044_v54  ;;  %v2047_v42 = vld [vmem:[#allocation12 + $0x620] sm:$0xff]  ;;  %v2052_v32 = vld [vmem:[#allocation12 + $0x648] sm:$0xff] }
 0x2a2   : > { %v1499_v16 = vrot.slane %v1494_v15, 7  ;;  %4344 = vmatpush1.bf16.msra.mxu1 %v4343_v61  ;;  %v1630_v11 = vrot.slane %v1626_v4, 7  ;;  %v4351_v12 = vpack.c.bf16 %v2047_v42, %v2043_v36  ;;  %v1807_v13 = vrot.slane %v1803_v62, 7  ;;  %v2051_v26 = vld [vmem:[#allocation12 + $0x640] sm:$0xff] }
 0x2a3   : > { %1715 = vst.msk [vmem:[#allocation4 + $0x8] sm:$0xfe] %vm1503_vm9, %v1710_v18  ;;  %v1703_v59 = vpop.permute.xlu1 %1702  ;;  %4346 = vmatprep.subr.bf16.mxu1 %v4345_v56  ;;  %v4353_v58 = vpack.c.bf16 %v2056_v57, %v2052_v32  ;;  %v2055_v15 = vld [vmem:[#allocation12 + $0x660] sm:$0xff]  ;;  %vm1694_vm9 = vcmask 1047424  }
 0x2a4   : > { %v1500_v27 = vsel %vm1497_vm8, %v1498_v29, %v1499_v16  ;;  %v1707_v2 = vmax.f32 %v6001_v48, %v1703_v59  ;;  %1761 = vrot.lane.b32.xlu1 %v1758_v47, %s5384_s25  ;;  %v2035_v48 = vld [vmem:[#allocation12 + $0x5c0] sm:$0xff]  ;;  %v1631_v43 = vsel %vm1497_vm8, %v6053_v6, %v1630_v11  ;;  %v4355_v3 = vpack.c.bf16 %v2055_v15, %v2051_v26  ;;  %v2072_v59 = vld [vmem:[#allocation12 + $0x6e8] sm:$0xff]  ;;  %v1969_v15 = vld [vmem:[#allocation12 + $0x3b0] sm:$0xff] }
 0x2a5   : > { %1506 = vst.msk [vmem:[#allocation4 + $0x10] sm:$0x7f] %vm1505_vm10, %v1500_v27  ;;  %v4347_v29 = vpack.c.bf16 %v2039_v63, %v2035_v48  ;;  %v1808_v44 = vsel %vm1497_vm8, %v6060_v10, %v1807_v13  ;;  %v2059_v6 = vld [vmem:[#allocation12 + $0x680] sm:$0xff]  ;;  %v4357_v16 = vpack.c.bf16 %v2064_v55, %v2060_v41  ;;  %v4361_v37 = vpack.c.bf16 %v2072_v59, %v2068_v19  ;;  %v1977_v19 = vld [vmem:[#allocation12 + $0x3f0] sm:$0xff] }
 0x2a6   : > { %v1711_v20 = vrot.slane %v1707_v2, 7  ;;  %v2063_v21 = vld [vmem:[#allocation12 + $0x6a0] sm:$0xff]  ;;  %v1658_v10 = vsel %vm1497_vm8, %v6073_v50, %v1657_v17  ;;  %v1966_v2 = vld [vmem:[#allocation12 + $0x398] sm:$0xff] }
 0x2a7   : > { %4348 = vmatpush1.bf16.msra.mxu1 %v4347_v29  ;;  %v4359_v47 = vpack.c.bf16 %v2063_v21, %v2059_v6  ;;  %v1974_v17 = vld [vmem:[#allocation12 + $0x3d8] sm:$0xff]  ;;  %v1973_v21 = vld [vmem:[#allocation12 + $0x3d0] sm:$0xff] }
 0x2a8   : > { %v1712_v52 = vsel %vm1497_vm8, %v1710_v18, %v1711_v20  ;;  %1607 = vrot.lane.b32.xlu1 %v1604_v51, %s5386_s2  ;;  %4350 = vmatprep.subr.bf16.mxu1 %v4349_v8  ;;  %v1828_v18 = vmax.f32 %v5983_v45, %v6089_v24  ;;  %v1680_v45 = vmax.f32 %v5989_v46, %v6101_v53 }
 0x2a9   : > { %1716 = vst.msk [vmem:[#allocation4 + $0x18] sm:$0x7f] %vm1505_vm10, %v1712_v52  ;;  %v4363_v24 = vpack.c.bf16 %v2071_v49, %v2067_v39  ;;  %v4365_v20 = vpack.c.bf16 %v1970_v25, %v1966_v2  ;;  %vm2079_vm10 = vcmask 1046528   ;;  %v4371_v39 = vpack.c.bf16 %v1977_v19, %v1973_v21  ;;  %v2045_v19 = vld [vmem:[#allocation12 + $0x610] sm:$0xff] }
 0x2aa   : > { %v1832_v27 = vrot.slane %v1828_v18, 7  ;;  %v1684_v22 = vrot.slane %v1680_v45, 7  ;;  %v1978_v18 = vld [vmem:[#allocation12 + $0x3f8] sm:$0xff]  ;;  %v1985_v45 = vld [vmem:[#allocation12 + $0x430] sm:$0xff] }
 0x2ab   : > { %4352 = vmatpush1.bf16.msra.mxu1 %v4351_v12 }
 0x2ac   : > { %1786 = vrot.lane.b32.xlu1 %v1783_v30, %s5385_s28  ;;  %4354 = vmatprep.subr.bf16.mxu1 %v4353_v58  ;;  %v1833_v61 = vsel %vm1497_vm8, %v6085_v14, %v1832_v27  ;;  %v1685_v46 = vsel %vm1497_vm8, %v6097_v1, %v1684_v22  ;;  %vm1667_vm8 = vcmask 916224   ;;  %v1965_v58 = vld [vmem:[#allocation12 + $0x390] sm:$0xff]  ;;  %s7046_s28 = scalar_lea.hbm %s7097_s9, %s4229_s26 }
 0x2ad   : > { %v4367_v6 = vpack.c.bf16 %v1969_v15, %v1965_v58  ;;  %v1981_v27 = vld [vmem:[#allocation12 + $0x410] sm:$0xff]  ;;  %v2038_v58 = vld [vmem:[#allocation12 + $0x5d8] sm:$0xff] }
 0x2ae   : > { %v4375_v2 = vpack.c.bf16 %v1985_v45, %v1981_v27  ;;  %v1989_v22 = vld [vmem:[#allocation12 + $0x450] sm:$0xff]  ;;  %v2042_v15 = vld [vmem:[#allocation12 + $0x5f8] sm:$0xff] }
 0x2af   : > { %4356 = vmatpush1.bf16.msra.mxu1 %v4355_v3  ;;  %v2053_v45 = vld [vmem:[#allocation12 + $0x650] sm:$0xff] }
 0x2b0   : > { %1634 = vrot.lane.b32.xlu1 %v1631_v43, %s5387_s4  ;;  %4358 = vmatprep.subr.bf16.mxu1 %v4357_v16  ;;  %v4369_v16 = vpack.c.bf16 %v1978_v18, %v1974_v17  ;;  %v4401_v17 = vpack.c.bf16 %v2042_v15, %v2038_v58  ;;  %v2037_v18 = vld [vmem:[#allocation12 + $0x5d0] sm:$0xff]  ;;  %v1879_v58 = vld [vmem:[#allocation12 + $0x108] sm:$0xff] }
 0x2b1   : > { %v1883_v15 = vld [vmem:[#allocation12 + $0x128] sm:$0xff] }
 0x2b3   : > { %4360 = vmatpush1.bf16.msra.mxu1 %v4359_v47  ;;  %v1982_v47 = vld [vmem:[#allocation12 + $0x418] sm:$0xff] }
 0x2b4   : > { %1811 = vrot.lane.b32.xlu1 %v1808_v44, %s5386_s2  ;;  %4362 = vmatprep.subr.bf16.mxu1 %v4361_v37  ;;  %v1986_v37 = vld [vmem:[#allocation12 + $0x438] sm:$0xff] }
 0x2b5   : > { %v4373_v49 = vpack.c.bf16 %v1986_v37, %v1982_v47  ;;  %v2049_v47 = vld [vmem:[#allocation12 + $0x630] sm:$0xff]  ;;  %v2054_v37 = vld [vmem:[#allocation12 + $0x658] sm:$0xff] }
 0x2b7   : > { %4364 = vmatpush1.bf16.msra.mxu1 %v4363_v24  ;;  %v1994_v24 = vld [vmem:[#allocation12 + $0x478] sm:$0xff] }
 0x2b8   : > { %1661 = vrot.lane.b32.xlu1 %v1658_v10, %s5388_s30  ;;  %4366 = vmatprep.subr.bf16.mxu1 %v4365_v20  ;;  %v1990_v10 = vld [vmem:[#allocation12 + $0x458] sm:$0xff] }
 0x2b9   : > { %v4377_v25 = vpack.c.bf16 %v1994_v24, %v1990_v10  ;;  %v1998_v20 = vld [vmem:[#allocation12 + $0x498] sm:$0xff]  ;;  %v2057_v10 = vld [vmem:[#allocation12 + $0x670] sm:$0xff] }
 0x2ba   : > { %v2062_v24 = vld [vmem:[#allocation12 + $0x698] sm:$0xff] }
 0x2bc   : > { %1836 = vrot.lane.b32.xlu1 %v1833_v61, %s5387_s4  ;;  %v1993_v61 = vld [vmem:[#allocation12 + $0x470] sm:$0xff] }
 0x2c0   : > { %1688 = vrot.lane.b32.xlu1 %v1685_v46, %s5389_s20  ;;  %v2002_v46 = vld [vmem:[#allocation12 + $0x4b8] sm:$0xff] }
 0x2e1   : > { %v1525_v50 = vpop.permute.xlu0 %1524 }
 0x2e2   : > { %1531 = vst.msk [vmem:[#allocation4] sm:$0xfe] %vm1530_vm11, %v1525_v50  ;;  %v4379_v50 = vpack.c.bf16 %v1993_v61, %v1989_v22  ;;  %v2061_v61 = vld [vmem:[#allocation12 + $0x690] sm:$0xff] }
 0x2e5   : > { %v1552_v53 = vpop.permute.xlu0 %1551 }
 0x2e6   : > { %1558 = vst.msk [vmem:[#allocation4] sm:$0xfe] %vm1557_vm12, %v1552_v53  ;;  %v4381_v53 = vpack.c.bf16 %v2002_v46, %v1998_v20  ;;  %v2065_v20 = vld [vmem:[#allocation12 + $0x6b0] sm:$0xff]  ;;  %v2070_v46 = vld [vmem:[#allocation12 + $0x6d8] sm:$0xff] }
 0x2e9   : > { %v1735_v7 = vpop.permute.xlu0 %1734 }
 0x2ea   : > { %1740 = vst.msk [vmem:[#allocation4 + $0x8] sm:$0xfe] %vm1530_vm11, %v1735_v7  ;;  %vm2088_vm11 = vcmask 785408   ;;  %v1997_v7 = vld [vmem:[#allocation12 + $0x490] sm:$0xff] }
 0x2ed   : > { %v1579_v14 = vpop.permute.xlu0 %1578 }
 0x2ee   : > { %1585 = vst.msk [vmem:[#allocation4] sm:$0xfe] %vm1584_vm13, %v1579_v14  ;;  %v2001_v14 = vld [vmem:[#allocation12 + $0x4b0] sm:$0xff] }
 0x2f1   : > { %v1760_v4 = vpop.permute.xlu0 %1759 }
 0x2f2   : > { %1765 = vst.msk [vmem:[#allocation4 + $0x8] sm:$0xfe] %vm1557_vm12, %v1760_v4  ;;  %v2006_v4 = vld [vmem:[#allocation12 + $0x4d8] sm:$0xff]  ;;  %vm2528_vm12 = vcmask 1045504  }
 0x2f5   : > { %v1606_v51 = vpop.permute.xlu0 %1605 }
 0x2f6   : > { %1612 = vst.msk [vmem:[#allocation4] sm:$0xfe] %vm1611_vm14, %v1606_v51  ;;  %v2010_v51 = vld [vmem:[#allocation12 + $0x4f8] sm:$0xff] }
 0x2f9   : > { %v1785_v35 = vpop.permute.xlu0 %1784 }
 0x2fa   : > { %1790 = vst.msk [vmem:[#allocation4 + $0x8] sm:$0xfe] %vm1584_vm13, %v1785_v35  ;;  %v4383_v35 = vpack.c.bf16 %v2001_v14, %v1997_v7  ;;  %v2069_v14 = vld [vmem:[#allocation12 + $0x6d0] sm:$0xff]  ;;  %vm2925_vm13 = vcmask 522496  }
 0x2fd   : > { %v1633_v1 = vpop.permute.xlu0 %1632 }
 0x2fe   : > { %1639 = vst.msk [vmem:[#allocation4] sm:$0xfe] %vm1638_vm15, %v1633_v1  ;;  %v4385_v1 = vpack.c.bf16 %v2010_v51, %v2006_v4  ;;  %v2073_v4 = vld [vmem:[#allocation12 + $0x6f0] sm:$0xff]  ;;  %v1847_v51 = vld [vmem:[#allocation12 + $0x8] sm:$0xff] }
 0x301   : > { %v1810_v5 = vpop.permute.xlu0 %1809 }
 0x302   : > { %1815 = vst.msk [vmem:[#allocation4 + $0x8] sm:$0xfe] %vm1611_vm14, %v1810_v5  ;;  %v2005_v5 = vld [vmem:[#allocation12 + $0x4d0] sm:$0xff]  ;;  %vm2937_vm14 = vcmask 784896  }
 0x305   : > { %v1660_v48 = vpop.permute.xlu0 %1659 }
 0x306   : > { %1666 = vst.msk [vmem:[#allocation4] sm:$0xfe] %vm1665_vm0, %v1660_v48  ;;  %v1527_v52 = vpop.permute.xlu1 %1526  ;;  %v2009_v48 = vld [vmem:[#allocation12 + $0x4f0] sm:$0xff]  ;;  %vm5391_vm0 = vmmov 0  }
 0x307   : > { %1533 = vst.msk [vmem:[#allocation4 + $0x10] sm:$0x7f] %vm1532_vm1, %v1527_v52  ;;  %v2014_v52 = vld [vmem:[#allocation12 + $0x518] sm:$0xff] }
 0x309   : > { %v1835_v56 = vpop.permute.xlu0 %1834 }
 0x30a   : > { %1840 = vst.msk [vmem:[#allocation4 + $0x8] sm:$0xfe] %vm1638_vm15, %v1835_v56  ;;  %v1554_v63 = vpop.permute.xlu1 %1553  ;;  %v2018_v56 = vld [vmem:[#allocation12 + $0x538] sm:$0xff]  ;;  %vm2949_vm15 = vcmask 1047296  }
 0x30b   : > { %1560 = vst.msk [vmem:[#allocation4 + $0x10] sm:$0x7f] %vm1559_vm2, %v1554_v63  ;;  %v4387_v63 = vpack.c.bf16 %v2009_v48, %v2005_v5  ;;  %v1846_v48 = vld [vmem:[#allocation12] sm:$0xff] }
 0x30d   : > { %v1687_v29 = vpop.permute.xlu0 %1686 }
 0x30e   : > { %1693 = vst.msk [vmem:[#allocation4] sm:$0xfe] %vm1692_vm3, %v1687_v29  ;;  %v1737_v11 = vpop.permute.xlu1 %1736  ;;  %v4389_v29 = vpack.c.bf16 %v2018_v56, %v2014_v52  ;;  %v1850_v52 = vld [vmem:[#allocation12 + $0x20] sm:$0xff]  ;;  %v1855_v56 = vld [vmem:[#allocation12 + $0x48] sm:$0xff] }
 0x30f   : > { %1741 = vst.msk [vmem:[#allocation4 + $0x18] sm:$0x7f] %vm1532_vm1, %v1737_v11  ;;  %v2013_v11 = vld [vmem:[#allocation12 + $0x510] sm:$0xff]  ;;  %vm3783_vm1 = vcmask 261120  }
 0x311   : > { %v1959_v23 = vld [vmem:[#allocation4 + $0x8] sm:$0xfe] }
 0x312   : > { %v1581_v62 = vpop.permute.xlu1 %1580  ;;  %v2083_v32 = vrot.slane %v1959_v23, 1 }
 0x313   : > { %1587 = vst.msk [vmem:[#allocation4 + $0x10] sm:$0x7f] %vm1586_vm4, %v1581_v62  ;;  %v2017_v62 = vld [vmem:[#allocation12 + $0x530] sm:$0xff] }
 0x315   : > { %v1958_v26 = vld [vmem:[#allocation4] sm:$0xfe] }
 0x316   : > { %v1762_v30 = vpop.permute.xlu1 %1761  ;;  %v2080_v41 = vrot.slane %v1958_v26, 1  ;;  %v2033_v26 = vld [vmem:[#allocation12 + $0x5b0] sm:$0xff] }
 0x317   : > { %1766 = vst.msk [vmem:[#allocation4 + $0x18] sm:$0x7f] %vm1559_vm2, %v1762_v30  ;;  %v2022_v30 = vld [vmem:[#allocation12 + $0x558] sm:$0xff]  ;;  %vm3857_vm2 = vcmask 73728  }
 0x31a   : > { %v1608_v54 = vpop.permute.xlu1 %1607 }
 0x31b   : > { %1614 = vst.msk [vmem:[#allocation4 + $0x10] sm:$0x7f] %vm1613_vm5, %v1608_v54  ;;  %v2026_v54 = vld [vmem:[#allocation12 + $0x578] sm:$0xff] }
 0x31e   : > { %v1787_v33 = vpop.permute.xlu1 %1786 }
 0x31f   : > { %1791 = vst.msk [vmem:[#allocation4 + $0x18] sm:$0x7f] %vm1586_vm4, %v1787_v33  ;;  %v4391_v33 = vpack.c.bf16 %v2017_v62, %v2013_v11  ;;  %v1854_v62 = vld [vmem:[#allocation12 + $0x40] sm:$0xff] }
 0x322   : > { %v1635_v36 = vpop.permute.xlu1 %1634 }
 0x323   : > { %1641 = vst.msk [vmem:[#allocation4 + $0x10] sm:$0x7f] %vm1640_vm7, %v1635_v36  ;;  %v4393_v36 = vpack.c.bf16 %v2026_v54, %v2022_v30  ;;  %v1858_v30 = vld [vmem:[#allocation12 + $0x60] sm:$0xff]  ;;  %v1863_v54 = vld [vmem:[#allocation12 + $0x88] sm:$0xff] }
 0x326   : > { %v1812_v8 = vpop.permute.xlu1 %1811 }
 0x327   : > { %1816 = vst.msk [vmem:[#allocation4 + $0x18] sm:$0x7f] %vm1613_vm5, %v1812_v8  ;;  %v2021_v8 = vld [vmem:[#allocation12 + $0x550] sm:$0xff] }
 0x32a   : > { %v1662_v42 = vpop.permute.xlu1 %1661 }
 0x32b   : > { %1668 = vst.msk [vmem:[#allocation4 + $0x10] sm:$0x7f] %vm1667_vm8, %v1662_v42  ;;  %v2025_v42 = vld [vmem:[#allocation12 + $0x570] sm:$0xff] }
 0x32c   : > { %v4395_v23 = vpack.c.bf16 %v2025_v42, %v2021_v8  ;;  %v1862_v42 = vld [vmem:[#allocation12 + $0x80] sm:$0xff] }
 0x32e   : > { %v1837_v12 = vpop.permute.xlu1 %1836 }
 0x32f   : > { %1841 = vst.msk [vmem:[#allocation4 + $0x18] sm:$0x7f] %vm1640_vm7, %v1837_v12  ;;  %v2030_v12 = vld [vmem:[#allocation12 + $0x598] sm:$0xff] }
 0x332   : > { %v1689_v13 = vpop.permute.xlu1 %1688 }
 0x333   : > { %1695 = vst.msk [vmem:[#allocation4 + $0x10] sm:$0x7f] %vm1694_vm9, %v1689_v13  ;;  %v2034_v13 = vld [vmem:[#allocation12 + $0x5b8] sm:$0xff] }
 0x336   : > { %v1961_v43 = vld [vmem:[#allocation4 + $0x18] sm:$0x7f] }
 0x337   : > { %v6159_v57 = vrot.slane %v1961_v43, 1  ;;  %v4397_v43 = vpack.c.bf16 %v2034_v13, %v2030_v12  ;;  %v1866_v12 = vld [vmem:[#allocation12 + $0xa0] sm:$0xff]  ;;  %v1871_v13 = vld [vmem:[#allocation12 + $0xc8] sm:$0xff] }
 0x339   : > { %v2085_v3 = vsel %vm2079_vm10, %v2083_v32, %v6159_v57  ;;  %v2029_v32 = vld [vmem:[#allocation12 + $0x590] sm:$0xff] }
 0x33a   : > { %4041 = vmatprep.mubr.msk.f32.mxu1 %vm2088_vm11, %v2085_v3  ;;  %v1960_v44 = vld [vmem:[#allocation4 + $0x10] sm:$0x7f] }
 0x33b   : > { %v6164_v55 = vrot.slane %v1960_v44, 1  ;;  %v2041_v44 = vld [vmem:[#allocation12 + $0x5f0] sm:$0xff] }
 0x33d   : > { %v6168_v59 = vsel %vm2079_vm10, %v2080_v41, %v6164_v55  ;;  %v2046_v41 = vld [vmem:[#allocation12 + $0x618] sm:$0xff] }
 0x33e   : > { %2158 = vmatmul.mubr.f32.vlgmr.msra.gmra.mrb[16].mxu1 %v6168_v59 }
 0x33f   : > { %4368 = vmatpush1.bf16.msra.mxu1 %v4367_v6  ;;  %4042 = vmatprep.mubr.msk.f32.mxu1 %vm2088_vm11, %v6159_v57  ;;  %v2050_v6 = vld [vmem:[#allocation12 + $0x638] sm:$0xff] }
 0x340   : > { %4370 = vmatprep.subr.bf16.mxu1 %v4369_v16  ;;  %v4403_v16 = vpack.c.bf16 %v2041_v44, %v2037_v18  ;;  %v4405_v21 = vpack.c.bf16 %v2050_v6, %v2046_v41  ;;  %v1878_v18 = vld [vmem:[#allocation12 + $0x100] sm:$0xff]  ;;  %v1891_v41 = vld [vmem:[#allocation12 + $0x168] sm:$0xff] }
 0x341   : > { %v1882_v44 = vld [vmem:[#allocation12 + $0x120] sm:$0xff] }
 0x342   : > { %2164 = vmatmul.mubr.f32.gmra.mrb[18].mxu1 %v6164_v55  ;;  %v4439_v6 = vpack.c.bf16 %v1882_v44, %v1878_v18  ;;  %v1954_v18 = vld [vmem:[#allocation12 + $0x360] sm:$0xff]  ;;  %v1849_v44 = vld [vmem:[#allocation12 + $0x18] sm:$0xff] }
 0x343   : > { %4372 = vmatpush1.bf16.msra.mxu1 %v4371_v39  ;;  %4043 = vmatprep.mubr.msk.f32.mxu1 %vm2088_vm11, %v2085_v3  ;;  %v4399_v3 = vpack.c.bf16 %v2033_v26, %v2029_v32  ;;  %v2058_v39 = vld [vmem:[#allocation12 + $0x678] sm:$0xff]  ;;  %v1874_v26 = vld [vmem:[#allocation12 + $0xe0] sm:$0xff] }
 0x344   : > { %4374 = vmatprep.subr.bf16.mxu1 %v4373_v49  ;;  %v4407_v49 = vpack.c.bf16 %v2049_v47, %v2045_v19  ;;  %v4409_v27 = vpack.c.bf16 %v2058_v39, %v2054_v37  ;;  %v1890_v19 = vld [vmem:[#allocation12 + $0x160] sm:$0xff]  ;;  %v1895_v47 = vld [vmem:[#allocation12 + $0x188] sm:$0xff] }
 0x345   : > { %v1899_v37 = vld [vmem:[#allocation12 + $0x1a8] sm:$0xff] }
 0x347   : > { %4376 = vmatpush1.bf16.msra.mxu1 %v4375_v2  ;;  %v2066_v2 = vld [vmem:[#allocation12 + $0x6b8] sm:$0xff] }
 0x348   : > { %4378 = vmatprep.subr.bf16.mxu1 %v4377_v25  ;;  %v4411_v25 = vpack.c.bf16 %v2057_v10, %v2053_v45  ;;  %v4413_v22 = vpack.c.bf16 %v2066_v2, %v2062_v24  ;;  %v1898_v45 = vld [vmem:[#allocation12 + $0x1a0] sm:$0xff]  ;;  %v1903_v10 = vld [vmem:[#allocation12 + $0x1c8] sm:$0xff] }
 0x349   : > { %v1907_v24 = vld [vmem:[#allocation12 + $0x1e8] sm:$0xff] }
 0x34b   : > { %4380 = vmatpush1.bf16.msra.mxu1 %v4379_v50  ;;  %v2074_v50 = vld [vmem:[#allocation12 + $0x6f8] sm:$0xff] }
 0x34c   : > { %4382 = vmatprep.subr.bf16.mxu1 %v4381_v53  ;;  %v4415_v53 = vpack.c.bf16 %v2065_v20, %v2061_v61  ;;  %v4417_v7 = vpack.c.bf16 %v2074_v50, %v2070_v46  ;;  %v1906_v61 = vld [vmem:[#allocation12 + $0x1e0] sm:$0xff]  ;;  %v1911_v20 = vld [vmem:[#allocation12 + $0x208] sm:$0xff] }
 0x34d   : > { %v1915_v46 = vld [vmem:[#allocation12 + $0x228] sm:$0xff] }
 0x34f   : > { %4384 = vmatpush1.bf16.msra.mxu1 %v4383_v35  ;;  %v1851_v35 = vld [vmem:[#allocation12 + $0x28] sm:$0xff] }
 0x350   : > { %4386 = vmatprep.subr.bf16.mxu1 %v4385_v1  ;;  %v4419_v1 = vpack.c.bf16 %v2073_v4, %v2069_v14  ;;  %v4421_v5 = vpack.c.bf16 %v1851_v35, %v1847_v51  ;;  %v1914_v14 = vld [vmem:[#allocation12 + $0x220] sm:$0xff]  ;;  %v1919_v4 = vld [vmem:[#allocation12 + $0x248] sm:$0xff] }
 0x351   : > { %v1923_v51 = vld [vmem:[#allocation12 + $0x268] sm:$0xff] }
 0x353   : > { %4388 = vmatpush1.bf16.msra.mxu1 %v4387_v63  ;;  %v1859_v63 = vld [vmem:[#allocation12 + $0x68] sm:$0xff] }
 0x354   : > { %4390 = vmatprep.subr.bf16.mxu1 %v4389_v29  ;;  %v4423_v29 = vpack.c.bf16 %v1850_v52, %v1846_v48  ;;  %v4425_v11 = vpack.c.bf16 %v1859_v63, %v1855_v56  ;;  %v1922_v48 = vld [vmem:[#allocation12 + $0x260] sm:$0xff]  ;;  %v1927_v52 = vld [vmem:[#allocation12 + $0x288] sm:$0xff] }
 0x355   : > { %v1931_v56 = vld [vmem:[#allocation12 + $0x2a8] sm:$0xff] }
 0x357   : > { %4392 = vmatpush1.bf16.msra.mxu1 %v4391_v33  ;;  %v1867_v33 = vld [vmem:[#allocation12 + $0xa8] sm:$0xff] }
 0x358   : > { %4394 = vmatprep.subr.bf16.mxu1 %v4393_v36  ;;  %v4427_v36 = vpack.c.bf16 %v1858_v30, %v1854_v62  ;;  %v4429_v8 = vpack.c.bf16 %v1867_v33, %v1863_v54  ;;  %v1930_v62 = vld [vmem:[#allocation12 + $0x2a0] sm:$0xff]  ;;  %v1935_v30 = vld [vmem:[#allocation12 + $0x2c8] sm:$0xff] }
 0x359   : > { %v1939_v54 = vld [vmem:[#allocation12 + $0x2e8] sm:$0xff] }
 0x35b   : > { %4396 = vmatpush1.bf16.msra.mxu1 %v4395_v23  ;;  %v1875_v23 = vld [vmem:[#allocation12 + $0xe8] sm:$0xff] }
 0x35c   : > { %4398 = vmatprep.subr.bf16.mxu1 %v4397_v43  ;;  %v6179_v43 = vld [vmem:[#allocation4 + $0x8] sm:$0xff]  ;;  %v4433_v32 = vpack.c.bf16 %v1875_v23, %v1871_v13  ;;  %v1947_v13 = vld [vmem:[#allocation12 + $0x328] sm:$0xff] }
 0x35f   : > { %4400 = vmatpush1.bf16.msra.mxu1 %v4399_v3 }
 0x360   : > { %4402 = vmatprep.subr.bf16.mxu1 %v4401_v17  ;;  %v4437_v17 = vpack.c.bf16 %v1883_v15, %v1879_v58  ;;  %v1955_v58 = vld [vmem:[#allocation12 + $0x368] sm:$0xff] }
 0x363   : > { %4404 = vmatpush1.bf16.msra.mxu1 %v4403_v16 }
 0x364   : > { %4406 = vmatprep.subr.bf16.mxu1 %v4405_v21  ;;  %v1886_v21 = vld [vmem:[#allocation12 + $0x140] sm:$0xff] }
 0x365   : > { %v4443_v39 = vpack.c.bf16 %v1890_v19, %v1886_v21  ;;  %v1852_v21 = vld [vmem:[#allocation12 + $0x30] sm:$0xff]  ;;  %v1857_v19 = vld [vmem:[#allocation12 + $0x58] sm:$0xff] }
 0x367   : > { %4408 = vmatpush1.bf16.msra.mxu1 %v4407_v49  ;;  %v4445_v49 = vpack.c.bf16 %v1899_v37, %v1895_v47  ;;  %v1861_v47 = vld [vmem:[#allocation12 + $0x78] sm:$0xff] }
 0x368   : > { %4410 = vmatprep.subr.bf16.mxu1 %v4409_v27  ;;  %v1894_v27 = vld [vmem:[#allocation12 + $0x180] sm:$0xff] }
 0x369   : > { %v4447_v2 = vpack.c.bf16 %v1898_v45, %v1894_v27  ;;  %v1860_v27 = vld [vmem:[#allocation12 + $0x70] sm:$0xff] }
 0x36a   : > { %v6183_v45 = vld [vmem:[#allocation4] sm:$0xff] }
 0x36b   : > { %4412 = vmatpush1.bf16.msra.mxu1 %v4411_v25  ;;  %v4449_v25 = vpack.c.bf16 %v1907_v24, %v1903_v10  ;;  %v1865_v10 = vld [vmem:[#allocation12 + $0x98] sm:$0xff] }
 0x36c   : > { %4414 = vmatprep.subr.bf16.mxu1 %v4413_v22  ;;  %v1902_v22 = vld [vmem:[#allocation12 + $0x1c0] sm:$0xff]  ;;  %v1869_v24 = vld [vmem:[#allocation12 + $0xb8] sm:$0xff] }
 0x36d   : > { %v4451_v50 = vpack.c.bf16 %v1906_v61, %v1902_v22  ;;  %v4485_v22 = vpack.c.bf16 %v1869_v24, %v1865_v10  ;;  %v1864_v61 = vld [vmem:[#allocation12 + $0x90] sm:$0xff]  ;;  %v1937_v24 = vld [vmem:[#allocation12 + $0x2d8] sm:$0xff] }
 0x36e   : > { %v1932_v10 = vld [vmem:[#allocation12 + $0x2b0] sm:$0xff] }
 0x36f   : > { %4416 = vmatpush1.bf16.msra.mxu1 %v4415_v53  ;;  %v4453_v53 = vpack.c.bf16 %v1915_v46, %v1911_v20  ;;  %v1868_v20 = vld [vmem:[#allocation12 + $0xb0] sm:$0xff]  ;;  %v6190_v46 = vld [vmem:[#allocation4 + $0x10] sm:$0x3f] }
 0x370   : > { %4418 = vmatprep.subr.bf16.mxu1 %v4417_v7  ;;  %v1910_v7 = vld [vmem:[#allocation12 + $0x200] sm:$0xff] }
 0x371   : > { %v4455_v35 = vpack.c.bf16 %v1914_v14, %v1910_v7  ;;  %v4487_v7 = vpack.c.bf16 %v1868_v20, %v1864_v61  ;;  %v1936_v20 = vld [vmem:[#allocation12 + $0x2d0] sm:$0xff] }
 0x373   : > { %4420 = vmatpush1.bf16.msra.mxu1 %v4419_v1  ;;  %v4457_v1 = vpack.c.bf16 %v1923_v51, %v1919_v4  ;;  %v1872_v4 = vld [vmem:[#allocation12 + $0xd0] sm:$0xff] }
 0x374   : > { %4422 = vmatprep.subr.bf16.mxu1 %v4421_v5  ;;  %v1918_v5 = vld [vmem:[#allocation12 + $0x240] sm:$0xff]  ;;  %v1876_v51 = vld [vmem:[#allocation12 + $0xf0] sm:$0xff] }
 0x375   : > { %v4459_v63 = vpack.c.bf16 %v1922_v48, %v1918_v5  ;;  %v4491_v5 = vpack.c.bf16 %v1876_v51, %v1872_v4  ;;  %v1944_v51 = vld [vmem:[#allocation12 + $0x310] sm:$0xff] }
 0x376   : > { %2235 = vmatmul.mubr.f32.vlgmr.msra.gmra.mrb[20].mxu1 %v6168_v59  ;;  %v4431_v59 = vpack.c.bf16 %v1866_v12, %v1862_v42  ;;  %v1938_v42 = vld [vmem:[#allocation12 + $0x2e0] sm:$0xff]  ;;  %v1943_v12 = vld [vmem:[#allocation12 + $0x308] sm:$0xff] }
 0x377   : > { %4044 = vmatprep.mubr.msk.f32.mxu1 %vm2088_vm11, %v6159_v57  ;;  %4424 = vmatpush1.bf16.msra.mxu1 %v4423_v29  ;;  %v1870_v57 = vld [vmem:[#allocation12 + $0xc0] sm:$0xff]  ;;  %v4461_v29 = vpack.c.bf16 %v1931_v56, %v1927_v52  ;;  %v1880_v52 = vld [vmem:[#allocation12 + $0x110] sm:$0xff] }
 0x378   : > { %4426 = vmatprep.subr.bf16.mxu1 %v4425_v11  ;;  %v4435_v3 = vpack.c.bf16 %v1874_v26, %v1870_v57  ;;  %v1926_v11 = vld [vmem:[#allocation12 + $0x280] sm:$0xff]  ;;  %v1951_v26 = vld [vmem:[#allocation12 + $0x348] sm:$0xff]  ;;  %v1884_v56 = vld [vmem:[#allocation12 + $0x130] sm:$0xff] }
 0x379   : > { %v4463_v33 = vpack.c.bf16 %v1930_v62, %v1926_v11  ;;  %v1946_v57 = vld [vmem:[#allocation12 + $0x320] sm:$0xff]  ;;  %v4495_v11 = vpack.c.bf16 %v1884_v56, %v1880_v52  ;;  %v1952_v56 = vld [vmem:[#allocation12 + $0x350] sm:$0xff] }
 0x37a   : > { %2241 = vmatmul.mubr.f32.gmra.mrb[22].mxu1 %v6164_v55  ;;  %v1887_v55 = vld [vmem:[#allocation12 + $0x148] sm:$0xff] }
 0x37b   : > { %4428 = vmatpush1.bf16.msra.mxu1 %v4427_v36  ;;  %4045 = vmatprep.mubr.msk.f32.mxu1 %vm2088_vm11, %v6179_v43  ;;  %v4441_v16 = vpack.c.bf16 %v1891_v41, %v1887_v55  ;;  %v4465_v36 = vpack.c.bf16 %v1939_v54, %v1935_v30  ;;  %v1853_v55 = vld [vmem:[#allocation12 + $0x38] sm:$0xff]  ;;  %v1892_v30 = vld [vmem:[#allocation12 + $0x170] sm:$0xff] }
 0x37c   : > { %4430 = vmatprep.subr.bf16.mxu1 %v4429_v8  ;;  %v1934_v8 = vld [vmem:[#allocation12 + $0x2c0] sm:$0xff]  ;;  %v1897_v54 = vld [vmem:[#allocation12 + $0x198] sm:$0xff] }
 0x37d   : > { %v4467_v23 = vpack.c.bf16 %v1938_v42, %v1934_v8  ;;  %v1896_v42 = vld [vmem:[#allocation12 + $0x190] sm:$0xff] }
 0x37f   : > { %4432 = vmatpush1.bf16.msra.mxu1 %v4431_v59  ;;  %v4469_v59 = vpack.c.bf16 %v1947_v13, %v1943_v12  ;;  %v1900_v12 = vld [vmem:[#allocation12 + $0x1b0] sm:$0xff]  ;;  %v1905_v13 = vld [vmem:[#allocation12 + $0x1d8] sm:$0xff] }
 0x380   : > { %4434 = vmatprep.subr.bf16.mxu1 %v4433_v32  ;;  %v1942_v32 = vld [vmem:[#allocation12 + $0x300] sm:$0xff] }
 0x381   : > { %v4471_v15 = vpack.c.bf16 %v1946_v57, %v1942_v32  ;;  %v1904_v57 = vld [vmem:[#allocation12 + $0x1d0] sm:$0xff] }
 0x383   : > { %4436 = vmatpush1.bf16.msra.mxu1 %v4435_v3  ;;  %v4473_v3 = vpack.c.bf16 %v1955_v58, %v1951_v26  ;;  %v1908_v26 = vld [vmem:[#allocation12 + $0x1f0] sm:$0xff]  ;;  %v1913_v58 = vld [vmem:[#allocation12 + $0x218] sm:$0xff] }
 0x384   : > { %4438 = vmatprep.subr.bf16.mxu1 %v4437_v17  ;;  %v1950_v17 = vld [vmem:[#allocation12 + $0x340] sm:$0xff] }
 0x385   : > { %v4475_v41 = vpack.c.bf16 %v1954_v18, %v1950_v17  ;;  %v1912_v18 = vld [vmem:[#allocation12 + $0x210] sm:$0xff] }
 0x387   : > { %4440 = vmatpush1.bf16.msra.mxu1 %v4439_v6  ;;  %v4477_v6 = vpack.c.bf16 %v1853_v55, %v1849_v44  ;;  %v1916_v44 = vld [vmem:[#allocation12 + $0x230] sm:$0xff]  ;;  %v1921_v55 = vld [vmem:[#allocation12 + $0x258] sm:$0xff] }
 0x388   : > { %4442 = vmatprep.subr.bf16.mxu1 %v4441_v16  ;;  %v1848_v16 = vld [vmem:[#allocation12 + $0x10] sm:$0xff] }
 0x389   : > { %v4479_v37 = vpack.c.bf16 %v1852_v21, %v1848_v16  ;;  %v1920_v21 = vld [vmem:[#allocation12 + $0x250] sm:$0xff] }
 0x38b   : > { %4444 = vmatpush1.bf16.msra.mxu1 %v4443_v39  ;;  %v4481_v39 = vpack.c.bf16 %v1861_v47, %v1857_v19  ;;  %v1924_v19 = vld [vmem:[#allocation12 + $0x270] sm:$0xff]  ;;  %v1929_v47 = vld [vmem:[#allocation12 + $0x298] sm:$0xff] }
 0x38c   : > { %4446 = vmatprep.subr.bf16.mxu1 %v4445_v49  ;;  %v1856_v49 = vld [vmem:[#allocation12 + $0x50] sm:$0xff] }
 0x38f   : > { %4448 = vmatpush1.bf16.msra.mxu1 %v4447_v2  ;;  %v6186_v2 = vld [vmem:[#allocation4 + $0x18] sm:$0x3f] }
 0x390   : > { %4450 = vmatprep.subr.bf16.mxu1 %v4449_v25  ;;  %v4483_v25 = vpack.c.bf16 %v1860_v27, %v1856_v49  ;;  %v1928_v27 = vld [vmem:[#allocation12 + $0x290] sm:$0xff] }
 0x393   : > { %4452 = vmatpush1.bf16.msra.mxu1 %v4451_v50  ;;  %v1873_v50 = vld [vmem:[#allocation12 + $0xd8] sm:$0xff] }
 0x394   : > { %4454 = vmatprep.subr.bf16.mxu1 %v4453_v53  ;;  %v1877_v53 = vld [vmem:[#allocation12 + $0xf8] sm:$0xff] }
 0x395   : > { %v4489_v14 = vpack.c.bf16 %v1877_v53, %v1873_v50  ;;  %v1940_v50 = vld [vmem:[#allocation12 + $0x2f0] sm:$0xff]  ;;  %v1945_v53 = vld [vmem:[#allocation12 + $0x318] sm:$0xff] }
 0x397   : > { %4456 = vmatpush1.bf16.msra.mxu1 %v4455_v35  ;;  %v1881_v35 = vld [vmem:[#allocation12 + $0x118] sm:$0xff] }
 0x398   : > { %4458 = vmatprep.subr.bf16.mxu1 %v4457_v1  ;;  %v1885_v1 = vld [vmem:[#allocation12 + $0x138] sm:$0xff] }
 0x399   : > { %v4493_v48 = vpack.c.bf16 %v1885_v1, %v1881_v35  ;;  %v1948_v35 = vld [vmem:[#allocation12 + $0x330] sm:$0xff]  ;;  %v1953_v1 = vld [vmem:[#allocation12 + $0x358] sm:$0xff] }
 0x39b   : > { %4460 = vmatpush1.bf16.msra.mxu1 %v4459_v63  ;;  %v1889_v63 = vld [vmem:[#allocation12 + $0x158] sm:$0xff] }
 0x39c   : > { %4462 = vmatprep.subr.bf16.mxu1 %v4461_v29  ;;  %v1893_v29 = vld [vmem:[#allocation12 + $0x178] sm:$0xff] }
 0x39d   : > { %v4497_v62 = vpack.c.bf16 %v1893_v29, %v1889_v63  ;;  %v1956_v63 = vld [vmem:[#allocation12 + $0x370] sm:$0xff]  ;;  %v2413_v29 = vld [vmem:[#allocation12 + $0x708] sm:$0xff] }
 0x39f   : > { %4464 = vmatpush1.bf16.msra.mxu1 %v4463_v33  ;;  %v1901_v33 = vld [vmem:[#allocation12 + $0x1b8] sm:$0xff] }
 0x3a0   : > { %4466 = vmatprep.subr.bf16.mxu1 %v4465_v36  ;;  %v4501_v8 = vpack.c.bf16 %v1901_v33, %v1897_v54  ;;  %v2416_v54 = vld [vmem:[#allocation12 + $0x720] sm:$0xff]  ;;  %v2421_v33 = vld [vmem:[#allocation12 + $0x748] sm:$0xff] }
 0x3a3   : > { %4468 = vmatpush1.bf16.msra.mxu1 %v4467_v23  ;;  %v1909_v23 = vld [vmem:[#allocation12 + $0x1f8] sm:$0xff] }
 0x3a4   : > { %4470 = vmatprep.subr.bf16.mxu1 %v4469_v59  ;;  %v4503_v59 = vpack.c.bf16 %v1900_v12, %v1896_v42  ;;  %v4505_v32 = vpack.c.bf16 %v1909_v23, %v1905_v13  ;;  %v2410_v42 = vld [vmem:[#allocation4 + $0x18] sm:$0xff] }
 0x3a5   : > { %v2420_v13 = vld [vmem:[#allocation12 + $0x740] sm:$0xff] }
 0x3a6   : > { %v2424_v23 = vld [vmem:[#allocation12 + $0x760] sm:$0xff] }
 0x3a7   : > { %4472 = vmatpush1.bf16.msra.mxu1 %v4471_v15  ;;  %v1917_v15 = vld [vmem:[#allocation12 + $0x238] sm:$0xff] }
 0x3a8   : > { %4474 = vmatprep.subr.bf16.mxu1 %v4473_v3  ;;  %v4507_v3 = vpack.c.bf16 %v1908_v26, %v1904_v57  ;;  %v4509_v17 = vpack.c.bf16 %v1917_v15, %v1913_v58  ;;  %v2433_v57 = vld [vmem:[#allocation12 + $0x7a8] sm:$0xff]  ;;  %v6196_v26 = vrot.slane %v2410_v42, 2  ;;  %v4539_v58 = vpack.c.bf16 %v2424_v23, %v2420_v13 }
 0x3a9   : > { %v2493_v42 = vld [vmem:[#allocation12 + $0x988] sm:$0xff] }
 0x3ab   : > { %4476 = vmatpush1.bf16.msra.mxu1 %v4475_v41  ;;  %v1925_v41 = vld [vmem:[#allocation12 + $0x278] sm:$0xff] }
 0x3ac   : > { %4478 = vmatprep.subr.bf16.mxu1 %v4477_v6  ;;  %v4511_v6 = vpack.c.bf16 %v1916_v44, %v1912_v18  ;;  %v4513_v16 = vpack.c.bf16 %v1925_v41, %v1921_v55  ;;  %v2432_v18 = vld [vmem:[#allocation12 + $0x7a0] sm:$0xff]  ;;  %v2437_v44 = vld [vmem:[#allocation12 + $0x7c8] sm:$0xff] }
 0x3ad   : > { %v2441_v55 = vld [vmem:[#allocation12 + $0x7e8] sm:$0xff] }
 0x3ae   : > { %2318 = vmatmul.mubr.f32.vlgmr.msra.gmra.mrb[16].mxu1 %v6183_v45  ;;  %v4545_v41 = vpack.c.bf16 %v2441_v55, %v2437_v44  ;;  %v2509_v44 = vld [vmem:[#allocation12 + $0xa08] sm:$0xff] }
 0x3af   : > { %4046 = vmatprep.mubr.msk.f32.mxu1 %vm2088_vm11, %v6186_v2  ;;  %4480 = vmatpush1.bf16.msra.mxu1 %v4479_v37  ;;  %v1933_v37 = vld [vmem:[#allocation12 + $0x2b8] sm:$0xff]  ;;  %v2513_v55 = vld [vmem:[#allocation12 + $0xa28] sm:$0xff] }
 0x3b0   : > { %4482 = vmatprep.subr.bf16.mxu1 %v4481_v39  ;;  %v4515_v39 = vpack.c.bf16 %v1924_v19, %v1920_v21  ;;  %v4517_v49 = vpack.c.bf16 %v1933_v37, %v1929_v47  ;;  %v2445_v21 = vld [vmem:[#allocation12 + $0x808] sm:$0xff] }
 0x3b1   : > { %v2449_v19 = vld [vmem:[#allocation12 + $0x828] sm:$0xff] }
 0x3b2   : > { %2324 = vmatmul.mubr.f32.gmra.mrb[18].mxu1 %v6190_v46  ;;  %v4549_v37 = vpack.c.bf16 %v2449_v19, %v2445_v21  ;;  %v2517_v21 = vld [vmem:[#allocation12 + $0xa48] sm:$0xff] }
 0x3b3   : > { %4484 = vmatpush1.bf16.msra.mxu1 %v4483_v25  ;;  %4047 = vmatprep.mubr.msk.f32.mxu1 %vm2088_vm11, %v6179_v43  ;;  %v1888_v43 = vld [vmem:[#allocation12 + $0x150] sm:$0xff]  ;;  %v1941_v25 = vld [vmem:[#allocation12 + $0x2f8] sm:$0xff]  ;;  %v2521_v19 = vld [vmem:[#allocation12 + $0xa68] sm:$0xff] }
 0x3b4   : > { %4486 = vmatprep.subr.bf16.mxu1 %v4485_v22  ;;  %v4499_v36 = vpack.c.bf16 %v1892_v30, %v1888_v43  ;;  %v4519_v22 = vpack.c.bf16 %v1932_v10, %v1928_v27  ;;  %v4521_v61 = vpack.c.bf16 %v1941_v25, %v1937_v24  ;;  %v2412_v30 = vld [vmem:[#allocation12 + $0x700] sm:$0xff]  ;;  %v2457_v27 = vld [vmem:[#allocation12 + $0x868] sm:$0xff] }
 0x3b5   : > { %v2452_v25 = vld [vmem:[#allocation12 + $0x840] sm:$0xff] }
 0x3b7   : > { %4488 = vmatpush1.bf16.msra.mxu1 %v4487_v7  ;;  %v1949_v7 = vld [vmem:[#allocation12 + $0x338] sm:$0xff] }
 0x3b8   : > { %4490 = vmatprep.subr.bf16.mxu1 %v4489_v14  ;;  %v4523_v14 = vpack.c.bf16 %v1940_v50, %v1936_v20  ;;  %v4525_v4 = vpack.c.bf16 %v1949_v7, %v1945_v53  ;;  %v2465_v20 = vld [vmem:[#allocation12 + $0x8a8] sm:$0xff]  ;;  %v2460_v7 = vld [vmem:[#allocation12 + $0x880] sm:$0xff] }
 0x3bb   : > { %4492 = vmatpush1.bf16.msra.mxu1 %v4491_v5  ;;  %v1957_v5 = vld [vmem:[#allocation12 + $0x378] sm:$0xff] }
 0x3bc   : > { %4494 = vmatprep.subr.bf16.mxu1 %v4493_v48  ;;  %v4527_v48 = vpack.c.bf16 %v1948_v35, %v1944_v51  ;;  %v4529_v52 = vpack.c.bf16 %v1957_v5, %v1953_v1  ;;  %v2473_v51 = vld [vmem:[#allocation12 + $0x8e8] sm:$0xff]  ;;  %v2468_v5 = vld [vmem:[#allocation12 + $0x8c0] sm:$0xff] }
 0x3bf   : > { %4496 = vmatpush1.bf16.msra.mxu1 %v4495_v11  ;;  %v2417_v11 = vld [vmem:[#allocation12 + $0x728] sm:$0xff] }
 0x3c0   : > { %4498 = vmatprep.subr.bf16.mxu1 %v4497_v62  ;;  %v4531_v62 = vpack.c.bf16 %v1956_v63, %v1952_v56  ;;  %v4533_v43 = vpack.c.bf16 %v2417_v11, %v2413_v29  ;;  %v2481_v56 = vld [vmem:[#allocation12 + $0x928] sm:$0xff]  ;;  %v2476_v11 = vld [vmem:[#allocation12 + $0x900] sm:$0xff] }
 0x3c3   : > { %4500 = vmatpush1.bf16.msra.mxu1 %v4499_v36  ;;  %v2425_v36 = vld [vmem:[#allocation12 + $0x768] sm:$0xff] }
 0x3c4   : > { %4502 = vmatprep.subr.bf16.mxu1 %v4501_v8  ;;  %v4535_v8 = vpack.c.bf16 %v2416_v54, %v2412_v30  ;;  %v4537_v12 = vpack.c.bf16 %v2425_v36, %v2421_v33  ;;  %v2489_v30 = vld [vmem:[#allocation12 + $0x968] sm:$0xff]  ;;  %v2484_v36 = vld [vmem:[#allocation12 + $0x940] sm:$0xff] }
 0x3c7   : > { %4504 = vmatpush1.bf16.msra.mxu1 %v4503_v59  ;;  %v2408_v59 = vld [vmem:[#allocation4 + $0x8] sm:$0xfc] }
 0x3c8   : > { %4506 = vmatprep.subr.bf16.mxu1 %v4505_v32  ;;  %v2429_v32 = vld [vmem:[#allocation12 + $0x788] sm:$0xff]  ;;  %v2532_v15 = vrot.slane %v2408_v59, 2  ;;  %v2492_v59 = vld [vmem:[#allocation12 + $0x980] sm:$0xff] }
 0x3cb   : > { %4508 = vmatpush1.bf16.msra.mxu1 %v4507_v3  ;;  %v4541_v3 = vpack.c.bf16 %v2433_v57, %v2429_v32  ;;  %v2496_v32 = vld [vmem:[#allocation12 + $0x9a0] sm:$0xff]  ;;  %v2501_v57 = vld [vmem:[#allocation12 + $0x9c8] sm:$0xff] }
 0x3cc   : > { %4510 = vmatprep.subr.bf16.mxu1 %v4509_v17  ;;  %v2428_v17 = vld [vmem:[#allocation12 + $0x780] sm:$0xff] }
 0x3cf   : > { %4512 = vmatpush1.bf16.msra.mxu1 %v4511_v6  ;;  %v2436_v6 = vld [vmem:[#allocation12 + $0x7c0] sm:$0xff] }
 0x3d0   : > { %4514 = vmatprep.subr.bf16.mxu1 %v4513_v16  ;;  %v2440_v16 = vld [vmem:[#allocation12 + $0x7e0] sm:$0xff] }
 0x3d1   : > { %v4547_v47 = vpack.c.bf16 %v2440_v16, %v2436_v6  ;;  %v2508_v6 = vld [vmem:[#allocation12 + $0xa00] sm:$0xff] }
 0x3d2   : > { %v2512_v16 = vld [vmem:[#allocation12 + $0xa20] sm:$0xff] }
 0x3d3   : > { %4516 = vmatpush1.bf16.msra.mxu1 %v4515_v39  ;;  %v2448_v39 = vld [vmem:[#allocation12 + $0x820] sm:$0xff] }
 0x3d4   : > { %4518 = vmatprep.subr.bf16.mxu1 %v4517_v49  ;;  %v2453_v49 = vld [vmem:[#allocation12 + $0x848] sm:$0xff] }
 0x3d5   : > { %v4553_v24 = vpack.c.bf16 %v2457_v27, %v2453_v49  ;;  %v2415_v49 = vld [vmem:[#allocation12 + $0x718] sm:$0xff] }
 0x3d6   : > { %v2419_v27 = vld [vmem:[#allocation12 + $0x738] sm:$0xff] }
 0x3d7   : > { %4520 = vmatpush1.bf16.msra.mxu1 %v4519_v22  ;;  %v2456_v22 = vld [vmem:[#allocation12 + $0x860] sm:$0xff] }
 0x3d8   : > { %4522 = vmatprep.subr.bf16.mxu1 %v4521_v61  ;;  %v2461_v61 = vld [vmem:[#allocation12 + $0x888] sm:$0xff]  ;;  %v4555_v50 = vpack.c.bf16 %v2456_v22, %v2452_v25  ;;  %v4589_v22 = vpack.c.bf16 %v2419_v27, %v2415_v49 }
 0x3d9   : > { %v4557_v53 = vpack.c.bf16 %v2465_v20, %v2461_v61  ;;  %v2407_v25 = vld [vmem:[#allocation4] sm:$0xfc] }
 0x3da   : > { %v2414_v61 = vld [vmem:[#allocation12 + $0x710] sm:$0xff] }
 0x3db   : > { %4524 = vmatpush1.bf16.msra.mxu1 %v4523_v14  ;;  %v2464_v14 = vld [vmem:[#allocation12 + $0x8a0] sm:$0xff]  ;;  %v2418_v20 = vld [vmem:[#allocation12 + $0x730] sm:$0xff] }
 0x3dc   : > { %4526 = vmatprep.subr.bf16.mxu1 %v4525_v4  ;;  %v2469_v4 = vld [vmem:[#allocation12 + $0x8c8] sm:$0xff]  ;;  %v4559_v35 = vpack.c.bf16 %v2464_v14, %v2460_v7  ;;  %v2427_v7 = vld [vmem:[#allocation12 + $0x778] sm:$0xff]  ;;  %v2529_v14 = vrot.slane %v2407_v25, 2 }
 0x3dd   : > { %v4561_v1 = vpack.c.bf16 %v2473_v51, %v2469_v4  ;;  %v4591_v4 = vpack.c.bf16 %v2418_v20, %v2414_v61  ;;  %v2487_v25 = vld [vmem:[#allocation12 + $0x958] sm:$0xff] }
 0x3df   : > { %4528 = vmatpush1.bf16.msra.mxu1 %v4527_v48  ;;  %v2472_v48 = vld [vmem:[#allocation12 + $0x8e0] sm:$0xff] }
 0x3e0   : > { %4530 = vmatprep.subr.bf16.mxu1 %v4529_v52  ;;  %v2477_v52 = vld [vmem:[#allocation12 + $0x908] sm:$0xff]  ;;  %v4563_v63 = vpack.c.bf16 %v2472_v48, %v2468_v5  ;;  %v2431_v48 = vld [vmem:[#allocation12 + $0x798] sm:$0xff] }
 0x3e1   : > { %v4565_v29 = vpack.c.bf16 %v2481_v56, %v2477_v52  ;;  %v2435_v52 = vld [vmem:[#allocation12 + $0x7b8] sm:$0xff] }
 0x3e3   : > { %4532 = vmatpush1.bf16.msra.mxu1 %v4531_v62  ;;  %v2480_v62 = vld [vmem:[#allocation12 + $0x920] sm:$0xff] }
 0x3e4   : > { %4534 = vmatprep.subr.bf16.mxu1 %v4533_v43  ;;  %v2485_v43 = vld [vmem:[#allocation12 + $0x948] sm:$0xff]  ;;  %v4567_v54 = vpack.c.bf16 %v2480_v62, %v2476_v11  ;;  %v2434_v11 = vld [vmem:[#allocation12 + $0x7b0] sm:$0xff]  ;;  %v2439_v62 = vld [vmem:[#allocation12 + $0x7d8] sm:$0xff] }
 0x3e5   : > { %v4569_v33 = vpack.c.bf16 %v2489_v30, %v2485_v43  ;;  %v2443_v43 = vld [vmem:[#allocation12 + $0x7f8] sm:$0xff] }
 0x3e6   : > { %2395 = vmatmul.mubr.f32.vlgmr.msra.gmra.mrb[20].mxu1 %v6183_v45  ;;  %v6203_v45 = vsel %vm2528_vm12, %v2532_v15, %v6196_v26  ;;  %v4575_v15 = vpack.c.bf16 %v2496_v32, %v2492_v59  ;;  %v2450_v59 = vld [vmem:[#allocation12 + $0x830] sm:$0xff]  ;;  %v2455_v32 = vld [vmem:[#allocation12 + $0x858] sm:$0xff] }
 0x3e7   : > { %4048 = vmatprep.mubr.msk.f32.mxu1 %vm2088_vm11, %v6186_v2  ;;  %4536 = vmatpush1.bf16.msra.mxu1 %v4535_v8  ;;  %v4543_v2 = vpack.c.bf16 %v2432_v18, %v2428_v17  ;;  %v2488_v8 = vld [vmem:[#allocation12 + $0x960] sm:$0xff] }
 0x3e8   : > { %4538 = vmatprep.subr.bf16.mxu1 %v4537_v12  ;;  %v2497_v12 = vld [vmem:[#allocation12 + $0x9a8] sm:$0xff]  ;;  %v4571_v13 = vpack.c.bf16 %v2488_v8, %v2484_v36  ;;  %v2500_v17 = vld [vmem:[#allocation12 + $0x9c0] sm:$0xff]  ;;  %v2442_v36 = vld [vmem:[#allocation12 + $0x7f0] sm:$0xff] }
 0x3e9   : > { %v4573_v23 = vpack.c.bf16 %v2497_v12, %v2493_v42  ;;  %v2504_v18 = vld [vmem:[#allocation12 + $0x9e0] sm:$0xff]  ;;  %v2447_v8 = vld [vmem:[#allocation12 + $0x818] sm:$0xff] }
 0x3ea   : > { %2401 = vmatmul.mubr.f32.gmra.mrb[22].mxu1 %v6190_v46  ;;  %v2444_v46 = vld [vmem:[#allocation12 + $0x800] sm:$0xff]  ;;  %v2451_v42 = vld [vmem:[#allocation12 + $0x838] sm:$0xff] }
 0x3eb   : > { %4540 = vmatpush1.bf16.msra.mxu1 %v4539_v58  ;;  %4049 = vmatprep.mubr.msk.f32.mxu1 %vm2088_vm11, %v6203_v45  ;;  %v4551_v10 = vpack.c.bf16 %v2448_v39, %v2444_v46  ;;  %v2505_v58 = vld [vmem:[#allocation12 + $0x9e8] sm:$0xff]  ;;  %v2516_v46 = vld [vmem:[#allocation12 + $0xa40] sm:$0xff] }
 0x3ec   : > { %4542 = vmatprep.subr.bf16.mxu1 %v4541_v3  ;;  %v4577_v3 = vpack.c.bf16 %v2505_v58, %v2501_v57  ;;  %v2520_v39 = vld [vmem:[#allocation12 + $0xa60] sm:$0xff]  ;;  %v2459_v57 = vld [vmem:[#allocation12 + $0x878] sm:$0xff] }
 0x3ef   : > { %4544 = vmatpush1.bf16.msra.mxu1 %v4543_v2  ;;  %v4579_v2 = vpack.c.bf16 %v2504_v18, %v2500_v17  ;;  %v2463_v17 = vld [vmem:[#allocation12 + $0x898] sm:$0xff] }
 0x3f0   : > { %4546 = vmatprep.subr.bf16.mxu1 %v4545_v41  ;;  %v4581_v41 = vpack.c.bf16 %v2513_v55, %v2509_v44  ;;  %v2467_v18 = vld [vmem:[#allocation12 + $0x8b8] sm:$0xff] }
 0x3f1   : > { %v4613_v55 = vpack.c.bf16 %v2467_v18, %v2463_v17 }
 0x3f3   : > { %4548 = vmatpush1.bf16.msra.mxu1 %v4547_v47  ;;  %v4583_v47 = vpack.c.bf16 %v2512_v16, %v2508_v6  ;;  %v2471_v6 = vld [vmem:[#allocation12 + $0x8d8] sm:$0xff] }
 0x3f4   : > { %4550 = vmatprep.subr.bf16.mxu1 %v4549_v37  ;;  %v4585_v37 = vpack.c.bf16 %v2521_v19, %v2517_v21  ;;  %v2475_v16 = vld [vmem:[#allocation12 + $0x8f8] sm:$0xff] }
 0x3f5   : > { %v4617_v19 = vpack.c.bf16 %v2475_v16, %v2471_v6 }
 0x3f7   : > { %4552 = vmatpush1.bf16.msra.mxu1 %v4551_v10  ;;  %v2409_v10 = vld [vmem:[#allocation4 + $0x10] sm:$0xff] }
 0x3f8   : > { %4554 = vmatprep.subr.bf16.mxu1 %v4553_v24  ;;  %v4587_v24 = vpack.c.bf16 %v2520_v39, %v2516_v46  ;;  %v2479_v46 = vld [vmem:[#allocation12 + $0x918] sm:$0xff] }
 0x3f9   : > { %v2483_v39 = vld [vmem:[#allocation12 + $0x938] sm:$0xff] }
 0x3fa   : > { %v4621_v27 = vpack.c.bf16 %v2483_v39, %v2479_v46 }
 0x3fb   : > { %4556 = vmatpush1.bf16.msra.mxu1 %v4555_v50  ;;  %v6207_v50 = vrot.slane %v2409_v10, 2  ;;  %v2478_v10 = vld [vmem:[#allocation12 + $0x910] sm:$0xff] }
 0x3fc   : > { %4558 = vmatprep.subr.bf16.mxu1 %v4557_v53  ;;  %v2423_v53 = vld [vmem:[#allocation12 + $0x758] sm:$0xff] }
 0x3fd   : > { %v4593_v51 = vpack.c.bf16 %v2427_v7, %v2423_v53  ;;  %v6211_v5 = vsel %vm2528_vm12, %v2529_v14, %v6207_v50  ;;  %v2486_v53 = vld [vmem:[#allocation12 + $0x950] sm:$0xff]  ;;  %v2495_v14 = vld [vmem:[#allocation12 + $0x998] sm:$0xff] }
 0x3fe   : > { %v2490_v7 = vld [vmem:[#allocation12 + $0x970] sm:$0xff] }
 0x3ff   : > { %4560 = vmatpush1.bf16.msra.mxu1 %v4559_v35  ;;  %v2422_v35 = vld [vmem:[#allocation12 + $0x750] sm:$0xff] }
 0x400   : > { %4562 = vmatprep.subr.bf16.mxu1 %v4561_v1  ;;  %v2426_v1 = vld [vmem:[#allocation12 + $0x770] sm:$0xff] }
 0x401   : > { %v4595_v56 = vpack.c.bf16 %v2426_v1, %v2422_v35  ;;  %v2494_v1 = vld [vmem:[#allocation12 + $0x990] sm:$0xff] }
 0x403   : > { %4564 = vmatpush1.bf16.msra.mxu1 %v4563_v63  ;;  %v4597_v63 = vpack.c.bf16 %v2435_v52, %v2431_v48  ;;  %v2498_v48 = vld [vmem:[#allocation12 + $0x9b0] sm:$0xff]  ;;  %v2503_v52 = vld [vmem:[#allocation12 + $0x9d8] sm:$0xff] }
 0x404   : > { %4566 = vmatprep.subr.bf16.mxu1 %v4565_v29  ;;  %v2430_v29 = vld [vmem:[#allocation12 + $0x790] sm:$0xff] }
 0x405   : > { %v4599_v30 = vpack.c.bf16 %v2434_v11, %v2430_v29  ;;  %v2502_v11 = vld [vmem:[#allocation12 + $0x9d0] sm:$0xff] }
 0x407   : > { %4568 = vmatpush1.bf16.msra.mxu1 %v4567_v54  ;;  %v4601_v54 = vpack.c.bf16 %v2443_v43, %v2439_v62  ;;  %v2506_v62 = vld [vmem:[#allocation12 + $0x9f0] sm:$0xff]  ;;  %v2511_v43 = vld [vmem:[#allocation12 + $0xa18] sm:$0xff] }
 0x408   : > { %4570 = vmatprep.subr.bf16.mxu1 %v4569_v33  ;;  %v2438_v33 = vld [vmem:[#allocation12 + $0x7d0] sm:$0xff] }
 0x409   : > { %v4603_v12 = vpack.c.bf16 %v2442_v36, %v2438_v33  ;;  %v2510_v36 = vld [vmem:[#allocation12 + $0xa10] sm:$0xff] }
 0x40b   : > { %4572 = vmatpush1.bf16.msra.mxu1 %v4571_v13  ;;  %v4605_v13 = vpack.c.bf16 %v2451_v42, %v2447_v8  ;;  %v2514_v8 = vld [vmem:[#allocation12 + $0xa30] sm:$0xff]  ;;  %v2519_v42 = vld [vmem:[#allocation12 + $0xa58] sm:$0xff] }
 0x40c   : > { %4574 = vmatprep.subr.bf16.mxu1 %v4573_v23  ;;  %v2446_v23 = vld [vmem:[#allocation12 + $0x810] sm:$0xff] }
 0x40d   : > { %v4607_v58 = vpack.c.bf16 %v2450_v59, %v2446_v23  ;;  %v2518_v59 = vld [vmem:[#allocation12 + $0xa50] sm:$0xff] }
 0x40f   : > { %4576 = vmatpush1.bf16.msra.mxu1 %v4575_v15  ;;  %v4609_v15 = vpack.c.bf16 %v2459_v57, %v2455_v32  ;;  %v2522_v32 = vld [vmem:[#allocation12 + $0xa70] sm:$0xff] }
 0x410   : > { %4578 = vmatprep.subr.bf16.mxu1 %v4577_v3  ;;  %v2458_v3 = vld [vmem:[#allocation12 + $0x870] sm:$0xff]  ;;  %v4643_v57 = vpack.c.bf16 %v2522_v32, %v2518_v59 }
 0x413   : > { %4580 = vmatpush1.bf16.msra.mxu1 %v4579_v2  ;;  %v2462_v2 = vld [vmem:[#allocation12 + $0x890] sm:$0xff] }
 0x414   : > { %4582 = vmatprep.subr.bf16.mxu1 %v4581_v41  ;;  %v2466_v41 = vld [vmem:[#allocation12 + $0x8b0] sm:$0xff] }
 0x415   : > { %v4615_v21 = vpack.c.bf16 %v2466_v41, %v2462_v2 }
 0x417   : > { %4584 = vmatpush1.bf16.msra.mxu1 %v4583_v47  ;;  %v2470_v47 = vld [vmem:[#allocation12 + $0x8d0] sm:$0xff] }
 0x418   : > { %4586 = vmatprep.subr.bf16.mxu1 %v4585_v37  ;;  %v2474_v37 = vld [vmem:[#allocation12 + $0x8f0] sm:$0xff] }
 0x419   : > { %v4619_v49 = vpack.c.bf16 %v2474_v37, %v2470_v47 }
 0x41b   : > { %4588 = vmatpush1.bf16.msra.mxu1 %v4587_v24  ;;  %v2482_v24 = vld [vmem:[#allocation12 + $0x930] sm:$0xff] }
 0x41c   : > { %4590 = vmatprep.subr.bf16.mxu1 %v4589_v22  ;;  %v2491_v22 = vld [vmem:[#allocation12 + $0x978] sm:$0xff]  ;;  %v4623_v61 = vpack.c.bf16 %v2482_v24, %v2478_v10 }
 0x41d   : > { %v4625_v20 = vpack.c.bf16 %v2491_v22, %v2487_v25 }
 0x41e   : > { %2606 = vmatmul.mubr.f32.vlgmr.msra.gmra.mrb[16].mxu1 %v6211_v5 }
 0x41f   : > { %4050 = vmatprep.mubr.msk.f32.mxu1 %vm2088_vm11, %v6196_v26  ;;  %4592 = vmatpush1.bf16.msra.mxu1 %v4591_v4  ;;  %v2499_v4 = vld [vmem:[#allocation12 + $0x9b8] sm:$0xff] }
 0x420   : > { %4594 = vmatprep.subr.bf16.mxu1 %v4593_v51  ;;  %v4627_v51 = vpack.c.bf16 %v2490_v7, %v2486_v53  ;;  %v4629_v35 = vpack.c.bf16 %v2499_v4, %v2495_v14 }
 0x422   : > { %2612 = vmatmul.mubr.f32.gmra.mrb[18].mxu1 %v6207_v50 }
 0x423   : > { %4596 = vmatpush1.bf16.msra.mxu1 %v4595_v56  ;;  %4051 = vmatprep.mubr.msk.f32.mxu1 %vm2088_vm11, %v6203_v45  ;;  %v2454_v45 = vld [vmem:[#allocation12 + $0x850] sm:$0xff]  ;;  %v2507_v56 = vld [vmem:[#allocation12 + $0x9f8] sm:$0xff] }
 0x424   : > { %4598 = vmatprep.subr.bf16.mxu1 %v4597_v63  ;;  %v4611_v44 = vpack.c.bf16 %v2458_v3, %v2454_v45  ;;  %v4631_v63 = vpack.c.bf16 %v2498_v48, %v2494_v1  ;;  %v4633_v29 = vpack.c.bf16 %v2507_v56, %v2503_v52 }
 0x427   : > { %4600 = vmatpush1.bf16.msra.mxu1 %v4599_v30  ;;  %v2515_v30 = vld [vmem:[#allocation12 + $0xa38] sm:$0xff] }
 0x428   : > { %4602 = vmatprep.subr.bf16.mxu1 %v4601_v54  ;;  %v4635_v54 = vpack.c.bf16 %v2506_v62, %v2502_v11  ;;  %v4637_v33 = vpack.c.bf16 %v2515_v30, %v2511_v43 }
 0x42b   : > { %4604 = vmatpush1.bf16.msra.mxu1 %v4603_v12  ;;  %v2523_v12 = vld [vmem:[#allocation12 + $0xa78] sm:$0xff] }
 0x42c   : > { %4606 = vmatprep.subr.bf16.mxu1 %v4605_v13  ;;  %v4639_v13 = vpack.c.bf16 %v2514_v8, %v2510_v36  ;;  %v4641_v23 = vpack.c.bf16 %v2523_v12, %v2519_v42 }
 0x42f   : > { %4608 = vmatpush1.bf16.msra.mxu1 %v4607_v58  ;;  %v2703_v58 = vld [vmem:[#allocation13] sm:$0xf] }
 0x430   : > { %4610 = vmatprep.subr.bf16.mxu1 %v4609_v15  ;;  %v2708_v15 = vrot.slane %v2703_v58, %v5786_v31  ;;  %v2712_v45 = vrot.slane %v2703_v58, %v5791_v34 }
 0x433   : > { %4612 = vmatpush1.bf16.msra.mxu1 %v4611_v44 }
 0x434   : > { %4614 = vmatprep.subr.bf16.mxu1 %v4613_v55 }
 0x437   : > { %4616 = vmatpush1.bf16.msra.mxu1 %v4615_v21 }
 0x438   : > { %4618 = vmatprep.subr.bf16.mxu1 %v4617_v19 }
 0x43b   : > { %4620 = vmatpush1.bf16.msra.mxu1 %v4619_v49 }
 0x43c   : > { %4622 = vmatprep.subr.bf16.mxu1 %v4621_v27 }
 0x43f   : > { %4624 = vmatpush1.bf16.msra.mxu1 %v4623_v61  ;;  %v2716_v61 = vrot.slane %v2703_v58, %v1120_v38 }
 0x440   : > { %4626 = vmatprep.subr.bf16.mxu1 %v4625_v20  ;;  %v2720_v20 = vrot.slane %v2703_v58, %v1124_v40 }
 0x443   : > { %4628 = vmatpush1.bf16.msra.mxu1 %v4627_v51 }
 0x444   : > { %4630 = vmatprep.subr.bf16.mxu1 %v4629_v35 }
 0x447   : > { %4632 = vmatpush1.bf16.msra.mxu1 %v4631_v63 }
 0x448   : > { %4634 = vmatprep.subr.bf16.mxu1 %v4633_v29 }
 0x44b   : > { %4636 = vmatpush1.bf16.msra.mxu1 %v4635_v54 }
 0x44c   : > { %4638 = vmatprep.subr.bf16.mxu1 %v4637_v33 }
 0x44f   : > { %4640 = vmatpush1.bf16.msra.mxu1 %v4639_v13 }
 0x450   : > { %4642 = vmatprep.subr.bf16.mxu1 %v4641_v23 }
 0x453   : > { %4644 = vmatpush1.bf16.msra.mxu1 %v4643_v57 }
 0x454   : > { %4939 = vmatprep.subr.bf16.mxu1 %v5390_v9 }
 0x456   : > { %2683 = vmatmul.mubr.f32.vlgmr.msra.gmra.mrb[20].mxu1 %v6211_v5 }
 0x457   : > { %4052 = vmatprep.mubr.msk.f32.mxu1 %vm2088_vm11, %v6196_v26 }
 0x45a   : > { %2689 = vmatmul.mubr.f32.gmra.mrb[22].mxu1 %v6207_v50 }
 0x45b   : > { %4246 = vmatprep.mubr.msk.f32.mxu1 %vm5391_vm0, %v5380_v0 }
 0x4f1   : > { %v2607_v3 = vpop.f32.mrb[16].mxu1 }
 0x4f2   : > { %v2725_v17 = vadd.f32 %v2708_v15, %v2607_v3  ;;  %v2609_v18 = vpop.f32.mrb[17].mxu1 }
 0x4f3   : > { %v2726_v44 = vadd.f32 %v2712_v45, %v2609_v18 }
 0x4f4   : > { %v2733_v55 = vmax.f32 %v2725_v17, 0.0 }
 0x4f5   : > { %v2734_v2 = vmax.f32 %v2726_v44, 0.0  ;;  %v2613_v41 = vpop.f32.mrb[18].mxu1 }
 0x4f6   : > { %v2745_v6 = vrot.slane %v2733_v55, 1  ;;  %v2729_v16 = vadd.f32 %v2708_v15, %v2613_v41  ;;  %v2615_v5 = vpop.f32.mrb[19].mxu1 }
 0x4f7   : > { %v2746_v21 = vrot.slane %v2734_v2, 1  ;;  %v2730_v19 = vadd.f32 %v2712_v45, %v2615_v5 }
 0x4f8   : > { %v2753_v26 = vmax.f32 %v2733_v55, %v2745_v6  ;;  %v2737_v47 = vmax.f32 %v2729_v16, 0.0 }
 0x4f9   : > { %v2754_v50 = vmax.f32 %v2734_v2, %v2746_v21  ;;  %v2738_v37 = vmax.f32 %v2730_v19, 0.0 }
 0x4fa   : > { %v2830_v46 = vrot.slane %v2737_v47, 1 }
 0x4fb   : > { %v2761_v39 = vcombine.low %v2753_v26, %v2754_v50  ;;  %v2793_v49 = vcombine.high %v2753_v26, %v2754_v50  ;;  %v2831_v27 = vrot.slane %v2738_v37, 1  ;;  %v2983_v26 = vld [vmem:[%s7093_s5 + $0x8] sm:$0xff]  ;;  %v2984_v50 = vld [vmem:[%s7093_s5 + $0x10] sm:$0xff] }
 0x4fc   : > { %v2838_v10 = vmax.f32 %v2737_v47, %v2830_v46 }
 0x4fd   : > { %v2839_v24 = vmax.f32 %v2738_v37, %v2831_v27  ;;  %v2769_v33 = vrot.slane %v2761_v39, %v5836_v60  ;;  %v2801_v8 = vrot.slane %v2793_v49, %v5836_v60  ;;  %v2985_v37 = vld [vmem:[%s7093_s5 + $0x18] sm:$0xff]  ;;  %v2986_v27 = vld [vmem:[%s7093_s5 + $0x20] sm:$0xff] }
 0x4fe   : > { %v4649_v49 = vpack.c.bf16 %v2985_v37, %v2984_v50 }
 0x4ff   : > { %v2846_v25 = vcombine.low %v2838_v10, %v2839_v24  ;;  %v2879_v22 = vcombine.high %v2838_v10, %v2839_v24  ;;  %v2987_v10 = vld [vmem:[%s7093_s5 + $0x28] sm:$0xff] }
 0x501   : > { %v2854_v58 = vrot.slane %v2846_v25, %v5836_v60  ;;  %v2887_v15 = vrot.slane %v2879_v22, %v5836_v60  ;;  %v4652_v22 = vpack.c.bf16 %v2987_v10, %v2986_v27 }
 0x529   : > { %v2684_v53 = vpop.f32.mrb[20].mxu1 }
 0x52a   : > { %v2727_v7 = vadd.f32 %v2716_v61, %v2684_v53  ;;  %v2686_v14 = vpop.f32.mrb[21].mxu1 }
 0x52b   : > { %v2728_v4 = vadd.f32 %v2720_v20, %v2686_v14  ;;  %v2990_v14 = vld [vmem:[%s7093_s5 + $0x40] sm:$0xff] }
 0x52c   : > { %v2735_v51 = vmax.f32 %v2727_v7, 0.0 }
 0x52d   : > { %v2736_v35 = vmax.f32 %v2728_v4, 0.0  ;;  %v2690_v1 = vpop.f32.mrb[22].mxu1  ;;  %v2991_v4 = vld [vmem:[%s7093_s5 + $0x48] sm:$0xff] }
 0x52e   : > { %v2747_v48 = vrot.slane %v2735_v51, 1  ;;  %v2731_v52 = vadd.f32 %v2716_v61, %v2690_v1  ;;  %v2692_v56 = vpop.f32.mrb[23].mxu1  ;;  %v2988_v61 = vld [vmem:[%s7093_s5 + $0x30] sm:$0xff]  ;;  %v2993_v1 = vld [vmem:[%s7093_s5 + $0x58] sm:$0xff] }
 0x52f   : > { %v2748_v63 = vrot.slane %v2736_v35, 1  ;;  %v2732_v29 = vadd.f32 %v2720_v20, %v2692_v56  ;;  %v2989_v20 = vld [vmem:[%s7093_s5 + $0x38] sm:$0xff]  ;;  %v2995_v56 = vld [vmem:[%s7093_s5 + $0x68] sm:$0xff] }
 0x530   : > { %v2755_v11 = vmax.f32 %v2735_v51, %v2747_v48  ;;  %v2739_v62 = vmax.f32 %v2731_v52, 0.0  ;;  %v4655_v7 = vpack.c.bf16 %v2989_v20, %v2988_v61  ;;  %v4658_v51 = vpack.c.bf16 %v2991_v4, %v2990_v14  ;;  %v2994_v52 = vld [vmem:[%s7093_s5 + $0x60] sm:$0xff]  ;;  %v4056_v61 = vld [vmem:[%s7093_s5 + $0xf0] sm:$0xff]  ;;  %v4057_v20 = vld [vmem:[%s7093_s5 + $0xf8] sm:$0xff] }
 0x531   : > { %v2756_v43 = vmax.f32 %v2736_v35, %v2748_v63  ;;  %v2740_v30 = vmax.f32 %v2732_v29, 0.0  ;;  %v2992_v35 = vld [vmem:[%s7093_s5 + $0x50] sm:$0xff]  ;;  %v4664_v63 = vpack.c.bf16 %v2995_v56, %v2994_v52  ;;  %v4058_v14 = vld [vmem:[%s7093_s5 + $0x100] sm:$0xff]  ;;  %v4059_v4 = vld [vmem:[%s7093_s5 + $0x108] sm:$0xff] }
 0x532   : > { %v2832_v38 = vrot.slane %v2739_v62, 1  ;;  %v4661_v48 = vpack.c.bf16 %v2993_v1, %v2992_v35  ;;  %v2996_v29 = vld [vmem:[%s7093_s5 + $0x70] sm:$0xff]  ;;  %v4061_v1 = vld [vmem:[%s7093_s5 + $0x118] sm:$0xff]  ;;  %v4062_v52 = vld [vmem:[%s7093_s5 + $0x120] sm:$0xff] }
 0x533   : > { %v2762_v54 = vcombine.low %v2755_v11, %v2756_v43  ;;  %v2794_v28 = vcombine.high %v2755_v11, %v2756_v43  ;;  %v2833_v40 = vrot.slane %v2740_v30, 1  ;;  %v2997_v11 = vld [vmem:[%s7093_s5 + $0x78] sm:$0xff]  ;;  %v2998_v43 = vld [vmem:[%s7093_s5 + $0x80] sm:$0xff]  ;;  %v4060_v35 = vld [vmem:[%s7093_s5 + $0x110] sm:$0xff] }
 0x534   : > { %v2840_v36 = vmax.f32 %v2739_v62, %v2832_v38  ;;  %v4667_v62 = vpack.c.bf16 %v2997_v11, %v2996_v29  ;;  %v4063_v56 = vld [vmem:[%s7093_s5 + $0x128] sm:$0xff]  ;;  %v4064_v29 = vld [vmem:[%s7093_s5 + $0x130] sm:$0xff]  ;;  %v4065_v11 = vld [vmem:[%s7093_s5 + $0x138] sm:$0xff] }
 0x535   : > { %v2776_v42 = vrot.slane %v2762_v54, %v5836_v60  ;;  %v2808_v12 = vrot.slane %v2794_v28, %v5836_v60  ;;  %v2841_v13 = vmax.f32 %v2740_v30, %v2833_v40  ;;  %v2999_v30 = vld [vmem:[%s7093_s5 + $0x88] sm:$0xff]  ;;  %v3000_v54 = vld [vmem:[%s7093_s5 + $0x90] sm:$0xff]  ;;  %v3001_v28 = vld [vmem:[%s7093_s5 + $0x98] sm:$0xff] }
 0x536   : > { %v4670_v38 = vpack.c.bf16 %v2999_v30, %v2998_v43  ;;  %v4673_v40 = vpack.c.bf16 %v3001_v28, %v3000_v54  ;;  %v4066_v43 = vld [vmem:[%s7093_s5 + $0x140] sm:$0xff]  ;;  %v4067_v30 = vld [vmem:[%s7093_s5 + $0x148] sm:$0xff]  ;;  %v4068_v54 = vld [vmem:[%s7093_s5 + $0x150] sm:$0xff] }
 0x537   : > { %v2777_v23 = vcombine.low %v2769_v33, %v2776_v42  ;;  %v2809_v59 = vcombine.low %v2801_v8, %v2808_v12  ;;  %v2847_v32 = vcombine.low %v2840_v36, %v2841_v13  ;;  %v2880_v57 = vcombine.high %v2840_v36, %v2841_v13  ;;  %v3002_v33 = vld [vmem:[%s7093_s5 + $0xa0] sm:$0xff]  ;;  %v3003_v36 = vld [vmem:[%s7093_s5 + $0xa8] sm:$0xff]  ;;  %v3004_v42 = vld [vmem:[%s7093_s5 + $0xb0] sm:$0xff] }
 0x538   : > { %v4676_v8 = vpack.c.bf16 %v3003_v36, %v3002_v33  ;;  %v3005_v12 = vld [vmem:[%s7093_s5 + $0xb8] sm:$0xff]  ;;  %v4070_v33 = vld [vmem:[%s7093_s5 + $0x160] sm:$0xff]  ;;  %v4071_v36 = vld [vmem:[%s7093_s5 + $0x168] sm:$0xff] }
 0x539   : > { %v2784_v45 = vrot.slane %v2777_v23, %v5836_v60  ;;  %v2816_v3 = vrot.slane %v2809_v59, %v5836_v60  ;;  %v2861_v17 = vrot.slane %v2847_v32, %v5836_v60  ;;  %v2894_v18 = vrot.slane %v2880_v57, %v5836_v60  ;;  %v3006_v23 = vld [vmem:[%s7093_s5 + $0xc0] sm:$0xff]  ;;  %v3007_v59 = vld [vmem:[%s7093_s5 + $0xc8] sm:$0xff]  ;;  %v3008_v32 = vld [vmem:[%s7093_s5 + $0xd0] sm:$0xff] }
 0x53a   : > { %v4679_v13 = vpack.c.bf16 %v3005_v12, %v3004_v42  ;;  %v4682_v57 = vpack.c.bf16 %v3007_v59, %v3006_v23  ;;  %v4069_v28 = vld [vmem:[%s7093_s5 + $0x158] sm:$0xff]  ;;  %v4072_v42 = vld [vmem:[%s7093_s5 + $0x170] sm:$0xff]  ;;  %v4074_v23 = vld [vmem:[%s7093_s5 + $0x180] sm:$0xff] }
 0x53b   : > { %2786 = vst.msk [vmem:[#allocation5] ss:$8 sm:$0xf] %vm5839_vm6, %v2784_v45  ;;  %v2788_v44 = vcombine.high %v2784_v45, %v2784_v45  ;;  %2819 = vst.msk [vmem:[#allocation5 + $0x2] ss:$8 sm:$0xf] %vm5839_vm6, %v2816_v3  ;;  %v2821_v55 = vcombine.high %v2816_v3, %v2816_v3  ;;  %v2862_v2 = vcombine.low %v2854_v58, %v2861_v17 }
 0x53c   : > { %v2895_v41 = vcombine.low %v2887_v15, %v2894_v18  ;;  %v3009_v58 = vld [vmem:[%s7093_s5 + $0xd8] sm:$0xff]  ;;  %v4075_v59 = vld [vmem:[%s7093_s5 + $0x188] sm:$0xff] }
 0x53d   : > { %2791 = vst.msk [vmem:[#allocation5 + $0x1] ss:$8 sm:$0xf] %vm5839_vm6, %v2788_v44  ;;  %2824 = vst.msk [vmem:[#allocation5 + $0x3] ss:$8 sm:$0xf] %vm5839_vm6, %v2821_v55  ;;  %v2869_v6 = vrot.slane %v2862_v2, %v5836_v60  ;;  %v4685_v18 = vpack.c.bf16 %v3009_v58, %v3008_v32  ;;  %v4718_v32 = vpack.c.bf16 %v4075_v59, %v4074_v23 }
 0x53e   : > { %v2902_v16 = vrot.slane %v2895_v41, %v5836_v60  ;;  %v2982_v60 = vld [vmem:[%s7093_s5] sm:$0xff]  ;;  %v4073_v12 = vld [vmem:[%s7093_s5 + $0x178] sm:$0xff] }
 0x53f   : > { %2872 = vst.msk [vmem:[#allocation5 + $0x4] ss:$8 sm:$0xf] %vm5839_vm6, %v2869_v6  ;;  %v2874_v5 = vcombine.high %v2869_v6, %v2869_v6  ;;  %v4646_v47 = vpack.c.bf16 %v2983_v26, %v2982_v60  ;;  %v4077_v58 = vld [vmem:[%s7093_s5 + $0x198] sm:$0xff] }
 0x540   : > { %2905 = vst.msk [vmem:[#allocation5 + $0x6] ss:$8 sm:$0xf] %vm5839_vm6, %v2902_v16 }
 0x541   : > { %2877 = vst.msk [vmem:[#allocation5 + $0x5] ss:$8 sm:$0xf] %vm5839_vm6, %v2874_v5  ;;  %4647 = vmatpush1.bf16.msra.mxu0 %v4646_v47  ;;  %vm2913_vm6 = vcmask 260096  }
 0x542   : > { %4648 = vmatprep.subr.bf16.mxu0 %v5390_v9 }
 0x545   : > { %4650 = vmatpush1.bf16.msra.mxu0 %v4649_v49  ;;  %v4055_v49 = vld [vmem:[%s7093_s5 + $0xe8] sm:$0xff] }
 0x546   : > { %4651 = vmatprep.subr.bf16.mxu0 %v5390_v9 }
 0x548   : > { %v6255_v21 = vld [vmem:[#allocation5 + $0x8] sm:$0x7f]  ;;  %v6257_v19 = vld [vmem:[#allocation5] sm:$0x7f]  ;;  %v6279_v39 = vld [vmem:[#allocation5 + $0x10] sm:$0x7f] }
 0x549   : > { %2929 = vrot.lane.b32.xlu1 %v6255_v21, %s5384_s25  ;;  %2917 = vrot.lane.b32.xlu0 %v6257_v19, %s5384_s25  ;;  %v6277_v46 = vld [vmem:[#allocation5 + $0x8] sm:$0x7f]  ;;  %v6292_v24 = vld [vmem:[#allocation5 + $0x18] sm:$0x7f]  ;;  %v6294_v25 = vld [vmem:[#allocation5] sm:$0x7f] }
 0x54a   : > { %v6307_v53 = vld [vmem:[#allocation5 + $0x10] sm:$0x7f]  ;;  %4653 = vmatpush1.bf16.msra.mxu0 %v4652_v22 }
 0x54b   : > { %4654 = vmatprep.subr.bf16.mxu0 %v5390_v9 }
 0x54d   : > { %2941 = vrot.lane.b32.xlu1 %v6277_v46, %s5384_s25  ;;  %2960 = vrot.lane.b32.xlu0 %v6279_v39, %s5384_s25 }
 0x54e   : > { %4656 = vmatpush1.bf16.msra.mxu0 %v4655_v7  ;;  %v4691_v7 = vpack.c.bf16 %v4057_v20, %v4056_v61  ;;  %v4095_v20 = vld [vmem:[%s7093_s5 + $0x220] sm:$0xff] }
 0x54f   : > { %4657 = vmatprep.subr.bf16.mxu0 %v5390_v9 }
 0x551   : > { %2971 = vrot.lane.b32.xlu0 %v6292_v24, %s5384_s25  ;;  %2909 = vrot.lane.b32.xlu1 %v6294_v25, %s5384_s25 }
 0x552   : > { %4659 = vmatpush1.bf16.msra.mxu0 %v4658_v51  ;;  %v4694_v51 = vpack.c.bf16 %v4059_v4, %v4058_v14  ;;  %v4097_v14 = vld [vmem:[%s7093_s5 + $0x230] sm:$0xff]  ;;  %v4098_v4 = vld [vmem:[%s7093_s5 + $0x238] sm:$0xff] }
 0x553   : > { %4660 = vmatprep.subr.bf16.mxu0 %v5390_v9 }
 0x555   : > { %2953 = vrot.lane.b32.xlu0 %v6307_v53, %s5384_s25 }
 0x556   : > { %4662 = vmatpush1.bf16.msra.mxu0 %v4661_v48  ;;  %v4697_v48 = vpack.c.bf16 %v4061_v1, %v4060_v35  ;;  %v4099_v35 = vld [vmem:[%s7093_s5 + $0x240] sm:$0xff]  ;;  %v4100_v1 = vld [vmem:[%s7093_s5 + $0x248] sm:$0xff] }
 0x557   : > { %4663 = vmatprep.subr.bf16.mxu0 %v5390_v9 }
 0x55a   : > { %4665 = vmatpush1.bf16.msra.mxu0 %v4664_v63  ;;  %v4700_v63 = vpack.c.bf16 %v4063_v56, %v4062_v52  ;;  %v4101_v52 = vld [vmem:[%s7093_s5 + $0x250] sm:$0xff]  ;;  %v4102_v56 = vld [vmem:[%s7093_s5 + $0x258] sm:$0xff] }
 0x55b   : > { %4666 = vmatprep.subr.bf16.mxu0 %v5390_v9 }
 0x55e   : > { %4668 = vmatpush1.bf16.msra.mxu0 %v4667_v62  ;;  %v4703_v62 = vpack.c.bf16 %v4065_v11, %v4064_v29  ;;  %v4103_v29 = vld [vmem:[%s7093_s5 + $0x260] sm:$0xff]  ;;  %v4104_v11 = vld [vmem:[%s7093_s5 + $0x268] sm:$0xff] }
 0x55f   : > { %4669 = vmatprep.subr.bf16.mxu0 %v5390_v9 }
 0x562   : > { %4671 = vmatpush1.bf16.msra.mxu0 %v4670_v38  ;;  %v4706_v38 = vpack.c.bf16 %v4067_v30, %v4066_v43  ;;  %v4105_v43 = vld [vmem:[%s7093_s5 + $0x270] sm:$0xff]  ;;  %v4106_v30 = vld [vmem:[%s7093_s5 + $0x278] sm:$0xff] }
 0x563   : > { %4672 = vmatprep.subr.bf16.mxu0 %v5390_v9 }
 0x566   : > { %4674 = vmatpush1.bf16.msra.mxu0 %v4673_v40  ;;  %v4709_v40 = vpack.c.bf16 %v4069_v28, %v4068_v54  ;;  %v4107_v54 = vld [vmem:[%s7093_s5 + $0x280] sm:$0xff]  ;;  %v4108_v28 = vld [vmem:[%s7093_s5 + $0x288] sm:$0xff] }
 0x567   : > { %4675 = vmatprep.subr.bf16.mxu0 %v5390_v9 }
 0x56a   : > { %4677 = vmatpush1.bf16.msra.mxu0 %v4676_v8  ;;  %v4712_v8 = vpack.c.bf16 %v4071_v36, %v4070_v33  ;;  %v4109_v33 = vld [vmem:[%s7093_s5 + $0x290] sm:$0xff]  ;;  %v4110_v36 = vld [vmem:[%s7093_s5 + $0x298] sm:$0xff] }
 0x56b   : > { %4678 = vmatprep.subr.bf16.mxu0 %v5390_v9 }
 0x56e   : > { %4680 = vmatpush1.bf16.msra.mxu0 %v4679_v13  ;;  %v4715_v13 = vpack.c.bf16 %v4073_v12, %v4072_v42  ;;  %v4112_v42 = vld [vmem:[%s7093_s5 + $0x2a0] sm:$0xff]  ;;  %v4113_v12 = vld [vmem:[%s7093_s5 + $0x2a8] sm:$0xff] }
 0x56f   : > { %4681 = vmatprep.subr.bf16.mxu0 %v5390_v9  ;;  %v4772_v23 = vpack.c.bf16 %v4113_v12, %v4112_v42  ;;  %v4149_v42 = vld [vmem:[%s7093_s5 + $0x3c0] sm:$0xff]  ;;  %v4150_v12 = vld [vmem:[%s7093_s5 + $0x3c8] sm:$0xff] }
 0x572   : > { %4683 = vmatpush1.bf16.msra.mxu0 %v4682_v57  ;;  %v4076_v57 = vld [vmem:[%s7093_s5 + $0x190] sm:$0xff] }
 0x573   : > { %4684 = vmatprep.subr.bf16.mxu0 %v5390_v9 }
 0x576   : > { %4686 = vmatpush1.bf16.msra.mxu0 %v4685_v18  ;;  %v4080_v18 = vld [vmem:[%s7093_s5 + $0x1b0] sm:$0xff] }
 0x577   : > { %4687 = vmatprep.subr.bf16.mxu0 %v5390_v9 }
 0x5bb   : > { %v2930_v15 = vpop.permute.xlu1 %2929  ;;  %v2918_v45 = vpop.permute.xlu0 %2917 }
 0x5bc   : > { %v2932_v3 = vmax.f32 %v6255_v21, %v2930_v15  ;;  %v2920_v17 = vmax.f32 %v6257_v19, %v2918_v45  ;;  %v4721_v15 = vpack.c.bf16 %v4077_v58, %v4076_v57  ;;  %v4078_v45 = vld [vmem:[%s7093_s5 + $0x1a0] sm:$0xff]  ;;  %v4115_v57 = vld [vmem:[%s7093_s5 + $0x2b8] sm:$0xff] }
 0x5be   : > { %2934 = vrot.lane.b32.xlu0 %v2932_v3, %s5386_s2  ;;  %2922 = vrot.lane.b32.xlu1 %v2920_v17, %s5384_s25  ;;  %v4079_v3 = vld [vmem:[%s7093_s5 + $0x1a8] sm:$0xff] }
 0x5bf   : > { %v2942_v44 = vpop.permute.xlu1 %2941  ;;  %v2961_v55 = vpop.permute.xlu0 %2960  ;;  %v4724_v17 = vpack.c.bf16 %v4079_v3, %v4078_v45  ;;  %v4116_v45 = vld [vmem:[%s7093_s5 + $0x2c0] sm:$0xff]  ;;  %v4117_v3 = vld [vmem:[%s7093_s5 + $0x2c8] sm:$0xff] }
 0x5c0   : > { %v2944_v2 = vmax.f32 %v6277_v46, %v2942_v44  ;;  %v2963_v41 = vmax.f32 %v6279_v39, %v2961_v55  ;;  %v4054_v39 = vld [vmem:[%s7093_s5 + $0xe0] sm:$0xff]  ;;  %v4081_v44 = vld [vmem:[%s7093_s5 + $0x1b8] sm:$0xff] }
 0x5c1   : > { %v4688_v22 = vpack.c.bf16 %v4055_v49, %v4054_v39  ;;  %v4727_v55 = vpack.c.bf16 %v4081_v44, %v4080_v18  ;;  %v4090_v39 = vld [vmem:[%s7093_s5 + $0x1f8] sm:$0xff]  ;;  %v4118_v18 = vld [vmem:[%s7093_s5 + $0x2d0] sm:$0xff] }
 0x5c2   : > { %2946 = vrot.lane.b32.xlu0 %v2944_v2, %s5388_s30  ;;  %2965 = vrot.lane.b32.xlu1 %v2963_v41, %s5384_s25  ;;  %v4083_v2 = vld [vmem:[%s7093_s5 + $0x1c0] sm:$0xff]  ;;  %v4084_v41 = vld [vmem:[%s7093_s5 + $0x1c8] sm:$0xff] }
 0x5c3   : > { %v2972_v6 = vpop.permute.xlu0 %2971  ;;  %v2910_v16 = vpop.permute.xlu1 %2909  ;;  %v4119_v44 = vld [vmem:[%s7093_s5 + $0x2d8] sm:$0xff] }
 0x5c4   : > { %v2974_v5 = vmax.f32 %v6292_v24, %v2972_v6  ;;  %v2912_v21 = vmax.f32 %v6294_v25, %v2910_v16  ;;  %v4730_v16 = vpack.c.bf16 %v4084_v41, %v4083_v2  ;;  %v4120_v2 = vld [vmem:[%s7093_s5 + $0x2e0] sm:$0xff]  ;;  %v4121_v41 = vld [vmem:[%s7093_s5 + $0x2e8] sm:$0xff] }
 0x5c6   : > { %2914 = vst.msk [vmem:[#allocation6] sm:$0x7f] %vm2913_vm6, %v2912_v21  ;;  %2976 = vrot.lane.b32.xlu1 %v2974_v5, %s5386_s2  ;;  %v4085_v21 = vld [vmem:[%s7093_s5 + $0x1d0] sm:$0xff]  ;;  %s403_s2 = sand.u32 1, %s5362_s10  }
 0x5c7   : > { %v2954_v19 = vpop.permute.xlu0 %2953  ;;  %s404_s24 = scalar_lea.vmem [#allocation18], %s403_s2  ;;  %s3860_s4 = scalar_lea.sflag [#allocation9], %s403_s2 }
 0x5c8   : > { %v2956_v60 = vmax.f32 %v6307_v53, %v2954_v19  ;;  %v4086_v19 = vld [vmem:[%s7093_s5 + $0x1d8] sm:$0xff]  ;;  %s3872_s23 = sshll.u32 %s404_s24, 4  ;;  %s7048_s23 = int_to_ptr.vmem [resolvable:$true] %s3872_s23 }
 0x5c9   : > { %s5292_s20 = scalar_lea.vmem %s7048_s23, 16  ;;  %p5299_p13 = scmp.lt.s32.totalorder %s7048_s23, %s5297_s15 }
 0x5ca   : > { %2957 = vst.msk [vmem:[#allocation6 + $0x8] sm:$0x7f] %vm2913_vm6, %v2956_v60  ;;  %p5293_p4 = scmp.ne.s32.totalorder %s7048_s23, %s5292_s20  ;;  %p5300_p1 = scmp.lt.s32.totalorder %s5298_s14, %s5292_s20 }
 0x5cc   : > { %p5294_p8 = pnand %p5293_p4, %p7133_p7  ;;  %p5301_p0 = por %p5300_p1, %p5299_p13 }
 0x5ce   : > { %p5295_p11 = pneg %p5294_p8 }
 0x5d0   : > { %p5302_p6 = pnand %p5301_p0, %p5295_p11 }
 0x630   : > { %v2935_v26 = vpop.permute.xlu0 %2934  ;;  %v2923_v47 = vpop.permute.xlu1 %2922 }
 0x631   : > { %2926 = vst.msk [vmem:[#allocation6] sm:$0x7f] %vm2925_vm13, %v2923_v47  ;;  %v4087_v47 = vld [vmem:[%s7093_s5 + $0x1e0] sm:$0xff] }
 0x632   : > { %2938 = vst.msk [vmem:[#allocation6] sm:$0x7f] %vm2937_vm14, %v2935_v26  ;;  %v4733_v26 = vpack.c.bf16 %v4086_v19, %v4085_v21  ;;  %v4124_v19 = vld [vmem:[%s7093_s5 + $0x300] sm:$0xff] }
 0x634   : > { %v2947_v50 = vpop.permute.xlu0 %2946  ;;  %v2966_v37 = vpop.permute.xlu1 %2965 }
 0x635   : > { %2950 = vst.msk [vmem:[#allocation6] sm:$0x7f] %vm2949_vm15, %v2947_v50  ;;  %v4088_v50 = vld [vmem:[%s7093_s5 + $0x1e8] sm:$0xff] }
 0x636   : > { %2968 = vst.msk [vmem:[#allocation6 + $0x8] sm:$0x7f] %vm2925_vm13, %v2966_v37  ;;  %v4736_v37 = vpack.c.bf16 %v4088_v50, %v4087_v47  ;;  %v4126_v47 = vld [vmem:[%s7093_s5 + $0x310] sm:$0xff]  ;;  %v4127_v50 = vld [vmem:[%s7093_s5 + $0x318] sm:$0xff] }
 0x638   : > { %v2977_v46 = vpop.permute.xlu1 %2976 }
 0x639   : > { %2979 = vst.msk [vmem:[#allocation6 + $0x8] sm:$0x7f] %vm2937_vm14, %v2977_v46  ;;  %v4089_v46 = vld [vmem:[%s7093_s5 + $0x1f0] sm:$0xff] }
 0x63a   : > { %v4739_v49 = vpack.c.bf16 %v4090_v39, %v4089_v46  ;;  %v4128_v46 = vld [vmem:[%s7093_s5 + $0x320] sm:$0xff]  ;;  %v4129_v39 = vld [vmem:[%s7093_s5 + $0x328] sm:$0xff] }
 0x640   : > { %v2981_v27 = vld [vmem:[#allocation6] ss:$8 sm:$0x3]  ;;  %v6401_v10 = vld [vmem:[#allocation6 + $0x1] ss:$8 sm:$0x3] }
 0x641   : > { %v3014_v24 = vrot.slane %v2981_v27, %v5786_v31  ;;  %v3018_v25 = vrot.slane %v2981_v27, %v5791_v34  ;;  %v3132_v53 = vrot.slane %v6401_v10, %v5791_v34  ;;  %v6506_v6 = vld [vmem:[#allocation6 + $0x2] ss:$8 sm:$0x3]  ;;  %v3128_v5 = vrot.slane %v6401_v10, %v5786_v31 }
 0x642   : > { %v3246_v60 = vrot.slane %v6506_v6, %v5791_v34  ;;  %v4091_v27 = vld [vmem:[%s7093_s5 + $0x200] sm:$0xff]  ;;  %v4092_v10 = vld [vmem:[%s7093_s5 + $0x208] sm:$0xff]  ;;  %v3242_v59 = vrot.slane %v6506_v6, %v5786_v31  ;;  %v4784_v6 = vpack.c.bf16 %v4121_v41, %v4120_v2  ;;  %v4159_v2 = vld [vmem:[%s7093_s5 + $0x410] sm:$0xff] }
 0x643   : > { %4053 = vmatprep.mubr.msk.f32.mxu0 %vm2088_vm11, %v3018_v25  ;;  %v4093_v25 = vld [vmem:[%s7093_s5 + $0x210] sm:$0xff]  ;;  %v4160_v41 = vld [vmem:[%s7093_s5 + $0x418] sm:$0xff] }
 0x644   : > { %3087 = vmatmul.mubr.f32.vlgmr.msra.gmra.mrb[8].mxu0 %v3014_v24  ;;  %v4742_v24 = vpack.c.bf16 %v4092_v10, %v4091_v27  ;;  %v4130_v27 = vld [vmem:[%s7093_s5 + $0x330] sm:$0xff]  ;;  %v4131_v10 = vld [vmem:[%s7093_s5 + $0x338] sm:$0xff] }
 0x645   : > { %4689 = vmatpush1.bf16.msra.mxu0 %v4688_v22  ;;  %4082 = vmatprep.mubr.msk.f32.mxu0 %vm2088_vm11, %v3132_v53  ;;  %v4094_v22 = vld [vmem:[%s7093_s5 + $0x218] sm:$0xff]  ;;  %v4096_v53 = vld [vmem:[%s7093_s5 + $0x228] sm:$0xff] }
 0x646   : > { %4690 = vmatprep.subr.bf16.mxu0 %v5390_v9  ;;  %v4745_v61 = vpack.c.bf16 %v4094_v22, %v4093_v25  ;;  %v4132_v25 = vld [vmem:[%s7093_s5 + $0x340] sm:$0xff]  ;;  %v4133_v22 = vld [vmem:[%s7093_s5 + $0x348] sm:$0xff] }
 0x649   : > { %4692 = vmatpush1.bf16.msra.mxu0 %v4691_v7  ;;  %v4748_v7 = vpack.c.bf16 %v4096_v53, %v4095_v20  ;;  %v4134_v20 = vld [vmem:[%s7093_s5 + $0x350] sm:$0xff]  ;;  %v4135_v53 = vld [vmem:[%s7093_s5 + $0x358] sm:$0xff] }
 0x64a   : > { %4693 = vmatprep.subr.bf16.mxu0 %v5390_v9 }
 0x64d   : > { %4695 = vmatpush1.bf16.msra.mxu0 %v4694_v51  ;;  %v4751_v51 = vpack.c.bf16 %v4098_v4, %v4097_v14  ;;  %v4136_v14 = vld [vmem:[%s7093_s5 + $0x360] sm:$0xff]  ;;  %v4137_v4 = vld [vmem:[%s7093_s5 + $0x368] sm:$0xff] }
 0x64e   : > { %4696 = vmatprep.subr.bf16.mxu0 %v5390_v9 }
 0x651   : > { %4698 = vmatpush1.bf16.msra.mxu0 %v4697_v48  ;;  %v4754_v48 = vpack.c.bf16 %v4100_v1, %v4099_v35  ;;  %v4138_v35 = vld [vmem:[%s7093_s5 + $0x370] sm:$0xff]  ;;  %v4139_v1 = vld [vmem:[%s7093_s5 + $0x378] sm:$0xff] }
 0x652   : > { %4699 = vmatprep.subr.bf16.mxu0 %v5390_v9 }
 0x655   : > { %4701 = vmatpush1.bf16.msra.mxu0 %v4700_v63  ;;  %v4757_v63 = vpack.c.bf16 %v4102_v56, %v4101_v52  ;;  %v4141_v52 = vld [vmem:[%s7093_s5 + $0x380] sm:$0xff]  ;;  %v4142_v56 = vld [vmem:[%s7093_s5 + $0x388] sm:$0xff] }
 0x656   : > { %4702 = vmatprep.subr.bf16.mxu0 %v5390_v9 }
 0x659   : > { %4704 = vmatpush1.bf16.msra.mxu0 %v4703_v62  ;;  %v4760_v62 = vpack.c.bf16 %v4104_v11, %v4103_v29  ;;  %v4814_v29 = vpack.c.bf16 %v4142_v56, %v4141_v52  ;;  %v4176_v52 = vld [vmem:[%s7093_s5 + $0x490] sm:$0xff]  ;;  %v4177_v56 = vld [vmem:[%s7093_s5 + $0x498] sm:$0xff] }
 0x65a   : > { %4705 = vmatprep.subr.bf16.mxu0 %v5390_v9 }
 0x65d   : > { %4707 = vmatpush1.bf16.msra.mxu0 %v4706_v38  ;;  %v4763_v38 = vpack.c.bf16 %v4106_v30, %v4105_v43  ;;  %v4144_v43 = vld [vmem:[%s7093_s5 + $0x398] sm:$0xff] }
 0x65e   : > { %4708 = vmatprep.subr.bf16.mxu0 %v5390_v9 }
 0x661   : > { %4710 = vmatpush1.bf16.msra.mxu0 %v4709_v40  ;;  %v4766_v40 = vpack.c.bf16 %v4108_v28, %v4107_v54  ;;  %v4145_v54 = vld [vmem:[%s7093_s5 + $0x3a0] sm:$0xff]  ;;  %v4146_v28 = vld [vmem:[%s7093_s5 + $0x3a8] sm:$0xff] }
 0x662   : > { %4711 = vmatprep.subr.bf16.mxu0 %v5390_v9 }
 0x665   : > { %4713 = vmatpush1.bf16.msra.mxu0 %v4712_v8  ;;  %v4769_v8 = vpack.c.bf16 %v4110_v36, %v4109_v33  ;;  %v4147_v33 = vld [vmem:[%s7093_s5 + $0x3b0] sm:$0xff]  ;;  %v4148_v36 = vld [vmem:[%s7093_s5 + $0x3b8] sm:$0xff] }
 0x666   : > { %4714 = vmatprep.subr.bf16.mxu0 %v5390_v9 }
 0x669   : > { %4716 = vmatpush1.bf16.msra.mxu0 %v4715_v13  ;;  %v6611_v13 = vld [vmem:[#allocation6 + $0x3] ss:$8 sm:$0x3] }
 0x66a   : > { %4717 = vmatprep.subr.bf16.mxu0 %v5390_v9  ;;  %v3360_v58 = vrot.slane %v6611_v13, %v5791_v34  ;;  %v3356_v11 = vrot.slane %v6611_v13, %v5786_v31  ;;  %v4826_v13 = vpack.c.bf16 %v4150_v12, %v4149_v42  ;;  %v4186_v42 = vld [vmem:[%s7093_s5 + $0x4e0] sm:$0xff]  ;;  %v4187_v12 = vld [vmem:[%s7093_s5 + $0x4e8] sm:$0xff] }
 0x66d   : > { %4719 = vmatpush1.bf16.msra.mxu0 %v4718_v32  ;;  %v4114_v32 = vld [vmem:[%s7093_s5 + $0x2b0] sm:$0xff] }
 0x66e   : > { %4720 = vmatprep.subr.bf16.mxu0 %v5390_v9 }
 0x671   : > { %4722 = vmatpush1.bf16.msra.mxu0 %v4721_v15  ;;  %v4775_v15 = vpack.c.bf16 %v4115_v57, %v4114_v32  ;;  %v4153_v57 = vld [vmem:[%s7093_s5 + $0x3e0] sm:$0xff] }
 0x672   : > { %4723 = vmatprep.subr.bf16.mxu0 %v5390_v9 }
 0x675   : > { %4725 = vmatpush1.bf16.msra.mxu0 %v4724_v17  ;;  %v4778_v17 = vpack.c.bf16 %v4117_v3, %v4116_v45  ;;  %v4155_v45 = vld [vmem:[%s7093_s5 + $0x3f0] sm:$0xff]  ;;  %v4156_v3 = vld [vmem:[%s7093_s5 + $0x3f8] sm:$0xff] }
 0x676   : > { %4726 = vmatprep.subr.bf16.mxu0 %v5390_v9 }
 0x679   : > { %4728 = vmatpush1.bf16.msra.mxu0 %v4727_v55  ;;  %v4781_v55 = vpack.c.bf16 %v4119_v44, %v4118_v18  ;;  %v4157_v18 = vld [vmem:[%s7093_s5 + $0x400] sm:$0xff]  ;;  %v4158_v44 = vld [vmem:[%s7093_s5 + $0x408] sm:$0xff] }
 0x67a   : > { %4729 = vmatprep.subr.bf16.mxu0 %v5390_v9 }
 0x67c   : > { %3201 = vmatmul.mubr.f32.vlgmr.msra.gmra.mrb[8].mxu0 %v3128_v5  ;;  %v4123_v5 = vld [vmem:[%s7093_s5 + $0x2f8] sm:$0xff] }
 0x67d   : > { %4731 = vmatpush1.bf16.msra.mxu0 %v4730_v16  ;;  %4111 = vmatprep.mubr.msk.f32.mxu0 %vm2088_vm11, %v3246_v60  ;;  %v4122_v16 = vld [vmem:[%s7093_s5 + $0x2f0] sm:$0xff]  ;;  %v4125_v60 = vld [vmem:[%s7093_s5 + $0x308] sm:$0xff] }
 0x67e   : > { %4732 = vmatprep.subr.bf16.mxu0 %v5390_v9  ;;  %v4787_v21 = vpack.c.bf16 %v4123_v5, %v4122_v16  ;;  %v4161_v16 = vld [vmem:[%s7093_s5 + $0x420] sm:$0xff]  ;;  %v4162_v5 = vld [vmem:[%s7093_s5 + $0x428] sm:$0xff] }
 0x681   : > { %4734 = vmatpush1.bf16.msra.mxu0 %v4733_v26  ;;  %v4790_v26 = vpack.c.bf16 %v4125_v60, %v4124_v19  ;;  %v4163_v19 = vld [vmem:[%s7093_s5 + $0x430] sm:$0xff]  ;;  %v4164_v60 = vld [vmem:[%s7093_s5 + $0x438] sm:$0xff] }
 0x682   : > { %4735 = vmatprep.subr.bf16.mxu0 %v5390_v9 }
 0x685   : > { %4737 = vmatpush1.bf16.msra.mxu0 %v4736_v37  ;;  %v4793_v37 = vpack.c.bf16 %v4127_v50, %v4126_v47  ;;  %v3779_v47 = vld [vmem:[%s7095_s7 + $0x8] sm:$0xff]  ;;  %v4847_v50 = vpack.c.bf16 %v4164_v60, %v4163_v19 }
 0x686   : > { %4738 = vmatprep.subr.bf16.mxu0 %v5390_v9 }
 0x689   : > { %4740 = vmatpush1.bf16.msra.mxu0 %v4739_v49  ;;  %v4796_v49 = vpack.c.bf16 %v4129_v39, %v4128_v46  ;;  %v4165_v46 = vld [vmem:[%s7093_s5 + $0x440] sm:$0xff]  ;;  %v4166_v39 = vld [vmem:[%s7093_s5 + $0x448] sm:$0xff] }
 0x68a   : > { %4741 = vmatprep.subr.bf16.mxu0 %v5390_v9 }
 0x68d   : > { %4743 = vmatpush1.bf16.msra.mxu0 %v4742_v24  ;;  %v4799_v24 = vpack.c.bf16 %v4131_v10, %v4130_v27  ;;  %v4167_v27 = vld [vmem:[%s7093_s5 + $0x450] sm:$0xff]  ;;  %v4168_v10 = vld [vmem:[%s7093_s5 + $0x458] sm:$0xff] }
 0x68e   : > { %4744 = vmatprep.subr.bf16.mxu0 %v5390_v9 }
 0x691   : > { %4746 = vmatpush1.bf16.msra.mxu0 %v4745_v61  ;;  %v4802_v61 = vpack.c.bf16 %v4133_v22, %v4132_v25  ;;  %v4170_v25 = vld [vmem:[%s7093_s5 + $0x460] sm:$0xff]  ;;  %v4171_v22 = vld [vmem:[%s7093_s5 + $0x468] sm:$0xff] }
 0x692   : > { %4747 = vmatprep.subr.bf16.mxu0 %v5390_v9 }
 0x695   : > { %4749 = vmatpush1.bf16.msra.mxu0 %v4748_v7  ;;  %v4805_v7 = vpack.c.bf16 %v4135_v53, %v4134_v20  ;;  %v4856_v20 = vpack.c.bf16 %v4171_v22, %v4170_v25  ;;  %v4208_v25 = vld [vmem:[%s7093_s5 + $0x588] sm:$0xff] }
 0x696   : > { %4750 = vmatprep.subr.bf16.mxu0 %v5390_v9 }
 0x699   : > { %4752 = vmatpush1.bf16.msra.mxu0 %v4751_v51  ;;  %v4808_v51 = vpack.c.bf16 %v4137_v4, %v4136_v14  ;;  %v4173_v14 = vld [vmem:[%s7093_s5 + $0x478] sm:$0xff] }
 0x69a   : > { %4753 = vmatprep.subr.bf16.mxu0 %v5390_v9 }
 0x69d   : > { %4755 = vmatpush1.bf16.msra.mxu0 %v4754_v48  ;;  %v4811_v48 = vpack.c.bf16 %v4139_v1, %v4138_v35  ;;  %v4174_v35 = vld [vmem:[%s7093_s5 + $0x480] sm:$0xff]  ;;  %v4175_v1 = vld [vmem:[%s7093_s5 + $0x488] sm:$0xff] }
 0x69e   : > { %4756 = vmatprep.subr.bf16.mxu0 %v5390_v9 }
 0x6a1   : > { %4758 = vmatpush1.bf16.msra.mxu0 %v4757_v63  ;;  %v6716_v63 = vld [vmem:[#allocation6 + $0x4] ss:$8 sm:$0x3] }
 0x6a2   : > { %4759 = vmatprep.subr.bf16.mxu0 %v5390_v9  ;;  %v3474_v30 = vrot.slane %v6716_v63, %v5791_v34  ;;  %v3470_v53 = vrot.slane %v6716_v63, %v5786_v31  ;;  %v4865_v63 = vpack.c.bf16 %v4177_v56, %v4176_v52  ;;  %v4216_v52 = vld [vmem:[%s7093_s5 + $0x5c8] sm:$0xff] }
 0x6a5   : > { %4761 = vmatpush1.bf16.msra.mxu0 %v4760_v62  ;;  %v4143_v62 = vld [vmem:[%s7093_s5 + $0x390] sm:$0xff] }
 0x6a6   : > { %4762 = vmatprep.subr.bf16.mxu0 %v5390_v9 }
 0x6a9   : > { %4764 = vmatpush1.bf16.msra.mxu0 %v4763_v38  ;;  %v4817_v38 = vpack.c.bf16 %v4144_v43, %v4143_v62  ;;  %v4180_v43 = vld [vmem:[%s7093_s5 + $0x4b0] sm:$0xff] }
 0x6aa   : > { %4765 = vmatprep.subr.bf16.mxu0 %v5390_v9 }
 0x6ad   : > { %4767 = vmatpush1.bf16.msra.mxu0 %v4766_v40  ;;  %v4820_v40 = vpack.c.bf16 %v4146_v28, %v4145_v54  ;;  %v4182_v54 = vld [vmem:[%s7093_s5 + $0x4c0] sm:$0xff]  ;;  %v4183_v28 = vld [vmem:[%s7093_s5 + $0x4c8] sm:$0xff] }
 0x6ae   : > { %4768 = vmatprep.subr.bf16.mxu0 %v5390_v9 }
 0x6b1   : > { %4770 = vmatpush1.bf16.msra.mxu0 %v4769_v8  ;;  %v4823_v8 = vpack.c.bf16 %v4148_v36, %v4147_v33  ;;  %v4184_v33 = vld [vmem:[%s7093_s5 + $0x4d0] sm:$0xff]  ;;  %v4185_v36 = vld [vmem:[%s7093_s5 + $0x4d8] sm:$0xff] }
 0x6b2   : > { %4771 = vmatprep.subr.bf16.mxu0 %v5390_v9 }
 0x6b4   : > { %3315 = vmatmul.mubr.f32.vlgmr.msra.gmra.mrb[8].mxu0 %v3242_v59  ;;  %v4152_v59 = vld [vmem:[%s7093_s5 + $0x3d8] sm:$0xff] }
 0x6b5   : > { %4773 = vmatpush1.bf16.msra.mxu0 %v4772_v23  ;;  %4140 = vmatprep.mubr.msk.f32.mxu0 %vm2088_vm11, %v3360_v58  ;;  %v4151_v23 = vld [vmem:[%s7093_s5 + $0x3d0] sm:$0xff]  ;;  %v4154_v58 = vld [vmem:[%s7093_s5 + $0x3e8] sm:$0xff] }
 0x6b6   : > { %4774 = vmatprep.subr.bf16.mxu0 %v5390_v9  ;;  %v4829_v32 = vpack.c.bf16 %v4152_v59, %v4151_v23  ;;  %v4188_v23 = vld [vmem:[%s7093_s5 + $0x4f0] sm:$0xff]  ;;  %v4189_v59 = vld [vmem:[%s7093_s5 + $0x4f8] sm:$0xff] }
 0x6b9   : > { %4776 = vmatpush1.bf16.msra.mxu0 %v4775_v15  ;;  %v4832_v15 = vpack.c.bf16 %v4154_v58, %v4153_v57  ;;  %v4190_v57 = vld [vmem:[%s7093_s5 + $0x500] sm:$0xff]  ;;  %v4191_v58 = vld [vmem:[%s7093_s5 + $0x508] sm:$0xff] }
 0x6ba   : > { %4777 = vmatprep.subr.bf16.mxu0 %v5390_v9 }
 0x6bd   : > { %4779 = vmatpush1.bf16.msra.mxu0 %v4778_v17  ;;  %v4835_v17 = vpack.c.bf16 %v4156_v3, %v4155_v45  ;;  %v4192_v45 = vld [vmem:[%s7093_s5 + $0x510] sm:$0xff]  ;;  %v4193_v3 = vld [vmem:[%s7093_s5 + $0x518] sm:$0xff] }
 0x6be   : > { %4780 = vmatprep.subr.bf16.mxu0 %v5390_v9 }
 0x6c1   : > { %4782 = vmatpush1.bf16.msra.mxu0 %v4781_v55  ;;  %v4838_v55 = vpack.c.bf16 %v4158_v44, %v4157_v18  ;;  %v4194_v18 = vld [vmem:[%s7093_s5 + $0x520] sm:$0xff]  ;;  %v4195_v44 = vld [vmem:[%s7093_s5 + $0x528] sm:$0xff] }
 0x6c2   : > { %4783 = vmatprep.subr.bf16.mxu0 %v5390_v9 }
 0x6c5   : > { %4785 = vmatpush1.bf16.msra.mxu0 %v4784_v6  ;;  %v4841_v6 = vpack.c.bf16 %v4160_v41, %v4159_v2  ;;  %v4196_v2 = vld [vmem:[%s7093_s5 + $0x530] sm:$0xff]  ;;  %v4197_v41 = vld [vmem:[%s7093_s5 + $0x538] sm:$0xff] }
 0x6c6   : > { %4786 = vmatprep.subr.bf16.mxu0 %v5390_v9 }
 0x6c9   : > { %4788 = vmatpush1.bf16.msra.mxu0 %v4787_v21  ;;  %v4844_v21 = vpack.c.bf16 %v4162_v5, %v4161_v16  ;;  %v4199_v16 = vld [vmem:[%s7093_s5 + $0x540] sm:$0xff]  ;;  %v4200_v5 = vld [vmem:[%s7093_s5 + $0x548] sm:$0xff] }
 0x6ca   : > { %4789 = vmatprep.subr.bf16.mxu0 %v5390_v9  ;;  %v4898_v19 = vpack.c.bf16 %v4200_v5, %v4199_v16 }
 0x6cd   : > { %4791 = vmatpush1.bf16.msra.mxu0 %v4790_v26  ;;  %v3778_v26 = vld [vmem:[%s7095_s7] sm:$0xff] }
 0x6ce   : > { %4792 = vmatprep.subr.bf16.mxu0 %v5390_v9 }
 0x6d1   : > { %4794 = vmatpush1.bf16.msra.mxu0 %v4793_v37  ;;  %v4940_v37 = vpack.c.bf16 %v3779_v47, %v3778_v26  ;;  %v4201_v26 = vld [vmem:[%s7093_s5 + $0x550] sm:$0xff]  ;;  %v4202_v47 = vld [vmem:[%s7093_s5 + $0x558] sm:$0xff] }
 0x6d2   : > { %4795 = vmatprep.subr.bf16.mxu0 %v5390_v9 }
 0x6d3   : > { %4941 = vmatpush3.bf16.msra.mxu1 %v4940_v37  ;;  %v4901_v37 = vpack.c.bf16 %v4202_v47, %v4201_v26 }
 0x6d4   : > { %4942 = vmatprep.subr.bf16.mxu1 %v5390_v9 }
 0x6d5   : > { %4797 = vmatpush1.bf16.msra.mxu0 %v4796_v49  ;;  %v4850_v49 = vpack.c.bf16 %v4166_v39, %v4165_v46  ;;  %v4203_v46 = vld [vmem:[%s7093_s5 + $0x560] sm:$0xff]  ;;  %v4204_v39 = vld [vmem:[%s7093_s5 + $0x568] sm:$0xff] }
 0x6d6   : > { %4798 = vmatprep.subr.bf16.mxu0 %v5390_v9 }
 0x6d9   : > { %4800 = vmatpush1.bf16.msra.mxu0 %v4799_v24  ;;  %v4853_v24 = vpack.c.bf16 %v4168_v10, %v4167_v27  ;;  %v4206_v27 = vld [vmem:[%s7093_s5 + $0x578] sm:$0xff] }
 0x6da   : > { %4801 = vmatprep.subr.bf16.mxu0 %v5390_v9 }
 0x6dd   : > { %4803 = vmatpush1.bf16.msra.mxu0 %v4802_v61  ;;  %v6828_v61 = vld [vmem:[#allocation6 + $0x5] ss:$8 sm:$0x3] }
 0x6de   : > { %4804 = vmatprep.subr.bf16.mxu0 %v5390_v9  ;;  %v3588_v4 = vrot.slane %v6828_v61, %v5791_v34  ;;  %v3584_v60 = vrot.slane %v6828_v61, %v5786_v31  ;;  %v4209_v61 = vld [vmem:[%s7093_s5 + $0x590] sm:$0xff] }
 0x6e1   : > { %4806 = vmatpush1.bf16.msra.mxu0 %v4805_v7  ;;  %v4172_v7 = vld [vmem:[%s7093_s5 + $0x470] sm:$0xff] }
 0x6e2   : > { %4807 = vmatprep.subr.bf16.mxu0 %v5390_v9 }
 0x6e5   : > { %4809 = vmatpush1.bf16.msra.mxu0 %v4808_v51  ;;  %v4859_v51 = vpack.c.bf16 %v4173_v14, %v4172_v7  ;;  %v4211_v7 = vld [vmem:[%s7093_s5 + $0x5a0] sm:$0xff]  ;;  %v4212_v14 = vld [vmem:[%s7093_s5 + $0x5a8] sm:$0xff] }
 0x6e6   : > { %4810 = vmatprep.subr.bf16.mxu0 %v5390_v9 }
 0x6e9   : > { %4812 = vmatpush1.bf16.msra.mxu0 %v4811_v48  ;;  %v4862_v48 = vpack.c.bf16 %v4175_v1, %v4174_v35  ;;  %v4214_v35 = vld [vmem:[%s7093_s5 + $0x5b8] sm:$0xff] }
 0x6ea   : > { %4813 = vmatprep.subr.bf16.mxu0 %v5390_v9 }
 0x6ec   : > { %3429 = vmatmul.mubr.f32.vlgmr.msra.gmra.mrb[8].mxu0 %v3356_v11  ;;  %v4179_v11 = vld [vmem:[%s7093_s5 + $0x4a8] sm:$0xff] }
 0x6ed   : > { %4815 = vmatpush1.bf16.msra.mxu0 %v4814_v29  ;;  %4169 = vmatprep.mubr.msk.f32.mxu0 %vm2088_vm11, %v3474_v30  ;;  %v4178_v29 = vld [vmem:[%s7093_s5 + $0x4a0] sm:$0xff]  ;;  %v4181_v30 = vld [vmem:[%s7093_s5 + $0x4b8] sm:$0xff] }
 0x6ee   : > { %4816 = vmatprep.subr.bf16.mxu0 %v5390_v9  ;;  %v4868_v62 = vpack.c.bf16 %v4179_v11, %v4178_v29  ;;  %v4218_v29 = vld [vmem:[%s7093_s5 + $0x5d8] sm:$0xff] }
 0x6f1   : > { %4818 = vmatpush1.bf16.msra.mxu0 %v4817_v38  ;;  %v4871_v38 = vpack.c.bf16 %v4181_v30, %v4180_v43  ;;  %v4220_v43 = vld [vmem:[%s7093_s5 + $0x5e8] sm:$0xff] }
 0x6f2   : > { %4819 = vmatprep.subr.bf16.mxu0 %v5390_v9 }
 0x6f5   : > { %4821 = vmatpush1.bf16.msra.mxu0 %v4820_v40  ;;  %v4874_v40 = vpack.c.bf16 %v4183_v28, %v4182_v54  ;;  %v4222_v54 = vld [vmem:[%s7093_s5 + $0x5f8] sm:$0xff] }
 0x6f6   : > { %4822 = vmatprep.subr.bf16.mxu0 %v5390_v9 }
 0x6f9   : > { %4824 = vmatpush1.bf16.msra.mxu0 %v4823_v8  ;;  %v4877_v8 = vpack.c.bf16 %v4185_v36, %v4184_v33  ;;  %v4224_v33 = vld [vmem:[%s7093_s5 + $0x608] sm:$0xff] }
 0x6fa   : > { %4825 = vmatprep.subr.bf16.mxu0 %v5390_v9 }
 0x6fd   : > { %4827 = vmatpush1.bf16.msra.mxu0 %v4826_v13  ;;  %v4880_v13 = vpack.c.bf16 %v4187_v12, %v4186_v42  ;;  %v4226_v42 = vld [vmem:[%s7093_s5 + $0x618] sm:$0xff] }
 0x6fe   : > { %4828 = vmatprep.subr.bf16.mxu0 %v5390_v9 }
 0x701   : > { %4830 = vmatpush1.bf16.msra.mxu0 %v4829_v32  ;;  %v4883_v32 = vpack.c.bf16 %v4189_v59, %v4188_v23  ;;  %v3780_v23 = vld [vmem:[%s7095_s7 + $0x10] sm:$0xff]  ;;  %v3781_v59 = vld [vmem:[%s7095_s7 + $0x18] sm:$0xff] }
 0x702   : > { %4831 = vmatprep.subr.bf16.mxu0 %v5390_v9 }
 0x705   : > { %4833 = vmatpush1.bf16.msra.mxu0 %v4832_v15  ;;  %v4886_v15 = vpack.c.bf16 %v4191_v58, %v4190_v57 }
 0x706   : > { %4834 = vmatprep.subr.bf16.mxu0 %v5390_v9 }
 0x709   : > { %4836 = vmatpush1.bf16.msra.mxu0 %v4835_v17  ;;  %v4889_v17 = vpack.c.bf16 %v4193_v3, %v4192_v45  ;;  %v3782_v45 = vld [vmem:[#allocation16] sm:$0x1] }
 0x70a   : > { %4837 = vmatprep.subr.bf16.mxu0 %v5390_v9 }
 0x70d   : > { %4839 = vmatpush1.bf16.msra.mxu0 %v4838_v55  ;;  %v4892_v55 = vpack.c.bf16 %v4195_v44, %v4194_v18 }
 0x70e   : > { %4840 = vmatprep.subr.bf16.mxu0 %v5390_v9 }
 0x711   : > { %4842 = vmatpush1.bf16.msra.mxu0 %v4841_v6  ;;  %v4895_v6 = vpack.c.bf16 %v4197_v41, %v4196_v2 }
 0x712   : > { %4843 = vmatprep.subr.bf16.mxu0 %v5390_v9 }
 0x715   : > { %4845 = vmatpush1.bf16.msra.mxu0 %v4844_v21  ;;  %v6933_v21 = vld [vmem:[#allocation6 + $0x6] ss:$8 sm:$0x3] }
 0x716   : > { %4846 = vmatprep.subr.bf16.mxu0 %v5390_v9 }
 0x719   : > { %4848 = vmatpush1.bf16.msra.mxu0 %v4847_v50  ;;  %v3702_v50 = vrot.slane %v6933_v21, %v5791_v34  ;;  %v4205_v34 = vld [vmem:[%s7093_s5 + $0x570] sm:$0xff] }
 0x71a   : > { %4849 = vmatprep.subr.bf16.mxu0 %v5390_v9  ;;  %v4907_v10 = vpack.c.bf16 %v4206_v27, %v4205_v34 }
 0x71d   : > { %4851 = vmatpush1.bf16.msra.mxu0 %v4850_v49  ;;  %v4904_v49 = vpack.c.bf16 %v4204_v39, %v4203_v46 }
 0x71e   : > { %4852 = vmatprep.subr.bf16.mxu0 %v5390_v9 }
 0x721   : > { %4854 = vmatpush1.bf16.msra.mxu0 %v4853_v24  ;;  %v4207_v24 = vld [vmem:[%s7093_s5 + $0x580] sm:$0xff] }
 0x722   : > { %4855 = vmatprep.subr.bf16.mxu0 %v5390_v9  ;;  %v4910_v22 = vpack.c.bf16 %v4208_v25, %v4207_v24 }
 0x724   : > { %3543 = vmatmul.mubr.f32.vlgmr.msra.gmra.mrb[8].mxu0 %v3470_v53 }
 0x725   : > { %4857 = vmatpush1.bf16.msra.mxu0 %v4856_v20  ;;  %4198 = vmatprep.mubr.msk.f32.mxu0 %vm2088_vm11, %v3588_v4  ;;  %v4210_v20 = vld [vmem:[%s7093_s5 + $0x598] sm:$0xff]  ;;  %v4916_v4 = vpack.c.bf16 %v4212_v14, %v4211_v7 }
 0x726   : > { %4858 = vmatprep.subr.bf16.mxu0 %v5390_v9  ;;  %v4913_v53 = vpack.c.bf16 %v4210_v20, %v4209_v61 }
 0x729   : > { %4860 = vmatpush1.bf16.msra.mxu0 %v4859_v51  ;;  %v4213_v51 = vld [vmem:[%s7093_s5 + $0x5b0] sm:$0xff] }
 0x72a   : > { %4861 = vmatprep.subr.bf16.mxu0 %v5390_v9  ;;  %v4919_v1 = vpack.c.bf16 %v4214_v35, %v4213_v51 }
 0x72d   : > { %4863 = vmatpush1.bf16.msra.mxu0 %v4862_v48  ;;  %v4215_v48 = vld [vmem:[%s7093_s5 + $0x5c0] sm:$0xff] }
 0x72e   : > { %4864 = vmatprep.subr.bf16.mxu0 %v5390_v9  ;;  %v4922_v56 = vpack.c.bf16 %v4216_v52, %v4215_v48 }
 0x731   : > { %4866 = vmatpush1.bf16.msra.mxu0 %v4865_v63  ;;  %v4217_v63 = vld [vmem:[%s7093_s5 + $0x5d0] sm:$0xff] }
 0x732   : > { %4867 = vmatprep.subr.bf16.mxu0 %v5390_v9  ;;  %v4925_v11 = vpack.c.bf16 %v4218_v29, %v4217_v63 }
 0x735   : > { %4869 = vmatpush1.bf16.msra.mxu0 %v4868_v62  ;;  %v4219_v62 = vld [vmem:[%s7093_s5 + $0x5e0] sm:$0xff] }
 0x736   : > { %4870 = vmatprep.subr.bf16.mxu0 %v5390_v9  ;;  %v4928_v30 = vpack.c.bf16 %v4220_v43, %v4219_v62 }
 0x739   : > { %4872 = vmatpush1.bf16.msra.mxu0 %v4871_v38  ;;  %v4221_v38 = vld [vmem:[%s7093_s5 + $0x5f0] sm:$0xff] }
 0x73a   : > { %4873 = vmatprep.subr.bf16.mxu0 %v5390_v9  ;;  %v4931_v28 = vpack.c.bf16 %v4222_v54, %v4221_v38 }
 0x73d   : > { %4875 = vmatpush1.bf16.msra.mxu0 %v4874_v40  ;;  %v4223_v40 = vld [vmem:[%s7093_s5 + $0x600] sm:$0xff] }
 0x73e   : > { %4876 = vmatprep.subr.bf16.mxu0 %v5390_v9  ;;  %v4934_v36 = vpack.c.bf16 %v4224_v33, %v4223_v40 }
 0x741   : > { %4878 = vmatpush1.bf16.msra.mxu0 %v4877_v8  ;;  %v4225_v8 = vld [vmem:[%s7093_s5 + $0x610] sm:$0xff] }
 0x742   : > { %4879 = vmatprep.subr.bf16.mxu0 %v5390_v9  ;;  %v4937_v12 = vpack.c.bf16 %v4226_v42, %v4225_v8 }
 0x745   : > { %4881 = vmatpush1.bf16.msra.mxu0 %v4880_v13  ;;  %v3698_v13 = vrot.slane %v6933_v21, %v5786_v31 }
 0x746   : > { %4882 = vmatprep.subr.bf16.mxu0 %v5390_v9 }
 0x749   : > { %4884 = vmatpush1.bf16.msra.mxu0 %v4883_v32  ;;  %v4943_v32 = vpack.c.bf16 %v3781_v59, %v3780_v23 }
 0x74a   : > { %4885 = vmatprep.subr.bf16.mxu0 %v5390_v9 }
 0x74b   : > { %4944 = vmatpush3.bf16.msra.mxu1 %v4943_v32 }
 0x74d   : > { %4887 = vmatpush1.bf16.msra.mxu0 %v4886_v15 }
 0x74e   : > { %4888 = vmatprep.subr.bf16.mxu0 %v5390_v9 }
 0x751   : > { %4890 = vmatpush1.bf16.msra.mxu0 %v4889_v17 }
 0x752   : > { %4891 = vmatprep.subr.bf16.mxu0 %v5390_v9 }
 0x755   : > { %4893 = vmatpush1.bf16.msra.mxu0 %v4892_v55 }
 0x756   : > { %4894 = vmatprep.subr.bf16.mxu0 %v5390_v9 }
 0x759   : > { %4896 = vmatpush1.bf16.msra.mxu0 %v4895_v6 }
 0x75a   : > { %4897 = vmatprep.subr.bf16.mxu0 %v5390_v9 }
 0x75c   : > { %3657 = vmatmul.mubr.f32.vlgmr.msra.gmra.mrb[8].mxu0 %v3584_v60 }
 0x75d   : > { %4899 = vmatpush1.bf16.msra.mxu0 %v4898_v19  ;;  %4227 = vmatprep.mubr.msk.f32.mxu0 %vm2088_vm11, %v3702_v50 }
 0x75e   : > { %4900 = vmatprep.subr.bf16.mxu0 %v5390_v9 }
 0x761   : > { %4902 = vmatpush1.bf16.msra.mxu0 %v4901_v37 }
 0x762   : > { %4903 = vmatprep.subr.bf16.mxu0 %v5390_v9 }
 0x765   : > { %4905 = vmatpush1.bf16.msra.mxu0 %v4904_v49 }
 0x766   : > { %4906 = vmatprep.subr.bf16.mxu0 %v5390_v9 }
 0x769   : > { %4908 = vmatpush1.bf16.msra.mxu0 %v4907_v10 }
 0x76a   : > { %4909 = vmatprep.subr.bf16.mxu0 %v5390_v9 }
 0x76d   : > { %4911 = vmatpush1.bf16.msra.mxu0 %v4910_v22 }
 0x76e   : > { %4912 = vmatprep.subr.bf16.mxu0 %v5390_v9 }
 0x771   : > { %4914 = vmatpush1.bf16.msra.mxu0 %v4913_v53 }
 0x772   : > { %4915 = vmatprep.subr.bf16.mxu0 %v5390_v9 }
 0x775   : > { %4917 = vmatpush1.bf16.msra.mxu0 %v4916_v4 }
 0x776   : > { %4918 = vmatprep.subr.bf16.mxu0 %v5390_v9 }
 0x779   : > { %4920 = vmatpush1.bf16.msra.mxu0 %v4919_v1 }
 0x77a   : > { %4921 = vmatprep.subr.bf16.mxu0 %v5390_v9 }
 0x77d   : > { %4923 = vmatpush1.bf16.msra.mxu0 %v4922_v56 }
 0x77e   : > { %4924 = vmatprep.subr.bf16.mxu0 %v5390_v9 }
 0x781   : > { %4926 = vmatpush1.bf16.msra.mxu0 %v4925_v11 }
 0x782   : > { %4927 = vmatprep.subr.bf16.mxu0 %v5390_v9 }
 0x785   : > { %4929 = vmatpush1.bf16.msra.mxu0 %v4928_v30 }
 0x786   : > { %4930 = vmatprep.subr.bf16.mxu0 %v5390_v9 }
 0x789   : > { %4932 = vmatpush1.bf16.msra.mxu0 %v4931_v28 }
 0x78a   : > { %4933 = vmatprep.subr.bf16.mxu0 %v5390_v9 }
 0x78d   : > { %4935 = vmatpush1.bf16.msra.mxu0 %v4934_v36 }
 0x78e   : > { %4936 = vmatprep.subr.bf16.mxu0 %v5390_v9  ;;  %v2980_v9 = vld [vmem:[#allocation15] sm:$0x1] }
 0x791   : > { %4938 = vmatpush1.bf16.msra.mxu0 %v4937_v12 }
 0x794   : > { %3771 = vmatmul.mubr.f32.vlgmr.msra.gmra.mrb[8].mxu0 %v3698_v13 }
 0x867   : > { %v3772_v57 = vpop.f32.mrb[8].mxu0 }
 0x868   : > { %v4957_v58 = vadd.f32 %v3772_v57, %v2980_v9  ;;  %v3774_v15 = vpop.f32.mrb[9].mxu0 }
 0x86a   : > { %v3777_v31 = vmax.f32 %v4957_v58, 0.0 }
 0x86c   : > { %4247 = vmatmul.mubr.msk.f32.vlgmr.msra.gmra.mrb[24].mxu1 %vm3783_vm1, %v3777_v31 }
 0x93f   : > { %v3853_v3 = vpop.f32.mrb[24].mxu1 }
 0x940   : > { %v3854_v17 = vadd.f32 %v3853_v3, %v3782_v45  ;;  %v4248_v18 = vpop.f32.mrb[25].mxu1 }
 0x942   : > { %3858 = vst.msk [vmem:[%s404_s24] sm:$0x1] %vm3857_vm2, %v3854_v17 }
 0x943   : > { %5305 = shalt.err (!%p5302_p6)
}
 0x944   : > { %s5306_s17 = scalar_lea.hbm %s7046_s28, 16  ;;  %s5310_s27 = scalar_lea.hbm %s7097_s9, 32 }
 0x945   : > { %p5307_p5 = scmp.ne.s32.totalorder %s7046_s28, %s5306_s17  ;;  %p5311_p10 = scmp.lt.u32.totalorder %s7046_s28, %s7097_s9 }
 0x946   : > { %p5312_p2 = scmp.lt.u32.totalorder %s5310_s27, %s5306_s17  ;;  %p5314_p4 = scmp.lt.u32.totalorder %s5306_s17, %s7046_s28 }
 0x947   : > { %p5308_p9 = pnand %p5307_p5, %p7133_p7 }
 0x948   : > { %p5313_p3 = por %p5312_p2, %p5311_p10 }
 0x949   : > { %p5309_p12 = pneg %p5308_p9 }
 0x94a   : > { %p5315_p8 = por %p5314_p4, %p5313_p3 }
 0x94c   : > { %p5316_p11 = pnand %p5315_p8, %p5309_p12 }
 0x94e   : > { %5319 = shalt.err (!%p5316_p11)
}
 0x94f   : > { %5034 = dma.vmem_to_hbm [thread:$0]  (%p7133_p7), %s7048_s23, 16, %s7046_s28, %s3860_s4  }
 0x950 PF: > { %s7134_s25 = sld [smem:[#allocation24_spill]]  ;;  %s7135_s30 = sld [smem:[#allocation28_spill]] }
 0x951   : > { %p5071_p13 = scmp.ge.s32.totalorder %s5370_s12, 2 }
 0x956   : > { %s3884_s2 = sand.u32 1, %s7134_s25   ;;  %p7136_p1 = scmp.ne.s32.totalorder %s7135_s30, 0 }
 0x957   : > { %s3885_s26 = scalar_lea.sflag [#allocation9], %s3884_s2 }
 0x958   : > { %p5056_p0 = pnand %p5071_p13, %p7136_p1 }
 0x95a   : > { %5353 = dma.done.wait (!%p5056_p0), %s3885_s26, 16  }
 0x95b   : > { %5355 = vsyncadd (!%p5056_p0), %s3885_s26, 4294967280  ;;  %s7137_s12 = sld [smem:[#allocation26_spill]]  ;;  %s7138_s24 = sld [smem:[#allocation25_spill]] }
 0x95c   : > { %s7139_s11 = sld [smem:[#allocation27_spill]]  ;;  %s7140_s30 = smov %s5362_s10 }
 0x961   : > { %p23_p6 = scmp.ge.s32.totalorder %s7137_s12, 4   ;;  %s7141_s10 = smov %s7138_s24 }
 0x963   :  { %25 = sbr.rel (!%p23_p6) target bundleno = 10 (0xa), region = 152 }
 0x96a   :  { %3889 = vsyncpa [#allocation8], 1 }
 0x96b   :  { %3891 = vsyncpa [#allocation8 + $0x1], 1 }
 0x96c   :  { %3892 = vsyncpa [#allocation11], 1 }
 0x96d   :  { %3893 = vsyncpa [#allocation14], 1 }
 0x96e   :  { %3894 = vsyncpa [#allocation17], 1 }
 0x96f   :  { %3895 = vsyncpa [#allocation9], 1 }
 0x970   :  { %3897 = vsyncpa [#allocation9 + $0x1], 1 }

</bundles_post_ra>
